<compile_context>
chip_gen: v7x
topology: tpu7x:2x2x1
jax: 0.10.0
libtpu: 0.0.40
codegen_flags: <defaults>
</compile_context>

<pallas_src>
import functools
import numpy as np
import jax
import jax.numpy as jnp
from jax import lax
from jax.experimental import pallas as pl
from jax.experimental.pallas import tpu as pltpu


# Row-window bookkeeping for conv2 (a = ey + ky):
#   pool1_pad row (2*i + a) lives in parity slab ry = _RY[a] at slab row _DR[a] + i.
# Column offsets _DC / parities _RX are baked into the conv2 block weights.
_RY = (1, 0, 1, 0)
_DR = (0, 1, 1, 2)
_RX = (1, 0, 1, 0)
_DC = (0, 1, 1, 2)


# ------------------------------ fused kernel ------------------------------- #

def _mnist_fused_kernel(xdec_ref, m1f_ref, b1_ref, scat_ref, m2f_ref, b2_ref,
                        f1_ref, bf1_ref, wf2_ref, bf2_ref, out_ref, gs_ref):
    f32 = jnp.float32
    B = out_ref.shape[0]                       # images per grid step (batch-minor)

    # Row halo of the pooled-conv1 slab buffer must be zero every step (scratch is
    # uninitialised and the grid may be split across cores).
    zero_halo = jnp.zeros((B, 108), f32)
    for ry in range(2):
        gs_ref[ry, 0:B, :] = zero_halo
        gs_ref[ry, 8 * B:9 * B, :] = zero_halo
    b1 = b1_ref[...]                           # (1, 42)

    # ---- Stage 1: conv1 + bias + relu fused with 2x2 maxpool ---------------
    # xdec[0, s][m*B+b, ky*42 + t'*7 + n'] = xpad[b, 4m+s+ky, 4n'+t']   (ky fused in K)
    for ry in range(2):
        mval = [None, None]                                   # running max per rx
        for so in range(2):                                   # conv1 row parity 2ry+so
            xw = xdec_ref[0, 2 * ry + so]                     # (7B, 126)
            for rx in range(2):
                for to in range(2):                           # conv1 col parity 2rx+to
                    c1 = jnp.dot(xw, m1f_ref[2 * rx + to],
                                 preferred_element_type=f32)  # (7B, 42) cols (u,n)
                    mval[rx] = c1 if mval[rx] is None else jnp.maximum(mval[rx], c1)
        q0 = jnp.maximum(mval[0] + b1, 0.0)                   # pool1 parity (ry, 0)
        q1 = jnp.maximum(mval[1] + b1, 0.0)                   # pool1 parity (ry, 1)
        # 0/1 scatter matmul: (u*7+n) -> (rx*54 + u*9 + 1 + n), zero column halo.
        slab = (jnp.dot(q0, scat_ref[0], preferred_element_type=f32)
                + jnp.dot(q1, scat_ref[1], preferred_element_type=f32))   # (7B,108)
        gs_ref[ry, B:8 * B, :] = slab                          # aligned full store

    # ---- Stage 2: conv2 + bias + relu fused with 2x2 maxpool ---------------
    p2m = None
    for ey in range(2):
        for ex in range(2):
            acc = None
            for ky in range(3):
                a = ey + ky
                slab = gs_ref[_RY[a], _DR[a] * B:(_DR[a] + 7) * B, :]      # (7B,108)
                term = jnp.dot(slab, m2f_ref[ex, ky],
                               preferred_element_type=f32)                 # (7B,56)
                acc = term if acc is None else acc + term
            p2m = acc if p2m is None else jnp.maximum(p2m, acc)            # fold max
    p2 = jnp.maximum(p2m + b2_ref[...], 0.0)                   # (7B,56) cols (j,c)

    # ---- Stage 3: fc1 + relu + fc2 (all in vregs) ---------------------------
    h = None
    for i in range(7):
        term = jnp.dot(p2[i * B:(i + 1) * B, :], f1_ref[i],
                       preferred_element_type=f32)             # (B, 32)
        h = term if h is None else h + term
    h = jnp.maximum(h + bf1_ref[...], 0.0)
    out = jnp.dot(h, wf2_ref[...], preferred_element_type=f32) + bf2_ref[...]
    out_ref[...] = out.astype(out_ref.dtype)


# --------------------- wrapper: layout / weight packing -------------------- #

def _build_operands(x_nchw, params, B):
    f32 = jnp.float32
    hi = lax.Precision.HIGHEST
    N = x_nchw.shape[0]
    G = -(-N // B)
    Np = G * B
    x = jnp.pad(x_nchw.astype(f32), ((0, Np - N), (0, 0), (0, 0), (0, 0)))

    # phase-split padded input, conv1 ky-window fused into the lane (K) axis
    xp = jnp.pad(x[:, 0], ((0, 0), (1, 1), (1, 1)))                     # (Np,30,30)
    g0 = []
    for s in range(6):
        cols = [xp[:, s:s + 25:4, t:t + 25:4] for t in range(6)]        # (Np,7,7)
        g0.append(jnp.stack(cols, axis=2).reshape(Np, 7, 42))
    xw = [jnp.concatenate([g0[s], g0[s + 1], g0[s + 2]], axis=-1) for s in range(4)]
    xdec = jnp.stack(xw, axis=1)                                        # (Np,4,7,126)
    # m-major / batch-minor rows inside each block of B images
    xdec = xdec.reshape(G, B, 4, 7, 126).transpose(0, 2, 3, 1, 4)
    xdec = xdec.reshape(G, 4, 7 * B, 126)

    # conv1 block weights, ky fused into K: m1f[t][ky*42+t'*7+n', u*7+n]
    w1 = params["w1"][:, 0, :, :].astype(f32)                           # (6,3,3)
    eye7 = jnp.eye(7, dtype=f32)
    ind_t = jnp.asarray(
        np.arange(6)[:, None, None]
        == np.arange(4)[None, :, None] + np.arange(3)[None, None, :], f32)
    m1 = jnp.einsum('ptk,uyk,ab->ytpaub', ind_t, w1, eye7,
                    precision=hi).reshape(3, 4, 42, 42)
    m1f = jnp.transpose(m1, (1, 0, 2, 3)).reshape(4, 126, 42)
    b1row = jnp.repeat(params["b1"].astype(f32), 7).reshape(1, 42)

    # 0/1 scatter matrices: pooled conv1 (u*7+n) -> zero-padded slab (rx*54+u*9+1+n)
    scat_np = np.zeros((2, 42, 108), np.float32)
    for rx in range(2):
        for u in range(6):
            for n in range(7):
                scat_np[rx, u * 7 + n, rx * 54 + u * 9 + 1 + n] = 1.0
    scat = jnp.asarray(scat_np)

    # conv2 block weights: column offsets + rx parity fused into the K rows,
    # kx contributions sharing (rxb, dest) pre-summed.  m2f[ex, ky]: (108, 56)
    T = np.zeros((2, 3, 2, 9, 7), np.float32)                 # [ex, kx, rxb, p, j]
    for ex in range(2):
        for kx in range(3):
            bb = ex + kx
            for j in range(7):
                T[ex, kx, _RX[bb], j + _DC[bb], j] = 1.0
    w2 = params["w2"].astype(f32)                                       # (8,6,3,3)
    m2f = jnp.einsum('xkrpj,cuyk->xyrupjc', jnp.asarray(T), w2,
                     precision=hi).reshape(2, 3, 108, 56)
    b2row = jnp.tile(params["b2"].astype(f32), 7).reshape(1, 56)

    # fc weights (torch NCHW flatten order: feature = c*49 + i*7 + j)
    f1 = params["wf1"].astype(f32).reshape(32, 8, 7, 7)
    f1 = jnp.transpose(f1, (2, 3, 1, 0)).reshape(7, 56, 32)
    bf1 = params["bf1"].astype(f32).reshape(1, 32)
    wf2t = params["wf2"].astype(f32).T                                  # (32,10)
    bf2 = params["bf2"].astype(f32).reshape(1, 10)
    return G, Np, (xdec, m1f, b1row, scat, m2f, b2row, f1, bf1, wf2t, bf2)


@functools.partial(jax.jit, static_argnames=("block_batch",))
def mnist_cnn_forward(x_nchw, params, block_batch=8):
    B = block_batch
    assert B % 8 == 0, "block_batch must be a multiple of 8 (sublane alignment)"
    N = x_nchw.shape[0]
    G, Np, ops = _build_operands(x_nchw, params, B)
    xdec, m1f, b1row, scat, m2f, b2row, f1, bf1, wf2t, bf2 = ops

    flops = G * 2 * (16 * (7 * B) * 126 * 42 + 4 * (7 * B) * 42 * 108
                     + 12 * (7 * B) * 108 * 56 + 7 * B * 56 * 32 + B * 32 * 10)
    bytes_accessed_est = 4 * (sum(int(o.size) for o in ops) + Np * 10)

    out = pl.pallas_call(
        _mnist_fused_kernel,
        out_shape=jax.ShapeDtypeStruct((Np, 10), jnp.float32),
        grid=(G,),
        in_specs=[
            pl.BlockSpec((1, 4, 7 * B, 126), lambda i: (i, 0, 0, 0)),   # input phases
            pl.BlockSpec((4, 126, 42), lambda i: (0, 0, 0)),            # conv1 blocks
            pl.BlockSpec((1, 42), lambda i: (0, 0)),                    # b1 pattern
            pl.BlockSpec((2, 42, 108), lambda i: (0, 0, 0)),            # scatter mats
            pl.BlockSpec((2, 3, 108, 56), lambda i: (0, 0, 0, 0)),      # conv2 blocks
            pl.BlockSpec((1, 56), lambda i: (0, 0)),                    # b2 pattern
            pl.BlockSpec((7, 56, 32), lambda i: (0, 0, 0)),             # fc1 blocks
            pl.BlockSpec((1, 32), lambda i: (0, 0)),                    # bf1
            pl.BlockSpec((32, 10), lambda i: (0, 0)),                   # fc2 weight^T
            pl.BlockSpec((1, 10), lambda i: (0, 0)),                    # bf2
        ],
        out_specs=pl.BlockSpec((B, 10), lambda i: (i, 0)),
        scratch_shapes=[pltpu.VMEM((2, 9 * B, 108), jnp.float32)],      # pool1 slabs
        compiler_params=pltpu.CompilerParams(
            dimension_semantics=("parallel",)),
        cost_estimate=pl.CostEstimate(flops=flops, transcendentals=0,
                                      bytes_accessed=bytes_accessed_est),
    )(xdec, m1f, b1row, scat, m2f, b2row, f1, bf1, wf2t, bf2)
    return out[:N]


# --------------------------- deterministic params -------------------------- #

def init_params(key):
    def uniform(k, shape, fan_in):
        bound = 1.0 / np.sqrt(fan_in)
        return jax.random.uniform(k, shape, jnp.float32, -bound, bound)
    ks = jax.random.split(key, 8)
    return dict(
        w1=uniform(ks[0], (6, 1, 3, 3), 1 * 9),  b1=uniform(ks[1], (6,), 1 * 9),
        w2=uniform(ks[2], (8, 6, 3, 3), 6 * 9),  b2=uniform(ks[3], (8,), 6 * 9),
        wf1=uniform(ks[4], (32, 392), 392),      bf1=uniform(ks[5], (32,), 392),
        wf2=uniform(ks[6], (10, 32), 32),        bf2=uniform(ks[7], (10,), 32),
    )


# --------------------------- pure-JAX reference ---------------------------- #

def reference_forward(x_nchw, params):
    prec = lax.Precision.HIGHEST

    def conv(x, w, b):
        y = lax.conv_general_dilated(
            x, w, window_strides=(1, 1), padding=((1, 1), (1, 1)),
            dimension_numbers=("NCHW", "OIHW", "NCHW"), precision=prec)
        return y + b[None, :, None, None]

    def pool(x):
        return lax.reduce_window(x, -jnp.inf, lax.max,
                                 (1, 1, 2, 2), (1, 1, 2, 2), "VALID")

    y = pool(jnp.maximum(conv(x_nchw, params["w1"], params["b1"]), 0.0))
    y = pool(jnp.maximum(conv(y, params["w2"], params["b2"]), 0.0))
    y = y.reshape(y.shape[0], 8 * 7 * 7)
    y = jnp.maximum(jnp.dot(y, params["wf1"].T, precision=prec) + params["bf1"], 0.0)
    y = jnp.dot(y, params["wf2"].T, precision=prec) + params["bf2"]
    return y


# ---------------------------------- main ----------------------------------- #

if __name__ == "__main__":
    key = jax.random.PRNGKey(0)
    kx, kp = jax.random.split(key)
    x = jax.random.normal(kx, (16, 1, 28, 28), jnp.float32)   # MNIST-shaped NCHW
    params = init_params(kp)

    out = jax.block_until_ready(mnist_cnn_forward(x, params, block_batch=8))
    ref = jax.block_until_ready(reference_forward(x, params))

    assert out.shape == (16, 10) and out.dtype == jnp.float32
    np.testing.assert_allclose(np.asarray(out), np.asarray(ref), rtol=2e-3, atol=2e-3)
    print("KERNEL_OK")
</pallas_src>

<mosaic_0001>
module attributes {stable_mosaic.version = 11 : i64} {
  func.func @_mnist_fused_kernel(%arg0: i32, %arg1: memref<1x4x56x126xf32, #tpu.memory_space<vmem>>, %arg2: memref<4x126x42xf32, #tpu.memory_space<vmem>>, %arg3: memref<1x42xf32, #tpu.memory_space<vmem>>, %arg4: memref<2x42x108xf32, #tpu.memory_space<vmem>>, %arg5: memref<2x3x108x56xf32, #tpu.memory_space<vmem>>, %arg6: memref<1x56xf32, #tpu.memory_space<vmem>>, %arg7: memref<7x56x32xf32, #tpu.memory_space<vmem>>, %arg8: memref<1x32xf32, #tpu.memory_space<vmem>>, %arg9: memref<32x10xf32, #tpu.memory_space<vmem>>, %arg10: memref<1x10xf32, #tpu.memory_space<vmem>>, %arg11: memref<8x10xf32, #tpu.memory_space<vmem>>, %arg12: memref<2x72x108xf32, #tpu.memory_space<vmem>>) attributes {dimension_semantics = [#tpu.dimension_semantics<parallel>], iteration_bounds = array<i64: 2>, scalar_prefetch = 0 : i64, scratch_operands = 1 : i64, tpu.core_type = #tpu.core_type<tc>, window_params = [{transform_indices = @transform_0, window_bounds = array<i64: 1, 4, 56, 126>}, {pipeline_mode = #tpu.pipeline_mode<synchronous>, transform_indices = @transform_1, window_bounds = array<i64: 4, 126, 42>}, {pipeline_mode = #tpu.pipeline_mode<synchronous>, transform_indices = @transform_2, window_bounds = array<i64: 1, 42>}, {pipeline_mode = #tpu.pipeline_mode<synchronous>, transform_indices = @transform_3, window_bounds = array<i64: 2, 42, 108>}, {pipeline_mode = #tpu.pipeline_mode<synchronous>, transform_indices = @transform_4, window_bounds = array<i64: 2, 3, 108, 56>}, {pipeline_mode = #tpu.pipeline_mode<synchronous>, transform_indices = @transform_5, window_bounds = array<i64: 1, 56>}, {pipeline_mode = #tpu.pipeline_mode<synchronous>, transform_indices = @transform_6, window_bounds = array<i64: 7, 56, 32>}, {pipeline_mode = #tpu.pipeline_mode<synchronous>, transform_indices = @transform_7, window_bounds = array<i64: 1, 32>}, {pipeline_mode = #tpu.pipeline_mode<synchronous>, transform_indices = @transform_8, window_bounds = array<i64: 32, 10>}, {pipeline_mode = #tpu.pipeline_mode<synchronous>, transform_indices = @transform_9, window_bounds = array<i64: 1, 10>}, {transform_indices = @transform_10, window_bounds = array<i64: 8, 10>}]} {
    %cst = arith.constant 0.000000e+00 : f32
    %0 = vector.broadcast %cst : f32 to vector<8x108xf32>
    %c0 = arith.constant 0 : index
    %c0_0 = arith.constant 0 : index
    %c0_1 = arith.constant 0 : index
    %1 = vector.load %arg12[%c0, %c0_0, %c0_1] : memref<2x72x108xf32, #tpu.memory_space<vmem>>, vector<1x8x108xf32>
    %2 = vector.shape_cast %1 : vector<1x8x108xf32> to vector<8x108xf32>
    %3 = vector.shape_cast %0 : vector<8x108xf32> to vector<1x8x108xf32>
    tpu.vector_store %arg12[%c0, %c0_0, %c0_1], %3 {strides = array<i32>} : memref<2x72x108xf32, #tpu.memory_space<vmem>>, vector<1x8x108xf32>,
    %c0_2 = arith.constant 0 : index
    %c64 = arith.constant 64 : index
    %c0_3 = arith.constant 0 : index
    %4 = vector.load %arg12[%c0_2, %c64, %c0_3] : memref<2x72x108xf32, #tpu.memory_space<vmem>>, vector<1x8x108xf32>
    %5 = vector.shape_cast %4 : vector<1x8x108xf32> to vector<8x108xf32>
    %6 = vector.shape_cast %0 : vector<8x108xf32> to vector<1x8x108xf32>
    tpu.vector_store %arg12[%c0_2, %c64, %c0_3], %6 {strides = array<i32>} : memref<2x72x108xf32, #tpu.memory_space<vmem>>, vector<1x8x108xf32>,
    %c1 = arith.constant 1 : index
    %c0_4 = arith.constant 0 : index
    %c0_5 = arith.constant 0 : index
    %7 = vector.load %arg12[%c1, %c0_4, %c0_5] : memref<2x72x108xf32, #tpu.memory_space<vmem>>, vector<1x8x108xf32>
    %8 = vector.shape_cast %7 : vector<1x8x108xf32> to vector<8x108xf32>
    %9 = vector.shape_cast %0 : vector<8x108xf32> to vector<1x8x108xf32>
    tpu.vector_store %arg12[%c1, %c0_4, %c0_5], %9 {strides = array<i32>} : memref<2x72x108xf32, #tpu.memory_space<vmem>>, vector<1x8x108xf32>,
    %c1_6 = arith.constant 1 : index
    %c64_7 = arith.constant 64 : index
    %c0_8 = arith.constant 0 : index
    %10 = vector.load %arg12[%c1_6, %c64_7, %c0_8] : memref<2x72x108xf32, #tpu.memory_space<vmem>>, vector<1x8x108xf32>
    %11 = vector.shape_cast %10 : vector<1x8x108xf32> to vector<8x108xf32>
    %12 = vector.shape_cast %0 : vector<8x108xf32> to vector<1x8x108xf32>
    tpu.vector_store %arg12[%c1_6, %c64_7, %c0_8], %12 {strides = array<i32>} : memref<2x72x108xf32, #tpu.memory_space<vmem>>, vector<1x8x108xf32>,
    %c0_9 = arith.constant 0 : index
    %c0_10 = arith.constant 0 : index
    %13 = vector.load %arg3[%c0_9, %c0_10] : memref<1x42xf32, #tpu.memory_space<vmem>>, vector<1x42xf32>
    %c0_11 = arith.constant 0 : index
    %c0_12 = arith.constant 0 : index
    %c0_13 = arith.constant 0 : index
    %c0_14 = arith.constant 0 : index
    %14 = vector.load %arg1[%c0_11, %c0_12, %c0_13, %c0_14] : memref<1x4x56x126xf32, #tpu.memory_space<vmem>>, vector<1x1x56x126xf32>
    %15 = vector.shape_cast %14 : vector<1x1x56x126xf32> to vector<56x126xf32>
    %c0_15 = arith.constant 0 : index
    %c0_16 = arith.constant 0 : index
    %c0_17 = arith.constant 0 : index
    %16 = vector.load %arg2[%c0_15, %c0_16, %c0_17] : memref<4x126x42xf32, #tpu.memory_space<vmem>>, vector<1x126x42xf32>
    %17 = vector.shape_cast %16 : vector<1x126x42xf32> to vector<126x42xf32>
    %cst_18 = arith.constant dense<0.000000e+00> : vector<56x42xf32>
    %18 = tpu.matmul %15, %17, %cst_18 {dimension_numbers = #tpu.dot_dimension_numbers<[1], [0], [0], [1], [0, 0, 1, 1], [], []>} : vector<56x126xf32>, vector<126x42xf32>, vector<56x42xf32> -> vector<56x42xf32>
    %c1_19 = arith.constant 1 : index
    %c0_20 = arith.constant 0 : index
    %c0_21 = arith.constant 0 : index
    %19 = vector.load %arg2[%c1_19, %c0_20, %c0_21] : memref<4x126x42xf32, #tpu.memory_space<vmem>>, vector<1x126x42xf32>
    %20 = vector.shape_cast %19 : vector<1x126x42xf32> to vector<126x42xf32>
    %cst_22 = arith.constant dense<0.000000e+00> : vector<56x42xf32>
    %21 = tpu.matmul %15, %20, %cst_22 {dimension_numbers = #tpu.dot_dimension_numbers<[1], [0], [0], [1], [0, 0, 1, 1], [], []>} : vector<56x126xf32>, vector<126x42xf32>, vector<56x42xf32> -> vector<56x42xf32>
    %22 = arith.maximumf %18, %21 : vector<56x42xf32>
    %c2 = arith.constant 2 : index
    %c0_23 = arith.constant 0 : index
    %c0_24 = arith.constant 0 : index
    %23 = vector.load %arg2[%c2, %c0_23, %c0_24] : memref<4x126x42xf32, #tpu.memory_space<vmem>>, vector<1x126x42xf32>
    %24 = vector.shape_cast %23 : vector<1x126x42xf32> to vector<126x42xf32>
    %cst_25 = arith.constant dense<0.000000e+00> : vector<56x42xf32>
    %25 = tpu.matmul %15, %24, %cst_25 {dimension_numbers = #tpu.dot_dimension_numbers<[1], [0], [0], [1], [0, 0, 1, 1], [], []>} : vector<56x126xf32>, vector<126x42xf32>, vector<56x42xf32> -> vector<56x42xf32>
    %c3 = arith.constant 3 : index
    %c0_26 = arith.constant 0 : index
    %c0_27 = arith.constant 0 : index
    %26 = vector.load %arg2[%c3, %c0_26, %c0_27] : memref<4x126x42xf32, #tpu.memory_space<vmem>>, vector<1x126x42xf32>
    %27 = vector.shape_cast %26 : vector<1x126x42xf32> to vector<126x42xf32>
    %cst_28 = arith.constant dense<0.000000e+00> : vector<56x42xf32>
    %28 = tpu.matmul %15, %27, %cst_28 {dimension_numbers = #tpu.dot_dimension_numbers<[1], [0], [0], [1], [0, 0, 1, 1], [], []>} : vector<56x126xf32>, vector<126x42xf32>, vector<56x42xf32> -> vector<56x42xf32>
    %29 = arith.maximumf %25, %28 : vector<56x42xf32>
    %c0_29 = arith.constant 0 : index
    %c1_30 = arith.constant 1 : index
    %c0_31 = arith.constant 0 : index
    %c0_32 = arith.constant 0 : index
    %30 = vector.load %arg1[%c0_29, %c1_30, %c0_31, %c0_32] : memref<1x4x56x126xf32, #tpu.memory_space<vmem>>, vector<1x1x56x126xf32>
    %31 = vector.shape_cast %30 : vector<1x1x56x126xf32> to vector<56x126xf32>
    %c0_33 = arith.constant 0 : index
    %c0_34 = arith.constant 0 : index
    %c0_35 = arith.constant 0 : index
    %32 = vector.load %arg2[%c0_33, %c0_34, %c0_35] : memref<4x126x42xf32, #tpu.memory_space<vmem>>, vector<1x126x42xf32>
    %33 = vector.shape_cast %32 : vector<1x126x42xf32> to vector<126x42xf32>
    %cst_36 = arith.constant dense<0.000000e+00> : vector<56x42xf32>
    %34 = tpu.matmul %31, %33, %cst_36 {dimension_numbers = #tpu.dot_dimension_numbers<[1], [0], [0], [1], [0, 0, 1, 1], [], []>} : vector<56x126xf32>, vector<126x42xf32>, vector<56x42xf32> -> vector<56x42xf32>
    %35 = arith.maximumf %22, %34 : vector<56x42xf32>
    %c1_37 = arith.constant 1 : index
    %c0_38 = arith.constant 0 : index
    %c0_39 = arith.constant 0 : index
    %36 = vector.load %arg2[%c1_37, %c0_38, %c0_39] : memref<4x126x42xf32, #tpu.memory_space<vmem>>, vector<1x126x42xf32>
    %37 = vector.shape_cast %36 : vector<1x126x42xf32> to vector<126x42xf32>
    %cst_40 = arith.constant dense<0.000000e+00> : vector<56x42xf32>
    %38 = tpu.matmul %31, %37, %cst_40 {dimension_numbers = #tpu.dot_dimension_numbers<[1], [0], [0], [1], [0, 0, 1, 1], [], []>} : vector<56x126xf32>, vector<126x42xf32>, vector<56x42xf32> -> vector<56x42xf32>
    %39 = arith.maximumf %35, %38 : vector<56x42xf32>
    %c2_41 = arith.constant 2 : index
    %c0_42 = arith.constant 0 : index
    %c0_43 = arith.constant 0 : index
    %40 = vector.load %arg2[%c2_41, %c0_42, %c0_43] : memref<4x126x42xf32, #tpu.memory_space<vmem>>, vector<1x126x42xf32>
    %41 = vector.shape_cast %40 : vector<1x126x42xf32> to vector<126x42xf32>
    %cst_44 = arith.constant dense<0.000000e+00> : vector<56x42xf32>
    %42 = tpu.matmul %31, %41, %cst_44 {dimension_numbers = #tpu.dot_dimension_numbers<[1], [0], [0], [1], [0, 0, 1, 1], [], []>} : vector<56x126xf32>, vector<126x42xf32>, vector<56x42xf32> -> vector<56x42xf32>
    %43 = arith.maximumf %29, %42 : vector<56x42xf32>
    %c3_45 = arith.constant 3 : index
    %c0_46 = arith.constant 0 : index
    %c0_47 = arith.constant 0 : index
    %44 = vector.load %arg2[%c3_45, %c0_46, %c0_47] : memref<4x126x42xf32, #tpu.memory_space<vmem>>, vector<1x126x42xf32>
    %45 = vector.shape_cast %44 : vector<1x126x42xf32> to vector<126x42xf32>
    %cst_48 = arith.constant dense<0.000000e+00> : vector<56x42xf32>
    %46 = tpu.matmul %31, %45, %cst_48 {dimension_numbers = #tpu.dot_dimension_numbers<[1], [0], [0], [1], [0, 0, 1, 1], [], []>} : vector<56x126xf32>, vector<126x42xf32>, vector<56x42xf32> -> vector<56x42xf32>
    %47 = arith.maximumf %43, %46 : vector<56x42xf32>
    %48 = vector.broadcast %13 : vector<1x42xf32> to vector<56x42xf32>
    %49 = arith.addf %39, %48 : vector<56x42xf32>
    %cst_49 = arith.constant 0.000000e+00 : f32
    %50 = vector.broadcast %cst_49 : f32 to vector<56x42xf32>
    %51 = arith.maximumf %49, %50 : vector<56x42xf32>
    %52 = vector.broadcast %13 : vector<1x42xf32> to vector<56x42xf32>
    %53 = arith.addf %47, %52 : vector<56x42xf32>
    %cst_50 = arith.constant 0.000000e+00 : f32
    %54 = vector.broadcast %cst_50 : f32 to vector<56x42xf32>
    %55 = arith.maximumf %53, %54 : vector<56x42xf32>
    %c0_51 = arith.constant 0 : index
    %c0_52 = arith.constant 0 : index
    %c0_53 = arith.constant 0 : index
    %56 = vector.load %arg4[%c0_51, %c0_52, %c0_53] : memref<2x42x108xf32, #tpu.memory_space<vmem>>, vector<1x42x108xf32>
    %57 = vector.shape_cast %56 : vector<1x42x108xf32> to vector<42x108xf32>
    %cst_54 = arith.constant dense<0.000000e+00> : vector<56x108xf32>
    %58 = tpu.matmul %51, %57, %cst_54 {dimension_numbers = #tpu.dot_dimension_numbers<[1], [0], [0], [1], [0, 0, 1, 1], [], []>} : vector<56x42xf32>, vector<42x108xf32>, vector<56x108xf32> -> vector<56x108xf32>
    %c1_55 = arith.constant 1 : index
    %c0_56 = arith.constant 0 : index
    %c0_57 = arith.constant 0 : index
    %59 = vector.load %arg4[%c1_55, %c0_56, %c0_57] : memref<2x42x108xf32, #tpu.memory_space<vmem>>, vector<1x42x108xf32>
    %60 = vector.shape_cast %59 : vector<1x42x108xf32> to vector<42x108xf32>
    %cst_58 = arith.constant dense<0.000000e+00> : vector<56x108xf32>
    %61 = tpu.matmul %55, %60, %cst_58 {dimension_numbers = #tpu.dot_dimension_numbers<[1], [0], [0], [1], [0, 0, 1, 1], [], []>} : vector<56x42xf32>, vector<42x108xf32>, vector<56x108xf32> -> vector<56x108xf32>
    %62 = arith.addf %58, %61 : vector<56x108xf32>
    %c0_59 = arith.constant 0 : index
    %c8 = arith.constant 8 : index
    %c0_60 = arith.constant 0 : index
    %63 = vector.load %arg12[%c0_59, %c8, %c0_60] : memref<2x72x108xf32, #tpu.memory_space<vmem>>, vector<1x56x108xf32>
    %64 = vector.shape_cast %63 : vector<1x56x108xf32> to vector<56x108xf32>
    %65 = vector.shape_cast %62 : vector<56x108xf32> to vector<1x56x108xf32>
    tpu.vector_store %arg12[%c0_59, %c8, %c0_60], %65 {strides = array<i32>} : memref<2x72x108xf32, #tpu.memory_space<vmem>>, vector<1x56x108xf32>,
    %c0_61 = arith.constant 0 : index
    %c2_62 = arith.constant 2 : index
    %c0_63 = arith.constant 0 : index
    %c0_64 = arith.constant 0 : index
    %66 = vector.load %arg1[%c0_61, %c2_62, %c0_63, %c0_64] : memref<1x4x56x126xf32, #tpu.memory_space<vmem>>, vector<1x1x56x126xf32>
    %67 = vector.shape_cast %66 : vector<1x1x56x126xf32> to vector<56x126xf32>
    %c0_65 = arith.constant 0 : index
    %c0_66 = arith.constant 0 : index
    %c0_67 = arith.constant 0 : index
    %68 = vector.load %arg2[%c0_65, %c0_66, %c0_67] : memref<4x126x42xf32, #tpu.memory_space<vmem>>, vector<1x126x42xf32>
    %69 = vector.shape_cast %68 : vector<1x126x42xf32> to vector<126x42xf32>
    %cst_68 = arith.constant dense<0.000000e+00> : vector<56x42xf32>
    %70 = tpu.matmul %67, %69, %cst_68 {dimension_numbers = #tpu.dot_dimension_numbers<[1], [0], [0], [1], [0, 0, 1, 1], [], []>} : vector<56x126xf32>, vector<126x42xf32>, vector<56x42xf32> -> vector<56x42xf32>
    %c1_69 = arith.constant 1 : index
    %c0_70 = arith.constant 0 : index
    %c0_71 = arith.constant 0 : index
    %71 = vector.load %arg2[%c1_69, %c0_70, %c0_71] : memref<4x126x42xf32, #tpu.memory_space<vmem>>, vector<1x126x42xf32>
    %72 = vector.shape_cast %71 : vector<1x126x42xf32> to vector<126x42xf32>
    %cst_72 = arith.constant dense<0.000000e+00> : vector<56x42xf32>
    %73 = tpu.matmul %67, %72, %cst_72 {dimension_numbers = #tpu.dot_dimension_numbers<[1], [0], [0], [1], [0, 0, 1, 1], [], []>} : vector<56x126xf32>, vector<126x42xf32>, vector<56x42xf32> -> vector<56x42xf32>
    %74 = arith.maximumf %70, %73 : vector<56x42xf32>
    %c2_73 = arith.constant 2 : index
    %c0_74 = arith.constant 0 : index
    %c0_75 = arith.constant 0 : index
    %75 = vector.load %arg2[%c2_73, %c0_74, %c0_75] : memref<4x126x42xf32, #tpu.memory_space<vmem>>, vector<1x126x42xf32>
    %76 = vector.shape_cast %75 : vector<1x126x42xf32> to vector<126x42xf32>
    %cst_76 = arith.constant dense<0.000000e+00> : vector<56x42xf32>
    %77 = tpu.matmul %67, %76, %cst_76 {dimension_numbers = #tpu.dot_dimension_numbers<[1], [0], [0], [1], [0, 0, 1, 1], [], []>} : vector<56x126xf32>, vector<126x42xf32>, vector<56x42xf32> -> vector<56x42xf32>
    %c3_77 = arith.constant 3 : index
    %c0_78 = arith.constant 0 : index
    %c0_79 = arith.constant 0 : index
    %78 = vector.load %arg2[%c3_77, %c0_78, %c0_79] : memref<4x126x42xf32, #tpu.memory_space<vmem>>, vector<1x126x42xf32>
    %79 = vector.shape_cast %78 : vector<1x126x42xf32> to vector<126x42xf32>
    %cst_80 = arith.constant dense<0.000000e+00> : vector<56x42xf32>
    %80 = tpu.matmul %67, %79, %cst_80 {dimension_numbers = #tpu.dot_dimension_numbers<[1], [0], [0], [1], [0, 0, 1, 1], [], []>} : vector<56x126xf32>, vector<126x42xf32>, vector<56x42xf32> -> vector<56x42xf32>
    %81 = arith.maximumf %77, %80 : vector<56x42xf32>
    %c0_81 = arith.constant 0 : index
    %c3_82 = arith.constant 3 : index
    %c0_83 = arith.constant 0 : index
    %c0_84 = arith.constant 0 : index
    %82 = vector.load %arg1[%c0_81, %c3_82, %c0_83, %c0_84] : memref<1x4x56x126xf32, #tpu.memory_space<vmem>>, vector<1x1x56x126xf32>
    %83 = vector.shape_cast %82 : vector<1x1x56x126xf32> to vector<56x126xf32>
    %c0_85 = arith.constant 0 : index
    %c0_86 = arith.constant 0 : index
    %c0_87 = arith.constant 0 : index
    %84 = vector.load %arg2[%c0_85, %c0_86, %c0_87] : memref<4x126x42xf32, #tpu.memory_space<vmem>>, vector<1x126x42xf32>
    %85 = vector.shape_cast %84 : vector<1x126x42xf32> to vector<126x42xf32>
    %cst_88 = arith.constant dense<0.000000e+00> : vector<56x42xf32>
    %86 = tpu.matmul %83, %85, %cst_88 {dimension_numbers = #tpu.dot_dimension_numbers<[1], [0], [0], [1], [0, 0, 1, 1], [], []>} : vector<56x126xf32>, vector<126x42xf32>, vector<56x42xf32> -> vector<56x42xf32>
    %87 = arith.maximumf %74, %86 : vector<56x42xf32>
    %c1_89 = arith.constant 1 : index
    %c0_90 = arith.constant 0 : index
    %c0_91 = arith.constant 0 : index
    %88 = vector.load %arg2[%c1_89, %c0_90, %c0_91] : memref<4x126x42xf32, #tpu.memory_space<vmem>>, vector<1x126x42xf32>
    %89 = vector.shape_cast %88 : vector<1x126x42xf32> to vector<126x42xf32>
    %cst_92 = arith.constant dense<0.000000e+00> : vector<56x42xf32>
    %90 = tpu.matmul %83, %89, %cst_92 {dimension_numbers = #tpu.dot_dimension_numbers<[1], [0], [0], [1], [0, 0, 1, 1], [], []>} : vector<56x126xf32>, vector<126x42xf32>, vector<56x42xf32> -> vector<56x42xf32>
    %91 = arith.maximumf %87, %90 : vector<56x42xf32>
    %c2_93 = arith.constant 2 : index
    %c0_94 = arith.constant 0 : index
    %c0_95 = arith.constant 0 : index
    %92 = vector.load %arg2[%c2_93, %c0_94, %c0_95] : memref<4x126x42xf32, #tpu.memory_space<vmem>>, vector<1x126x42xf32>
    %93 = vector.shape_cast %92 : vector<1x126x42xf32> to vector<126x42xf32>
    %cst_96 = arith.constant dense<0.000000e+00> : vector<56x42xf32>
    %94 = tpu.matmul %83, %93, %cst_96 {dimension_numbers = #tpu.dot_dimension_numbers<[1], [0], [0], [1], [0, 0, 1, 1], [], []>} : vector<56x126xf32>, vector<126x42xf32>, vector<56x42xf32> -> vector<56x42xf32>
    %95 = arith.maximumf %81, %94 : vector<56x42xf32>
    %c3_97 = arith.constant 3 : index
    %c0_98 = arith.constant 0 : index
    %c0_99 = arith.constant 0 : index
    %96 = vector.load %arg2[%c3_97, %c0_98, %c0_99] : memref<4x126x42xf32, #tpu.memory_space<vmem>>, vector<1x126x42xf32>
    %97 = vector.shape_cast %96 : vector<1x126x42xf32> to vector<126x42xf32>
    %cst_100 = arith.constant dense<0.000000e+00> : vector<56x42xf32>
    %98 = tpu.matmul %83, %97, %cst_100 {dimension_numbers = #tpu.dot_dimension_numbers<[1], [0], [0], [1], [0, 0, 1, 1], [], []>} : vector<56x126xf32>, vector<126x42xf32>, vector<56x42xf32> -> vector<56x42xf32>
    %99 = arith.maximumf %95, %98 : vector<56x42xf32>
    %100 = vector.broadcast %13 : vector<1x42xf32> to vector<56x42xf32>
    %101 = arith.addf %91, %100 : vector<56x42xf32>
    %cst_101 = arith.constant 0.000000e+00 : f32
    %102 = vector.broadcast %cst_101 : f32 to vector<56x42xf32>
    %103 = arith.maximumf %101, %102 : vector<56x42xf32>
    %104 = vector.broadcast %13 : vector<1x42xf32> to vector<56x42xf32>
    %105 = arith.addf %99, %104 : vector<56x42xf32>
    %cst_102 = arith.constant 0.000000e+00 : f32
    %106 = vector.broadcast %cst_102 : f32 to vector<56x42xf32>
    %107 = arith.maximumf %105, %106 : vector<56x42xf32>
    %c0_103 = arith.constant 0 : index
    %c0_104 = arith.constant 0 : index
    %c0_105 = arith.constant 0 : index
    %108 = vector.load %arg4[%c0_103, %c0_104, %c0_105] : memref<2x42x108xf32, #tpu.memory_space<vmem>>, vector<1x42x108xf32>
    %109 = vector.shape_cast %108 : vector<1x42x108xf32> to vector<42x108xf32>
    %cst_106 = arith.constant dense<0.000000e+00> : vector<56x108xf32>
    %110 = tpu.matmul %103, %109, %cst_106 {dimension_numbers = #tpu.dot_dimension_numbers<[1], [0], [0], [1], [0, 0, 1, 1], [], []>} : vector<56x42xf32>, vector<42x108xf32>, vector<56x108xf32> -> vector<56x108xf32>
    %c1_107 = arith.constant 1 : index
    %c0_108 = arith.constant 0 : index
    %c0_109 = arith.constant 0 : index
    %111 = vector.load %arg4[%c1_107, %c0_108, %c0_109] : memref<2x42x108xf32, #tpu.memory_space<vmem>>, vector<1x42x108xf32>
    %112 = vector.shape_cast %111 : vector<1x42x108xf32> to vector<42x108xf32>
    %cst_110 = arith.constant dense<0.000000e+00> : vector<56x108xf32>
    %113 = tpu.matmul %107, %112, %cst_110 {dimension_numbers = #tpu.dot_dimension_numbers<[1], [0], [0], [1], [0, 0, 1, 1], [], []>} : vector<56x42xf32>, vector<42x108xf32>, vector<56x108xf32> -> vector<56x108xf32>
    %114 = arith.addf %110, %113 : vector<56x108xf32>
    %c1_111 = arith.constant 1 : index
    %c8_112 = arith.constant 8 : index
    %c0_113 = arith.constant 0 : index
    %115 = vector.load %arg12[%c1_111, %c8_112, %c0_113] : memref<2x72x108xf32, #tpu.memory_space<vmem>>, vector<1x56x108xf32>
    %116 = vector.shape_cast %115 : vector<1x56x108xf32> to vector<56x108xf32>
    %117 = vector.shape_cast %114 : vector<56x108xf32> to vector<1x56x108xf32>
    tpu.vector_store %arg12[%c1_111, %c8_112, %c0_113], %117 {strides = array<i32>} : memref<2x72x108xf32, #tpu.memory_space<vmem>>, vector<1x56x108xf32>,
    %c1_114 = arith.constant 1 : index
    %c0_115 = arith.constant 0 : index
    %c0_116 = arith.constant 0 : index
    %118 = vector.load %arg12[%c1_114, %c0_115, %c0_116] : memref<2x72x108xf32, #tpu.memory_space<vmem>>, vector<1x56x108xf32>
    %119 = vector.shape_cast %118 : vector<1x56x108xf32> to vector<56x108xf32>
    %c0_117 = arith.constant 0 : index
    %c0_118 = arith.constant 0 : index
    %c0_119 = arith.constant 0 : index
    %c0_120 = arith.constant 0 : index
    %120 = vector.load %arg5[%c0_117, %c0_118, %c0_119, %c0_120] : memref<2x3x108x56xf32, #tpu.memory_space<vmem>>, vector<1x1x108x56xf32>
    %121 = vector.shape_cast %120 : vector<1x1x108x56xf32> to vector<108x56xf32>
    %cst_121 = arith.constant dense<0.000000e+00> : vector<56x56xf32>
    %122 = tpu.matmul %119, %121, %cst_121 {dimension_numbers = #tpu.dot_dimension_numbers<[1], [0], [0], [1], [0, 0, 1, 1], [], []>} : vector<56x108xf32>, vector<108x56xf32>, vector<56x56xf32> -> vector<56x56xf32>
    %c0_122 = arith.constant 0 : index
    %c8_123 = arith.constant 8 : index
    %c0_124 = arith.constant 0 : index
    %123 = vector.load %arg12[%c0_122, %c8_123, %c0_124] : memref<2x72x108xf32, #tpu.memory_space<vmem>>, vector<1x56x108xf32>
    %124 = vector.shape_cast %123 : vector<1x56x108xf32> to vector<56x108xf32>
    %c0_125 = arith.constant 0 : index
    %c1_126 = arith.constant 1 : index
    %c0_127 = arith.constant 0 : index
    %c0_128 = arith.constant 0 : index
    %125 = vector.load %arg5[%c0_125, %c1_126, %c0_127, %c0_128] : memref<2x3x108x56xf32, #tpu.memory_space<vmem>>, vector<1x1x108x56xf32>
    %126 = vector.shape_cast %125 : vector<1x1x108x56xf32> to vector<108x56xf32>
    %cst_129 = arith.constant dense<0.000000e+00> : vector<56x56xf32>
    %127 = tpu.matmul %124, %126, %cst_129 {dimension_numbers = #tpu.dot_dimension_numbers<[1], [0], [0], [1], [0, 0, 1, 1], [], []>} : vector<56x108xf32>, vector<108x56xf32>, vector<56x56xf32> -> vector<56x56xf32>
    %128 = arith.addf %122, %127 : vector<56x56xf32>
    %c1_130 = arith.constant 1 : index
    %c8_131 = arith.constant 8 : index
    %c0_132 = arith.constant 0 : index
    %129 = vector.load %arg12[%c1_130, %c8_131, %c0_132] : memref<2x72x108xf32, #tpu.memory_space<vmem>>, vector<1x56x108xf32>
    %130 = vector.shape_cast %129 : vector<1x56x108xf32> to vector<56x108xf32>
    %c0_133 = arith.constant 0 : index
    %c2_134 = arith.constant 2 : index
    %c0_135 = arith.constant 0 : index
    %c0_136 = arith.constant 0 : index
    %131 = vector.load %arg5[%c0_133, %c2_134, %c0_135, %c0_136] : memref<2x3x108x56xf32, #tpu.memory_space<vmem>>, vector<1x1x108x56xf32>
    %132 = vector.shape_cast %131 : vector<1x1x108x56xf32> to vector<108x56xf32>
    %cst_137 = arith.constant dense<0.000000e+00> : vector<56x56xf32>
    %133 = tpu.matmul %130, %132, %cst_137 {dimension_numbers = #tpu.dot_dimension_numbers<[1], [0], [0], [1], [0, 0, 1, 1], [], []>} : vector<56x108xf32>, vector<108x56xf32>, vector<56x56xf32> -> vector<56x56xf32>
    %134 = arith.addf %128, %133 : vector<56x56xf32>
    %c1_138 = arith.constant 1 : index
    %c0_139 = arith.constant 0 : index
    %c0_140 = arith.constant 0 : index
    %135 = vector.load %arg12[%c1_138, %c0_139, %c0_140] : memref<2x72x108xf32, #tpu.memory_space<vmem>>, vector<1x56x108xf32>
    %136 = vector.shape_cast %135 : vector<1x56x108xf32> to vector<56x108xf32>
    %c1_141 = arith.constant 1 : index
    %c0_142 = arith.constant 0 : index
    %c0_143 = arith.constant 0 : index
    %c0_144 = arith.constant 0 : index
    %137 = vector.load %arg5[%c1_141, %c0_142, %c0_143, %c0_144] : memref<2x3x108x56xf32, #tpu.memory_space<vmem>>, vector<1x1x108x56xf32>
    %138 = vector.shape_cast %137 : vector<1x1x108x56xf32> to vector<108x56xf32>
    %cst_145 = arith.constant dense<0.000000e+00> : vector<56x56xf32>
    %139 = tpu.matmul %136, %138, %cst_145 {dimension_numbers = #tpu.dot_dimension_numbers<[1], [0], [0], [1], [0, 0, 1, 1], [], []>} : vector<56x108xf32>, vector<108x56xf32>, vector<56x56xf32> -> vector<56x56xf32>
    %c0_146 = arith.constant 0 : index
    %c8_147 = arith.constant 8 : index
    %c0_148 = arith.constant 0 : index
    %140 = vector.load %arg12[%c0_146, %c8_147, %c0_148] : memref<2x72x108xf32, #tpu.memory_space<vmem>>, vector<1x56x108xf32>
    %141 = vector.shape_cast %140 : vector<1x56x108xf32> to vector<56x108xf32>
    %c1_149 = arith.constant 1 : index
    %c1_150 = arith.constant 1 : index
    %c0_151 = arith.constant 0 : index
    %c0_152 = arith.constant 0 : index
    %142 = vector.load %arg5[%c1_149, %c1_150, %c0_151, %c0_152] : memref<2x3x108x56xf32, #tpu.memory_space<vmem>>, vector<1x1x108x56xf32>
    %143 = vector.shape_cast %142 : vector<1x1x108x56xf32> to vector<108x56xf32>
    %cst_153 = arith.constant dense<0.000000e+00> : vector<56x56xf32>
    %144 = tpu.matmul %141, %143, %cst_153 {dimension_numbers = #tpu.dot_dimension_numbers<[1], [0], [0], [1], [0, 0, 1, 1], [], []>} : vector<56x108xf32>, vector<108x56xf32>, vector<56x56xf32> -> vector<56x56xf32>
    %145 = arith.addf %139, %144 : vector<56x56xf32>
    %c1_154 = arith.constant 1 : index
    %c8_155 = arith.constant 8 : index
    %c0_156 = arith.constant 0 : index
    %146 = vector.load %arg12[%c1_154, %c8_155, %c0_156] : memref<2x72x108xf32, #tpu.memory_space<vmem>>, vector<1x56x108xf32>
    %147 = vector.shape_cast %146 : vector<1x56x108xf32> to vector<56x108xf32>
    %c1_157 = arith.constant 1 : index
    %c2_158 = arith.constant 2 : index
    %c0_159 = arith.constant 0 : index
    %c0_160 = arith.constant 0 : index
    %148 = vector.load %arg5[%c1_157, %c2_158, %c0_159, %c0_160] : memref<2x3x108x56xf32, #tpu.memory_space<vmem>>, vector<1x1x108x56xf32>
    %149 = vector.shape_cast %148 : vector<1x1x108x56xf32> to vector<108x56xf32>
    %cst_161 = arith.constant dense<0.000000e+00> : vector<56x56xf32>
    %150 = tpu.matmul %147, %149, %cst_161 {dimension_numbers = #tpu.dot_dimension_numbers<[1], [0], [0], [1], [0, 0, 1, 1], [], []>} : vector<56x108xf32>, vector<108x56xf32>, vector<56x56xf32> -> vector<56x56xf32>
    %151 = arith.addf %145, %150 : vector<56x56xf32>
    %152 = arith.maximumf %134, %151 : vector<56x56xf32>
    %c0_162 = arith.constant 0 : index
    %c8_163 = arith.constant 8 : index
    %c0_164 = arith.constant 0 : index
    %153 = vector.load %arg12[%c0_162, %c8_163, %c0_164] : memref<2x72x108xf32, #tpu.memory_space<vmem>>, vector<1x56x108xf32>
    %154 = vector.shape_cast %153 : vector<1x56x108xf32> to vector<56x108xf32>
    %c0_165 = arith.constant 0 : index
    %c0_166 = arith.constant 0 : index
    %c0_167 = arith.constant 0 : index
    %c0_168 = arith.constant 0 : index
    %155 = vector.load %arg5[%c0_165, %c0_166, %c0_167, %c0_168] : memref<2x3x108x56xf32, #tpu.memory_space<vmem>>, vector<1x1x108x56xf32>
    %156 = vector.shape_cast %155 : vector<1x1x108x56xf32> to vector<108x56xf32>
    %cst_169 = arith.constant dense<0.000000e+00> : vector<56x56xf32>
    %157 = tpu.matmul %154, %156, %cst_169 {dimension_numbers = #tpu.dot_dimension_numbers<[1], [0], [0], [1], [0, 0, 1, 1], [], []>} : vector<56x108xf32>, vector<108x56xf32>, vector<56x56xf32> -> vector<56x56xf32>
    %c1_170 = arith.constant 1 : index
    %c8_171 = arith.constant 8 : index
    %c0_172 = arith.constant 0 : index
    %158 = vector.load %arg12[%c1_170, %c8_171, %c0_172] : memref<2x72x108xf32, #tpu.memory_space<vmem>>, vector<1x56x108xf32>
    %159 = vector.shape_cast %158 : vector<1x56x108xf32> to vector<56x108xf32>
    %c0_173 = arith.constant 0 : index
    %c1_174 = arith.constant 1 : index
    %c0_175 = arith.constant 0 : index
    %c0_176 = arith.constant 0 : index
    %160 = vector.load %arg5[%c0_173, %c1_174, %c0_175, %c0_176] : memref<2x3x108x56xf32, #tpu.memory_space<vmem>>, vector<1x1x108x56xf32>
    %161 = vector.shape_cast %160 : vector<1x1x108x56xf32> to vector<108x56xf32>
    %cst_177 = arith.constant dense<0.000000e+00> : vector<56x56xf32>
    %162 = tpu.matmul %159, %161, %cst_177 {dimension_numbers = #tpu.dot_dimension_numbers<[1], [0], [0], [1], [0, 0, 1, 1], [], []>} : vector<56x108xf32>, vector<108x56xf32>, vector<56x56xf32> -> vector<56x56xf32>
    %163 = arith.addf %157, %162 : vector<56x56xf32>
    %c0_178 = arith.constant 0 : index
    %c16 = arith.constant 16 : index
    %c0_179 = arith.constant 0 : index
    %164 = vector.load %arg12[%c0_178, %c16, %c0_179] : memref<2x72x108xf32, #tpu.memory_space<vmem>>, vector<1x56x108xf32>
    %165 = vector.shape_cast %164 : vector<1x56x108xf32> to vector<56x108xf32>
    %c0_180 = arith.constant 0 : index
    %c2_181 = arith.constant 2 : index
    %c0_182 = arith.constant 0 : index
    %c0_183 = arith.constant 0 : index
    %166 = vector.load %arg5[%c0_180, %c2_181, %c0_182, %c0_183] : memref<2x3x108x56xf32, #tpu.memory_space<vmem>>, vector<1x1x108x56xf32>
    %167 = vector.shape_cast %166 : vector<1x1x108x56xf32> to vector<108x56xf32>
    %cst_184 = arith.constant dense<0.000000e+00> : vector<56x56xf32>
    %168 = tpu.matmul %165, %167, %cst_184 {dimension_numbers = #tpu.dot_dimension_numbers<[1], [0], [0], [1], [0, 0, 1, 1], [], []>} : vector<56x108xf32>, vector<108x56xf32>, vector<56x56xf32> -> vector<56x56xf32>
    %169 = arith.addf %163, %168 : vector<56x56xf32>
    %170 = arith.maximumf %152, %169 : vector<56x56xf32>
    %c0_185 = arith.constant 0 : index
    %c8_186 = arith.constant 8 : index
    %c0_187 = arith.constant 0 : index
    %171 = vector.load %arg12[%c0_185, %c8_186, %c0_187] : memref<2x72x108xf32, #tpu.memory_space<vmem>>, vector<1x56x108xf32>
    %172 = vector.shape_cast %171 : vector<1x56x108xf32> to vector<56x108xf32>
    %c1_188 = arith.constant 1 : index
    %c0_189 = arith.constant 0 : index
    %c0_190 = arith.constant 0 : index
    %c0_191 = arith.constant 0 : index
    %173 = vector.load %arg5[%c1_188, %c0_189, %c0_190, %c0_191] : memref<2x3x108x56xf32, #tpu.memory_space<vmem>>, vector<1x1x108x56xf32>
    %174 = vector.shape_cast %173 : vector<1x1x108x56xf32> to vector<108x56xf32>
    %cst_192 = arith.constant dense<0.000000e+00> : vector<56x56xf32>
    %175 = tpu.matmul %172, %174, %cst_192 {dimension_numbers = #tpu.dot_dimension_numbers<[1], [0], [0], [1], [0, 0, 1, 1], [], []>} : vector<56x108xf32>, vector<108x56xf32>, vector<56x56xf32> -> vector<56x56xf32>
    %c1_193 = arith.constant 1 : index
    %c8_194 = arith.constant 8 : index
    %c0_195 = arith.constant 0 : index
    %176 = vector.load %arg12[%c1_193, %c8_194, %c0_195] : memref<2x72x108xf32, #tpu.memory_space<vmem>>, vector<1x56x108xf32>
    %177 = vector.shape_cast %176 : vector<1x56x108xf32> to vector<56x108xf32>
    %c1_196 = arith.constant 1 : index
    %c1_197 = arith.constant 1 : index
    %c0_198 = arith.constant 0 : index
    %c0_199 = arith.constant 0 : index
    %178 = vector.load %arg5[%c1_196, %c1_197, %c0_198, %c0_199] : memref<2x3x108x56xf32, #tpu.memory_space<vmem>>, vector<1x1x108x56xf32>
    %179 = vector.shape_cast %178 : vector<1x1x108x56xf32> to vector<108x56xf32>
    %cst_200 = arith.constant dense<0.000000e+00> : vector<56x56xf32>
    %180 = tpu.matmul %177, %179, %cst_200 {dimension_numbers = #tpu.dot_dimension_numbers<[1], [0], [0], [1], [0, 0, 1, 1], [], []>} : vector<56x108xf32>, vector<108x56xf32>, vector<56x56xf32> -> vector<56x56xf32>
    %181 = arith.addf %175, %180 : vector<56x56xf32>
    %c0_201 = arith.constant 0 : index
    %c16_202 = arith.constant 16 : index
    %c0_203 = arith.constant 0 : index
    %182 = vector.load %arg12[%c0_201, %c16_202, %c0_203] : memref<2x72x108xf32, #tpu.memory_space<vmem>>, vector<1x56x108xf32>
    %183 = vector.shape_cast %182 : vector<1x56x108xf32> to vector<56x108xf32>
    %c1_204 = arith.constant 1 : index
    %c2_205 = arith.constant 2 : index
    %c0_206 = arith.constant 0 : index
    %c0_207 = arith.constant 0 : index
    %184 = vector.load %arg5[%c1_204, %c2_205, %c0_206, %c0_207] : memref<2x3x108x56xf32, #tpu.memory_space<vmem>>, vector<1x1x108x56xf32>
    %185 = vector.shape_cast %184 : vector<1x1x108x56xf32> to vector<108x56xf32>
    %cst_208 = arith.constant dense<0.000000e+00> : vector<56x56xf32>
    %186 = tpu.matmul %183, %185, %cst_208 {dimension_numbers = #tpu.dot_dimension_numbers<[1], [0], [0], [1], [0, 0, 1, 1], [], []>} : vector<56x108xf32>, vector<108x56xf32>, vector<56x56xf32> -> vector<56x56xf32>
    %187 = arith.addf %181, %186 : vector<56x56xf32>
    %188 = arith.maximumf %170, %187 : vector<56x56xf32>
    %c0_209 = arith.constant 0 : index
    %c0_210 = arith.constant 0 : index
    %189 = vector.load %arg6[%c0_209, %c0_210] : memref<1x56xf32, #tpu.memory_space<vmem>>, vector<1x56xf32>
    %190 = vector.broadcast %189 : vector<1x56xf32> to vector<56x56xf32>
    %191 = arith.addf %188, %190 : vector<56x56xf32>
    %cst_211 = arith.constant 0.000000e+00 : f32
    %192 = vector.broadcast %cst_211 : f32 to vector<56x56xf32>
    %193 = arith.maximumf %191, %192 : vector<56x56xf32>
    %194 = vector.extract_strided_slice %193 {offsets = [0, 0], sizes = [8, 56], strides = [1, 1]} : vector<56x56xf32> to vector<8x56xf32>
    %c0_212 = arith.constant 0 : index
    %c0_213 = arith.constant 0 : index
    %c0_214 = arith.constant 0 : index
    %195 = vector.load %arg7[%c0_212, %c0_213, %c0_214] : memref<7x56x32xf32, #tpu.memory_space<vmem>>, vector<1x56x32xf32>
    %196 = vector.shape_cast %195 : vector<1x56x32xf32> to vector<56x32xf32>
    %cst_215 = arith.constant dense<0.000000e+00> : vector<8x32xf32>
    %197 = tpu.matmul %194, %196, %cst_215 {dimension_numbers = #tpu.dot_dimension_numbers<[1], [0], [0], [1], [0, 0, 1, 1], [], []>} : vector<8x56xf32>, vector<56x32xf32>, vector<8x32xf32> -> vector<8x32xf32>
    %198 = vector.extract_strided_slice %193 {offsets = [8, 0], sizes = [8, 56], strides = [1, 1]} : vector<56x56xf32> to vector<8x56xf32>
    %c1_216 = arith.constant 1 : index
    %c0_217 = arith.constant 0 : index
    %c0_218 = arith.constant 0 : index
    %199 = vector.load %arg7[%c1_216, %c0_217, %c0_218] : memref<7x56x32xf32, #tpu.memory_space<vmem>>, vector<1x56x32xf32>
    %200 = vector.shape_cast %199 : vector<1x56x32xf32> to vector<56x32xf32>
    %cst_219 = arith.constant dense<0.000000e+00> : vector<8x32xf32>
    %201 = tpu.matmul %198, %200, %cst_219 {dimension_numbers = #tpu.dot_dimension_numbers<[1], [0], [0], [1], [0, 0, 1, 1], [], []>} : vector<8x56xf32>, vector<56x32xf32>, vector<8x32xf32> -> vector<8x32xf32>
    %202 = arith.addf %197, %201 : vector<8x32xf32>
    %203 = vector.extract_strided_slice %193 {offsets = [16, 0], sizes = [8, 56], strides = [1, 1]} : vector<56x56xf32> to vector<8x56xf32>
    %c2_220 = arith.constant 2 : index
    %c0_221 = arith.constant 0 : index
    %c0_222 = arith.constant 0 : index
    %204 = vector.load %arg7[%c2_220, %c0_221, %c0_222] : memref<7x56x32xf32, #tpu.memory_space<vmem>>, vector<1x56x32xf32>
    %205 = vector.shape_cast %204 : vector<1x56x32xf32> to vector<56x32xf32>
    %cst_223 = arith.constant dense<0.000000e+00> : vector<8x32xf32>
    %206 = tpu.matmul %203, %205, %cst_223 {dimension_numbers = #tpu.dot_dimension_numbers<[1], [0], [0], [1], [0, 0, 1, 1], [], []>} : vector<8x56xf32>, vector<56x32xf32>, vector<8x32xf32> -> vector<8x32xf32>
    %207 = arith.addf %202, %206 : vector<8x32xf32>
    %208 = vector.extract_strided_slice %193 {offsets = [24, 0], sizes = [8, 56], strides = [1, 1]} : vector<56x56xf32> to vector<8x56xf32>
    %c3_224 = arith.constant 3 : index
    %c0_225 = arith.constant 0 : index
    %c0_226 = arith.constant 0 : index
    %209 = vector.load %arg7[%c3_224, %c0_225, %c0_226] : memref<7x56x32xf32, #tpu.memory_space<vmem>>, vector<1x56x32xf32>
    %210 = vector.shape_cast %209 : vector<1x56x32xf32> to vector<56x32xf32>
    %cst_227 = arith.constant dense<0.000000e+00> : vector<8x32xf32>
    %211 = tpu.matmul %208, %210, %cst_227 {dimension_numbers = #tpu.dot_dimension_numbers<[1], [0], [0], [1], [0, 0, 1, 1], [], []>} : vector<8x56xf32>, vector<56x32xf32>, vector<8x32xf32> -> vector<8x32xf32>
    %212 = arith.addf %207, %211 : vector<8x32xf32>
    %213 = vector.extract_strided_slice %193 {offsets = [32, 0], sizes = [8, 56], strides = [1, 1]} : vector<56x56xf32> to vector<8x56xf32>
    %c4 = arith.constant 4 : index
    %c0_228 = arith.constant 0 : index
    %c0_229 = arith.constant 0 : index
    %214 = vector.load %arg7[%c4, %c0_228, %c0_229] : memref<7x56x32xf32, #tpu.memory_space<vmem>>, vector<1x56x32xf32>
    %215 = vector.shape_cast %214 : vector<1x56x32xf32> to vector<56x32xf32>
    %cst_230 = arith.constant dense<0.000000e+00> : vector<8x32xf32>
    %216 = tpu.matmul %213, %215, %cst_230 {dimension_numbers = #tpu.dot_dimension_numbers<[1], [0], [0], [1], [0, 0, 1, 1], [], []>} : vector<8x56xf32>, vector<56x32xf32>, vector<8x32xf32> -> vector<8x32xf32>
    %217 = arith.addf %212, %216 : vector<8x32xf32>
    %218 = vector.extract_strided_slice %193 {offsets = [40, 0], sizes = [8, 56], strides = [1, 1]} : vector<56x56xf32> to vector<8x56xf32>
    %c5 = arith.constant 5 : index
    %c0_231 = arith.constant 0 : index
    %c0_232 = arith.constant 0 : index
    %219 = vector.load %arg7[%c5, %c0_231, %c0_232] : memref<7x56x32xf32, #tpu.memory_space<vmem>>, vector<1x56x32xf32>
    %220 = vector.shape_cast %219 : vector<1x56x32xf32> to vector<56x32xf32>
    %cst_233 = arith.constant dense<0.000000e+00> : vector<8x32xf32>
    %221 = tpu.matmul %218, %220, %cst_233 {dimension_numbers = #tpu.dot_dimension_numbers<[1], [0], [0], [1], [0, 0, 1, 1], [], []>} : vector<8x56xf32>, vector<56x32xf32>, vector<8x32xf32> -> vector<8x32xf32>
    %222 = arith.addf %217, %221 : vector<8x32xf32>
    %223 = vector.extract_strided_slice %193 {offsets = [48, 0], sizes = [8, 56], strides = [1, 1]} : vector<56x56xf32> to vector<8x56xf32>
    %c6 = arith.constant 6 : index
    %c0_234 = arith.constant 0 : index
    %c0_235 = arith.constant 0 : index
    %224 = vector.load %arg7[%c6, %c0_234, %c0_235] : memref<7x56x32xf32, #tpu.memory_space<vmem>>, vector<1x56x32xf32>
    %225 = vector.shape_cast %224 : vector<1x56x32xf32> to vector<56x32xf32>
    %cst_236 = arith.constant dense<0.000000e+00> : vector<8x32xf32>
    %226 = tpu.matmul %223, %225, %cst_236 {dimension_numbers = #tpu.dot_dimension_numbers<[1], [0], [0], [1], [0, 0, 1, 1], [], []>} : vector<8x56xf32>, vector<56x32xf32>, vector<8x32xf32> -> vector<8x32xf32>
    %227 = arith.addf %222, %226 : vector<8x32xf32>
    %c0_237 = arith.constant 0 : index
    %c0_238 = arith.constant 0 : index
    %228 = vector.load %arg8[%c0_237, %c0_238] : memref<1x32xf32, #tpu.memory_space<vmem>>, vector<1x32xf32>
    %229 = vector.broadcast %228 : vector<1x32xf32> to vector<8x32xf32>
    %230 = arith.addf %227, %229 : vector<8x32xf32>
    %cst_239 = arith.constant 0.000000e+00 : f32
    %231 = vector.broadcast %cst_239 : f32 to vector<8x32xf32>
    %232 = arith.maximumf %230, %231 : vector<8x32xf32>
    %c0_240 = arith.constant 0 : index
    %c0_241 = arith.constant 0 : index
    %233 = vector.load %arg9[%c0_240, %c0_241] : memref<32x10xf32, #tpu.memory_space<vmem>>, vector<32x10xf32>
    %cst_242 = arith.constant dense<0.000000e+00> : vector<8x10xf32>
    %234 = tpu.matmul %232, %233, %cst_242 {dimension_numbers = #tpu.dot_dimension_numbers<[1], [0], [0], [1], [0, 0, 1, 1], [], []>} : vector<8x32xf32>, vector<32x10xf32>, vector<8x10xf32> -> vector<8x10xf32>
    %c0_243 = arith.constant 0 : index
    %c0_244 = arith.constant 0 : index
    %235 = vector.load %arg10[%c0_243, %c0_244] : memref<1x10xf32, #tpu.memory_space<vmem>>, vector<1x10xf32>
    %236 = vector.broadcast %235 : vector<1x10xf32> to vector<8x10xf32>
    %237 = arith.addf %234, %236 : vector<8x10xf32>
    %c0_245 = arith.constant 0 : index
    %c0_246 = arith.constant 0 : index
    %238 = vector.load %arg11[%c0_245, %c0_246] : memref<8x10xf32, #tpu.memory_space<vmem>>, vector<8x10xf32>
    tpu.vector_store %arg11[%c0_245, %c0_246], %237 {strides = array<i32>} : memref<8x10xf32, #tpu.memory_space<vmem>>, vector<8x10xf32>,
    return
  }
  func.func @transform_0(%arg0: i32) -> (i32, i32, i32, i32) {
    %c0_i32 = arith.constant 0 : i32
    %c0_i32_0 = arith.constant 0 : i32
    %c0_i32_1 = arith.constant 0 : i32
    %c0_i32_2 = arith.constant 0 : i32
    return %arg0, %c0_i32, %c0_i32_0, %c0_i32_1 : i32, i32, i32, i32
  }
  func.func @transform_1(%arg0: i32) -> (i32, i32, i32) {
    %c0_i32 = arith.constant 0 : i32
    %c0_i32_0 = arith.constant 0 : i32
    %c0_i32_1 = arith.constant 0 : i32
    %c0_i32_2 = arith.constant 0 : i32
    return %c0_i32, %c0_i32_0, %c0_i32_1 : i32, i32, i32
  }
  func.func @transform_2(%arg0: i32) -> (i32, i32) {
    %c0_i32 = arith.constant 0 : i32
    %c0_i32_0 = arith.constant 0 : i32
    %c0_i32_1 = arith.constant 0 : i32
    return %c0_i32, %c0_i32_0 : i32, i32
  }
  func.func @transform_3(%arg0: i32) -> (i32, i32, i32) {
    %c0_i32 = arith.constant 0 : i32
    %c0_i32_0 = arith.constant 0 : i32
    %c0_i32_1 = arith.constant 0 : i32
    %c0_i32_2 = arith.constant 0 : i32
    return %c0_i32, %c0_i32_0, %c0_i32_1 : i32, i32, i32
  }
  func.func @transform_4(%arg0: i32) -> (i32, i32, i32, i32) {
    %c0_i32 = arith.constant 0 : i32
    %c0_i32_0 = arith.constant 0 : i32
    %c0_i32_1 = arith.constant 0 : i32
    %c0_i32_2 = arith.constant 0 : i32
    %c0_i32_3 = arith.constant 0 : i32
    return %c0_i32, %c0_i32_0, %c0_i32_1, %c0_i32_2 : i32, i32, i32, i32
  }
  func.func @transform_5(%arg0: i32) -> (i32, i32) {
    %c0_i32 = arith.constant 0 : i32
    %c0_i32_0 = arith.constant 0 : i32
    %c0_i32_1 = arith.constant 0 : i32
    return %c0_i32, %c0_i32_0 : i32, i32
  }
  func.func @transform_6(%arg0: i32) -> (i32, i32, i32) {
    %c0_i32 = arith.constant 0 : i32
    %c0_i32_0 = arith.constant 0 : i32
    %c0_i32_1 = arith.constant 0 : i32
    %c0_i32_2 = arith.constant 0 : i32
    return %c0_i32, %c0_i32_0, %c0_i32_1 : i32, i32, i32
  }
  func.func @transform_7(%arg0: i32) -> (i32, i32) {
    %c0_i32 = arith.constant 0 : i32
    %c0_i32_0 = arith.constant 0 : i32
    %c0_i32_1 = arith.constant 0 : i32
    return %c0_i32, %c0_i32_0 : i32, i32
  }
  func.func @transform_8(%arg0: i32) -> (i32, i32) {
    %c0_i32 = arith.constant 0 : i32
    %c0_i32_0 = arith.constant 0 : i32
    %c0_i32_1 = arith.constant 0 : i32
    return %c0_i32, %c0_i32_0 : i32, i32
  }
  func.func @transform_9(%arg0: i32) -> (i32, i32) {
    %c0_i32 = arith.constant 0 : i32
    %c0_i32_0 = arith.constant 0 : i32
    %c0_i32_1 = arith.constant 0 : i32
    return %c0_i32, %c0_i32_0 : i32, i32
  }
  func.func @transform_10(%arg0: i32) -> (i32, i32) {
    %c0_i32 = arith.constant 0 : i32
    %c0_i32_0 = arith.constant 0 : i32
    return %arg0, %c0_i32 : i32, i32
  }
}

</mosaic_0001>

<bundles_post_ra>
// kernel: tile.8
= control target key start
LH: loop header
LB: loop body
LE: loop exit
PB: predicated region body
PF: predicated region fallthrough
CT: control target
= control target key end

     0   :  { %s22_s0 = inlined_call_operand.vmem [shape: f32[8], index: 0, kind: input, shape index: {}]   ;;  %s23_s1 = inlined_call_operand.vmem [shape: f32[7,8], index: 1, kind: output, shape index: {}]  }
   0x1   :  { %v4_v0 = vld [vmem:[%s22_s0] ss:$0 sm:$0xff] }
   0x2   :  { %5 = vst [vmem:[%s23_s1] sm:$0xff] %v4_v0 }

// kernel: tile.9
= control target key start
LH: loop header
LB: loop body
LE: loop exit
PB: predicated region body
PF: predicated region fallthrough
CT: control target
= control target key end

     0   :  { %s59_s10 = smov 48   ;;  %s60_s11 = smov 32   ;;  %vm3_vm0 = vcmask 64512   ;;  %vm9_vm1 = vcmask 458112   ;;  %vm15_vm2 = vcmask 392512   ;;  %vm21_vm3 = vcmask 326912   ;;  %s99_s0 = inlined_call_operand.vmem [shape: f32[7,8], index: 0, kind: input, shape index: {}]   ;;  %s100_s1 = inlined_call_operand.vmem [shape: f32[1,56], index: 1, kind: output, shape index: {}]  }
   0x1   :  { %v47_v0 = vld [vmem:[%s99_s0 + $0x6] sm:$0x1]   ;;  %v49_v1 = vld [vmem:[%s99_s0 + $0x4] sm:$0x1]   ;;  %v48_v2 = vld [vmem:[%s99_s0 + $0x5] sm:$0x1]  }
   0x2   :  { %7 = vrot.lane.b32.xlu0 %v47_v0, %s59_s10  ;;  %19 = vrot.lane.b32.xlu1 %v49_v1, %s60_s11  ;;  %v50_v3 = vld [vmem:[%s99_s0 + $0x3] sm:$0x1]   ;;  %v2_v4 = vld [vmem:[%s99_s0] sm:$0x1]   ;;  %s61_s18 = smov 40   ;;  %s62_s19 = smov 24  }
   0x3   :  { %4 = vst.msk [vmem:[#allocation0] sm:$0x1] %vm3_vm0, %v2_v4   ;;  %v51_v5 = vld [vmem:[%s99_s0 + $0x2] sm:$0x1]   ;;  %v52_v6 = vld [vmem:[%s99_s0 + $0x1] sm:$0x1]  }
   0x4   :  { %s63_s0 = smov 16   ;;  %s64_s24 = smov 8   ;;  %vm27_vm4 = vcmask 261312   ;;  %vm33_vm5 = vcmask 195712   ;;  %vm39_vm6 = vcmask 130112  }
   0x6   :  { %13 = vrot.lane.b32.xlu0 %v48_v2, %s61_s18  ;;  %25 = vrot.lane.b32.xlu1 %v50_v3, %s62_s19 }
   0xa   :  { %31 = vrot.lane.b32.xlu0 %v51_v5, %s63_s0  ;;  %37 = vrot.lane.b32.xlu1 %v52_v6, %s64_s24 }
  0x74   :  { %v8_v7 = vpop.permute.xlu0 %7   ;;  %v20_v8 = vpop.permute.xlu1 %19  }
  0x75   :  { %10 = vst.msk [vmem:[#allocation0] sm:$0x1] %vm9_vm1, %v8_v7  }
  0x78   :  { %v14_v9 = vpop.permute.xlu0 %13   ;;  %v26_v10 = vpop.permute.xlu1 %25  }
  0x79   :  { %16 = vst.msk [vmem:[#allocation0] sm:$0x1] %vm15_vm2, %v14_v9  }
  0x7a   :  { %22 = vst.msk [vmem:[#allocation0] sm:$0x1] %vm21_vm3, %v20_v8  }
  0x7b   :  { %28 = vst.msk [vmem:[#allocation0] sm:$0x1] %vm27_vm4, %v26_v10  }
  0x7c   :  { %v32_v11 = vpop.permute.xlu0 %31   ;;  %v38_v12 = vpop.permute.xlu1 %37  }
  0x7d   :  { %34 = vst.msk [vmem:[#allocation0] sm:$0x1] %vm33_vm5, %v32_v11  }
  0x7e   :  { %40 = vst.msk [vmem:[#allocation0] sm:$0x1] %vm39_vm6, %v38_v12  }
  0x85   :  { %v44_v13 = vld [vmem:[#allocation0] sm:$0x1] }
  0x86   :  { %46 = vst [vmem:[%s100_s1] sm:$0x1] %v44_v13 }

// kernel: mnist_cnn_forward.1
= control target key start
LH: loop header
LB: loop body
LE: loop exit
PB: predicated region body
PF: predicated region fallthrough
CT: control target
= control target key end

     0   :  { %15 = vsyncpa [#allocation4], 0  ;;  %s12296_s0 = inlined_call_operand.vmem [shape: f32[2,4,56,126], index: 0, kind: input, shape index: {}]   ;;  %s12297_s1 = inlined_call_operand.vmem [shape: f32[4,126,42], index: 1, kind: input, shape index: {}]   ;;  %s12298_s2 = inlined_call_operand.vmem [shape: f32[1,42], index: 2, kind: input, shape index: {}]   ;;  %s12299_s3 = inlined_call_operand.vmem [shape: f32[2,42,108], index: 3, kind: input, shape index: {}]   ;;  %s12300_s4 = inlined_call_operand.vmem [shape: f32[2,3,108,56], index: 4, kind: input, shape index: {}]   ;;  %s12301_s5 = inlined_call_operand.vmem [shape: f32[1,56], index: 5, kind: input, shape index: {}]   ;;  %s12302_s6 = inlined_call_operand.vmem [shape: f32[7,56,32], index: 6, kind: input, shape index: {}]   ;;  %s12303_s7 = inlined_call_operand.vmem [shape: f32[1,32], index: 7, kind: input, shape index: {}]   ;;  %s12304_s8 = inlined_call_operand.vmem [shape: f32[32,10], index: 8, kind: input, shape index: {}]   ;;  %s12305_s9 = inlined_call_operand.vmem [shape: f32[1,10], index: 9, kind: input, shape index: {}]   ;;  %s12306_s10 = inlined_call_operand.hbm [shape: f32[16,10], index: 10, kind: output, shape index: {}]  }
   0x1   :  { %17 = vsyncpa [#allocation4 + $0x1], 0  ;;  %s9190_s13 = smov 0   ;;  %s9192_s14 = smov 0  }
   0x2   :  { %s9194_s15 = smov 0   ;;  %s9196_s16 = smov 0  }
   0x3 LB: > { %s9211_s17 = sadd.s32 4294967295, %s9128_s16   ;;  %s5151_s18 = sadd.s32 4294967294, %s9128_s16   ;;  %s9128_s16 = sphi %s9196_s16, %s12401_s16   ;;  %s9124_s15 = sphi %s9194_s15, %s12400_s15   ;;  %s9120_s14 = sphi %s9192_s14, %s12399_s14   ;;  %s9116_s13 = sphi %s9190_s13, %s12398_s13  }
   0x4   : > { %s9215_s19 = sadd.s32 1, %s9128_s16   ;;  %s245_s20 = sadd.s32 1, %s9124_s15 }
   0x5   : > { %s242_s21 = ssub.s32 %s9128_s16, %s9215_s19  ;;  %p255_p0 = scmp.ne.s32.totalorder %s9124_s15, %s9120_s14 }
   0x6   : > { %p243_p1 = scmp.eq.s32.totalorder %s242_s21, 0  ;;  %p256_p2 = scmp.eq.s32.totalorder %s9211_s17, 1 }
   0x7   : > { %p261_p3 = scmp.ne.s32.totalorder %s9120_s14, %s9116_s13  ;;  %p262_p4 = scmp.eq.s32.totalorder %s5151_s18, 1 }
   0x8   : > { %s9226_s22 = scalar_select %p243_p1, %s9124_s15, %s245_s20  }
   0x9   : > { %p9228_p5 = por %p256_p2, %p255_p0  ;;  %p9232_p6 = por %p262_p4, %p261_p3 }
   0xa   : > { %12324 = sst [smem:[#allocation6_spill]] %s9226_s22  ;;  %p5154_p7 = scmp.ge.s32.totalorder %s9128_s16, 1 }
   0xb   : > { %p315_p8 = scmp.lt.s32.totalorder %s9128_s16, 3 }
   0xd   : > { %p316_p9 = pnand %p5154_p7, %p315_p8 }
   0xf   : > { %319 = sbr.rel (%p316_p9) target bundleno = 1800 (0x708), region = 60 }
  0x16   : > { %v372_v0 = vld [vmem:[%s12297_s1] sm:$0xff]  ;;  %v373_v1 = vld [vmem:[%s12297_s1 + $0x8] sm:$0xff]  ;;  %v12310_v3 = vmov 0.0|0.0   ;;  %v374_v6 = vld [vmem:[%s12297_s1 + $0x10] sm:$0xff]  ;;  %vm9131_vm0 = vmmov 0   ;;  %v12307_v11 = vmov 0.0  }
  0x17   : > { %v5165_v2 = vld [vmem:[%s12297_s1 + $0x80] sm:$0xff]  ;;  %8101 = vmatprep.subr.bf16.mxu0 %v12310_v3  ;;  %v9248_v4 = vpack.c.bf16 %v373_v1, %v372_v0  ;;  %8126 = vmatprep.subr.bf16.mxu1 %v12310_v3  ;;  %v5166_v5 = vld [vmem:[%s12297_s1 + $0x88] sm:$0xff]  ;;  %v375_v7 = vld [vmem:[%s12297_s1 + $0x18] sm:$0xff]  ;;  %p353_p10 = scmp.lt.s32.totalorder %s9211_s17, 1  ;;  %vm410_vm1 = vcmask 1045504   ;;  %vm9133_vm2 = vmmov 1  }
  0x18   : > { %v9260_v8 = vpack.c.bf16 %v5166_v5, %v5165_v2  ;;  %v5167_v9 = vld [vmem:[%s12297_s1 + $0x90] sm:$0xff]  ;;  %v5168_v10 = vld [vmem:[%s12297_s1 + $0x98] sm:$0xff]  ;;  %6435 = vmatprep.mubr.msk.f32.mxu0 %vm9131_vm0, %v12307_v11  ;;  %6488 = vmatprep.mubr.msk.f32.mxu1 %vm9131_vm0, %v12307_v11  ;;  %v9273_v12 = vpack.c.bf16 %v375_v7, %v374_v6  ;;  %v376_v14 = vld [vmem:[%s12297_s1 + $0x20] sm:$0xff]  ;;  %vm388_vm4 = vcmask 1031168   ;;  %vm1414_vm5 = vcmask 1041408   ;;  %s350_s21 = sand.u32 1, %s9120_s14  }
  0x19   : > { %8103 = vmatpush3.bf16.msra.mxu0 %v9248_v4  ;;  %v9277_v13 = vpack.c.bf16 %v5168_v10, %v5167_v9  ;;  %v377_v15 = vld [vmem:[%s12297_s1 + $0x28] sm:$0xff]  ;;  %v5169_v16 = vld [vmem:[%s12297_s1 + $0xa0] sm:$0xff]  ;;  %v378_v20 = vld [vmem:[%s12297_s1 + $0x30] sm:$0xff]  ;;  %s354_s18 = scalar_select %p353_p10, %s9211_s17, 1  ;;  %vm1392_vm7 = vcmask 343040   ;;  %vm358_vm8 = vcmask 883712  }
  0x1a   : > { %8128 = vmatpush3.bf16.msra.mxu1 %v9260_v8  ;;  %8104 = vmatprep.subr.bf16.mxu0 %v12310_v3  ;;  %v5170_v17 = vld [vmem:[%s12297_s1 + $0xa8] sm:$0xff]  ;;  %v9293_v18 = vpack.c.bf16 %v377_v15, %v376_v14  ;;  %v379_v21 = vld [vmem:[%s12297_s1 + $0x38] sm:$0xff]  ;;  %v5171_v22 = vld [vmem:[%s12297_s1 + $0xb0] sm:$0xff]  ;;  %vm2984_vm9 = vcmask 1043456   ;;  %vm4425_vm11 = vcmask 457728   ;;  %vm5002_vm12 = vcmask 261120  }
  0x1b   : > { %8129 = vmatprep.subr.bf16.mxu1 %v12310_v3  ;;  %v9297_v19 = vpack.c.bf16 %v5170_v17, %v5169_v16  ;;  %v5172_v23 = vld [vmem:[%s12297_s1 + $0xb8] sm:$0xff]  ;;  %v9313_v24 = vpack.c.bf16 %v379_v21, %v378_v20  ;;  %v380_v26 = vld [vmem:[%s12297_s1 + $0x40] sm:$0xff]  ;;  %v381_v27 = vld [vmem:[%s12297_s1 + $0x48] sm:$0xff]  ;;  %s9014_s11 = smul.u32 224, %s354_s18  ;;  %s5155_s25 = sshll.u32 %s350_s21, 3  ;;  %vm5076_vm13 = vcmask 80896  }
  0x1c   : > { %v9317_v25 = vpack.c.bf16 %v5172_v23, %v5171_v22  ;;  %v5173_v28 = vld [vmem:[%s12297_s1 + $0xc0] sm:$0xff]  ;;  %v5174_v29 = vld [vmem:[%s12297_s1 + $0xc8] sm:$0xff]  ;;  %v9333_v30 = vpack.c.bf16 %v381_v27, %v380_v26  ;;  %v382_v32 = vld [vmem:[%s12297_s1 + $0x50] sm:$0xff]  ;;  %s5667_s18 = sshll.u32 %s9211_s17, 7  ;;  %s352_s26 = scalar_lea.vmem [#allocation3], %s5155_s25 }
  0x1d   : > { %8106 = vmatpush3.bf16.msra.mxu0 %v9273_v12  ;;  %v9337_v31 = vpack.c.bf16 %v5174_v29, %v5173_v28  ;;  %v383_v33 = vld [vmem:[%s12297_s1 + $0x58] sm:$0xff]  ;;  %v5175_v34 = vld [vmem:[%s12297_s1 + $0xd0] sm:$0xff]  ;;  %v384_v38 = vld [vmem:[%s12297_s1 + $0x60] sm:$0xff]  ;;  %s9412_s27 = scalar_lea.vmem %s12296_s0, %s9014_s11  ;;  %s5092_s28 = sshll.u32 %s352_s26, 4  ;;  %s12256_s28 = int_to_ptr.vmem [resolvable:$true] %s5092_s28 }
  0x1e   : > { %8131 = vmatpush3.bf16.msra.mxu1 %v9277_v13  ;;  %8107 = vmatprep.subr.bf16.mxu0 %v12310_v3  ;;  %v5176_v35 = vld [vmem:[%s12297_s1 + $0xd8] sm:$0xff]  ;;  %v9354_v36 = vpack.c.bf16 %v383_v33, %v382_v32  ;;  %v385_v39 = vld [vmem:[%s12297_s1 + $0x68] sm:$0xff]  ;;  %v5177_v40 = vld [vmem:[%s12297_s1 + $0xe0] sm:$0xff]  ;;  %s12254_s12 = scalar_lea.hbm %s12306_s10, %s5667_s18  ;;  %s9066_s20 = scalar_lea.vmem %s12256_s28, 128 }
  0x1f   : > { %8132 = vmatprep.subr.bf16.mxu1 %v12310_v3  ;;  %v9358_v37 = vpack.c.bf16 %v5176_v35, %v5175_v34  ;;  %v5178_v41 = vld [vmem:[%s12297_s1 + $0xe8] sm:$0xff]  ;;  %v9375_v42 = vpack.c.bf16 %v385_v39, %v384_v38  ;;  %v9384_v44 = vld [vmem:[%s12297_s1 + $0x70] sm:$0xff]  ;;  %v387_v45 = vld [vmem:[%s12297_s1 + $0x78] sm:$0x3f]  ;;  %p9067_p11 = scmp.ne.s32.totalorder %s12256_s28, %s9066_s20  ;;  %s9134_s17 = smov [#allocation3]  }
  0x20   : > { %v9379_v43 = vpack.c.bf16 %v5178_v41, %v5177_v40  ;;  %v5179_v46 = vld [vmem:[%s12297_s1 + $0xf0] sm:$0xff]  ;;  %v5180_v47 = vld [vmem:[%s12297_s1 + $0xf8] sm:$0x3f]  ;;  %v9398_v48 = vpack.c.bf16 %v387_v45, %v9384_v44  ;;  %vm9403_vm3 = vmpackc.low %vm410_vm1, %vm9133_vm2  ;;  %s9070_s25 = sshll.u32 %s9134_s17, 4  ;;  %s9071_s25 = int_to_ptr.vmem [resolvable:$false] %s9070_s25 }
  0x21   : > { %8109 = vmatpush3.bf16.msra.mxu0 %v9293_v18  ;;  %v9407_v50 = vpack.c.bf16 %v5180_v47, %v5179_v46  ;;  %v5189_v51 = vld [vmem:[%s12297_s1 + $0x100] sm:$0xff]  ;;  %v5190_v52 = vld [vmem:[%s12297_s1 + $0x108] sm:$0xff]  ;;  %v5191_v58 = vld [vmem:[%s12297_s1 + $0x110] sm:$0xff]  ;;  %p9068_p12 = pnand %p9067_p11, %p9228_p5  ;;  %s9072_s22 = scalar_lea.vmem %s9071_s25, 256 }
  0x22   : > { %8134 = vmatpush3.bf16.msra.mxu1 %v9297_v19  ;;  %8110 = vmatprep.subr.bf16.mxu0 %v12310_v3  ;;  %v5213_v53 = vld [vmem:[%s12297_s1 + $0x180] sm:$0xff]  ;;  %v5214_v54 = vld [vmem:[%s12297_s1 + $0x188] sm:$0xff]  ;;  %v9433_v56 = vpack.c.bf16 %v5190_v52, %v5189_v51  ;;  %v5192_v59 = vld [vmem:[%s12297_s1 + $0x118] sm:$0xff]  ;;  %p9073_p0 = scmp.lt.s32.totalorder %s12256_s28, %s9071_s25  ;;  %p9074_p1 = scmp.lt.s32.totalorder %s9072_s22, %s9066_s20 }
  0x23   : > { %8135 = vmatprep.subr.bf16.mxu1 %v12310_v3  ;;  %v9431_v55 = vld [vmem:[%s9412_s27] sm:$0xff]  ;;  %v9439_v57 = vpack.c.bf16 %v5214_v54, %v5213_v53  ;;  %v5215_v60 = vld [vmem:[%s12297_s1 + $0x190] sm:$0xff]  ;;  %v5216_v61 = vld [vmem:[%s12297_s1 + $0x198] sm:$0xff]  ;;  %v9459_v62 = vpack.c.bf16 %v5192_v59, %v5191_v58  ;;  %p9069_p13 = pneg %p9068_p12 }
  0x24   : > { %v9462_v63 = vld [vmem:[%s9412_s27 + $0x8] sm:$0xff]  ;;  %v9466_v0 = vpack.c.bf16 %v5216_v61, %v5215_v60  ;;  %v5193_v1 = vld [vmem:[%s12297_s1 + $0x120] sm:$0xff]  ;;  %v9493_v9 = vld [vmem:[%s9412_s27 + $0x10] sm:$0xff]  ;;  %p9075_p2 = por %p9074_p1, %p9073_p0 }
  0x25   : > { %8112 = vmatpush3.bf16.msra.mxu0 %v9313_v24  ;;  %v5194_v2 = vld [vmem:[%s12297_s1 + $0x128] sm:$0xff]  ;;  %v5217_v5 = vld [vmem:[%s12297_s1 + $0x1a0] sm:$0xff]  ;;  %v5195_v14 = vld [vmem:[%s12297_s1 + $0x130] sm:$0xff] }
  0x26   : > { %8137 = vmatpush3.bf16.msra.mxu1 %v9317_v25  ;;  %8113 = vmatprep.subr.bf16.mxu0 %v12310_v3  ;;  %v5218_v6 = vld [vmem:[%s12297_s1 + $0x1a8] sm:$0xff]  ;;  %v9490_v7 = vpack.c.bf16 %v5194_v2, %v5193_v1  ;;  %v5196_v15 = vld [vmem:[%s12297_s1 + $0x138] sm:$0xff]  ;;  %v5219_v16 = vld [vmem:[%s12297_s1 + $0x1b0] sm:$0xff]  ;;  %p9076_p3 = pnand %p9075_p2, %p9069_p13 }
  0x27   : > { %8138 = vmatprep.subr.bf16.mxu1 %v12310_v3  ;;  %v9497_v10 = vpack.c.bf16 %v5218_v6, %v5217_v5  ;;  %v5220_v17 = vld [vmem:[%s12297_s1 + $0x1b8] sm:$0xff]  ;;  %v9521_v20 = vpack.c.bf16 %v5196_v15, %v5195_v14  ;;  %v5197_v23 = vld [vmem:[%s12297_s1 + $0x140] sm:$0xff]  ;;  %v5198_v26 = vld [vmem:[%s12297_s1 + $0x148] sm:$0xff] }
  0x28   : > { %v9524_v21 = vld [vmem:[%s9412_s27 + $0x18] sm:$0xff]  ;;  %v9528_v22 = vpack.c.bf16 %v5220_v17, %v5219_v16  ;;  %v5221_v27 = vld [vmem:[%s12297_s1 + $0x1c0] sm:$0xff]  ;;  %v5222_v28 = vld [vmem:[%s12297_s1 + $0x1c8] sm:$0xff]  ;;  %v9552_v29 = vpack.c.bf16 %v5198_v26, %v5197_v23 }
  0x29   : > { %8115 = vmatpush3.bf16.msra.mxu0 %v9333_v30  ;;  %v9555_v32 = vld [vmem:[%s9412_s27 + $0x20] sm:$0xff]  ;;  %v9559_v33 = vpack.c.bf16 %v5222_v28, %v5221_v27  ;;  %v5199_v34 = vld [vmem:[%s12297_s1 + $0x150] sm:$0xff]  ;;  %v5200_v35 = vld [vmem:[%s12297_s1 + $0x158] sm:$0xff] }
  0x2a   : > { %8140 = vmatpush3.bf16.msra.mxu1 %v9337_v31  ;;  %8116 = vmatprep.subr.bf16.mxu0 %v12310_v3  ;;  %v5223_v38 = vld [vmem:[%s12297_s1 + $0x1d0] sm:$0xff]  ;;  %v5224_v39 = vld [vmem:[%s12297_s1 + $0x1d8] sm:$0xff]  ;;  %v9583_v40 = vpack.c.bf16 %v5200_v35, %v5199_v34  ;;  %v9586_v41 = vld [vmem:[%s9412_s27 + $0x28] sm:$0xff] }
  0x2b   : > { %8141 = vmatprep.subr.bf16.mxu1 %v12310_v3  ;;  %v9590_v45 = vpack.c.bf16 %v5224_v39, %v5223_v38  ;;  %v5201_v46 = vld [vmem:[%s12297_s1 + $0x160] sm:$0xff]  ;;  %v5202_v47 = vld [vmem:[%s12297_s1 + $0x168] sm:$0xff]  ;;  %v9617_v54 = vld [vmem:[%s9412_s27 + $0x30] sm:$0xff] }
  0x2c   : > { %v5225_v51 = vld [vmem:[%s12297_s1 + $0x1e0] sm:$0xff]  ;;  %v5226_v52 = vld [vmem:[%s12297_s1 + $0x1e8] sm:$0xff]  ;;  %v9614_v53 = vpack.c.bf16 %v5202_v47, %v5201_v46  ;;  %v5203_v59 = vld [vmem:[%s12297_s1 + $0x170] sm:$0xff] }
  0x2d   : > { %8118 = vmatpush3.bf16.msra.mxu0 %v9354_v36  ;;  %v9621_v58 = vpack.c.bf16 %v5226_v52, %v5225_v51  ;;  %v5204_v60 = vld [vmem:[%s12297_s1 + $0x178] sm:$0x3f]  ;;  %v5227_v61 = vld [vmem:[%s12297_s1 + $0x1f0] sm:$0xff]  ;;  %v5323_v14 = vld [vmem:[%s12297_s1 + $0xc8] sm:$0xff] }
  0x2e   : > { %8143 = vmatpush3.bf16.msra.mxu1 %v9358_v37  ;;  %8119 = vmatprep.subr.bf16.mxu0 %v12310_v3  ;;  %v5228_v1 = vld [vmem:[%s12297_s1 + $0x1f8] sm:$0x3f]  ;;  %v9645_v2 = vpack.c.bf16 %v5204_v60, %v5203_v59  ;;  %v9973_v15 = vld [vmem:[%s9412_s27 + $0x88] sm:$0xff]  ;;  %v5324_v17 = vld [vmem:[%s12297_s1 + $0xd0] sm:$0xff] }
  0x2f   : > { %8144 = vmatprep.subr.bf16.mxu1 %v12310_v3  ;;  %v9649_v5 = vpack.c.bf16 %v5228_v1, %v5227_v61  ;;  %v5278_v6 = vld [vmem:[%s12299_s3 + $0x38] sm:$0xff]  ;;  %v5279_v23 = vld [vmem:[%s12299_s3 + $0x40] sm:$0xff]  ;;  %v5280_v26 = vld [vmem:[%s12299_s3 + $0x48] sm:$0xff] }
  0x30   : > { %v8305_v27 = vpack.c.bf16 %v5280_v26, %v5279_v23  ;;  %v5326_v28 = vld [vmem:[%s12297_s1 + $0xe0] sm:$0xff]  ;;  %v5281_v34 = vld [vmem:[%s12299_s3 + $0x50] sm:$0xff]  ;;  %v5282_v35 = vld [vmem:[%s12299_s3 + $0x58] sm:$0x3] }
  0x31   : > { %8121 = vmatpush3.bf16.msra.mxu0 %v9375_v42  ;;  %v5328_v38 = vld [vmem:[%s12297_s1 + $0xf0] sm:$0xff]  ;;  %v8308_v39 = vpack.c.bf16 %v5282_v35, %v5281_v34  ;;  %vm10034_vm6 = vmpackc.low %vm1414_vm5, %vm9133_vm2  ;;  %v5362_v59 = vld [vmem:[%s12297_s1 + $0x180] sm:$0xff] }
  0x32   : > { %8146 = vmatpush3.bf16.msra.mxu1 %v9379_v43  ;;  %8122 = vmatprep.subr.bf16.mxu0 %v12310_v3  ;;  %v5363_v60 = vld [vmem:[%s12297_s1 + $0x188] sm:$0xff]  ;;  %vm10866_vm10 = vmpackc.low %vm2984_vm9, %vm9133_vm2 }
  0x33   : > { %8147 = vmatprep.subr.bf16.mxu1 %v12310_v3 }
  0x35   : > { %8125 = vmatpush3.bf16.msk.msra.mxu0 %vm9403_vm3, %v9398_v48 }
  0x36   : > { %8150 = vmatpush3.bf16.msk.msra.mxu1 %vm9403_vm3, %v9407_v50  ;;  %8151 = vmatprep.subr.bf16.mxu0 %v12310_v3 }
  0x37   : > { %8176 = vmatprep.subr.bf16.mxu1 %v12310_v3 }
  0x38   : > { %6436 = vmatmul.mubr.msk.f32.vlgmr.msra.gmra.mrb[0].mxu0 %vm388_vm4, %v9431_v55 }
  0x39   : > { %6489 = vmatmul.mubr.msk.f32.vlgmr.msra.gmra.mrb[0].mxu1 %vm388_vm4, %v9431_v55  ;;  %8153 = vmatpush3.bf16.msra.mxu0 %v9433_v56 }
  0x3a   : > { %8178 = vmatpush3.bf16.msra.mxu1 %v9439_v57  ;;  %8154 = vmatprep.subr.bf16.mxu0 %v12310_v3 }
  0x3b   : > { %8179 = vmatprep.subr.bf16.mxu1 %v12310_v3  ;;  %6438 = vmatprep.mubr.msk.f32.mxu0 %vm9131_vm0, %v12307_v11 }
  0x3c   : > { %6439 = vmatmul.mubr.msk.f32.gmra.mrb[2].mxu0 %vm388_vm4, %v9462_v63  ;;  %6491 = vmatprep.mubr.msk.f32.mxu1 %vm9131_vm0, %v12307_v11 }
  0x3d   : > { %8156 = vmatpush3.bf16.msra.mxu0 %v9459_v62  ;;  %6492 = vmatmul.mubr.msk.f32.gmra.mrb[2].mxu1 %vm388_vm4, %v9462_v63 }
  0x3e   : > { %8181 = vmatpush3.bf16.msra.mxu1 %v9466_v0  ;;  %8157 = vmatprep.subr.bf16.mxu0 %v12310_v3 }
  0x3f   : > { %8182 = vmatprep.subr.bf16.mxu1 %v12310_v3  ;;  %6441 = vmatprep.mubr.msk.f32.mxu0 %vm9131_vm0, %v12307_v11 }
  0x40   : > { %6442 = vmatmul.mubr.msk.f32.gmra.mrb[4].mxu0 %vm388_vm4, %v9493_v9  ;;  %6494 = vmatprep.mubr.msk.f32.mxu1 %vm9131_vm0, %v12307_v11 }
  0x41   : > { %8159 = vmatpush3.bf16.msra.mxu0 %v9490_v7  ;;  %6495 = vmatmul.mubr.msk.f32.gmra.mrb[4].mxu1 %vm388_vm4, %v9493_v9 }
  0x42   : > { %8184 = vmatpush3.bf16.msra.mxu1 %v9497_v10  ;;  %8160 = vmatprep.subr.bf16.mxu0 %v12310_v3 }
  0x43   : > { %8185 = vmatprep.subr.bf16.mxu1 %v12310_v3  ;;  %6444 = vmatprep.mubr.msk.f32.mxu0 %vm9131_vm0, %v12307_v11 }
  0x44   : > { %6445 = vmatmul.mubr.msk.f32.gmra.mrb[6].mxu0 %vm388_vm4, %v9524_v21  ;;  %6497 = vmatprep.mubr.msk.f32.mxu1 %vm9131_vm0, %v12307_v11 }
  0x45   : > { %8162 = vmatpush3.bf16.msra.mxu0 %v9521_v20  ;;  %6498 = vmatmul.mubr.msk.f32.gmra.mrb[6].mxu1 %vm388_vm4, %v9524_v21 }
  0x46   : > { %8187 = vmatpush3.bf16.msra.mxu1 %v9528_v22  ;;  %8163 = vmatprep.subr.bf16.mxu0 %v12310_v3 }
  0x47   : > { %8188 = vmatprep.subr.bf16.mxu1 %v12310_v3  ;;  %6447 = vmatprep.mubr.msk.f32.mxu0 %vm9131_vm0, %v12307_v11 }
  0x48   : > { %6448 = vmatmul.mubr.msk.f32.gmra.mrb[8].mxu0 %vm388_vm4, %v9555_v32  ;;  %6500 = vmatprep.mubr.msk.f32.mxu1 %vm9131_vm0, %v12307_v11 }
  0x49   : > { %8165 = vmatpush3.bf16.msra.mxu0 %v9552_v29  ;;  %6501 = vmatmul.mubr.msk.f32.gmra.mrb[8].mxu1 %vm388_vm4, %v9555_v32 }
  0x4a   : > { %8190 = vmatpush3.bf16.msra.mxu1 %v9559_v33  ;;  %8166 = vmatprep.subr.bf16.mxu0 %v12310_v3 }
  0x4b   : > { %8191 = vmatprep.subr.bf16.mxu1 %v12310_v3  ;;  %6450 = vmatprep.mubr.msk.f32.mxu0 %vm9131_vm0, %v12307_v11 }
  0x4c   : > { %6451 = vmatmul.mubr.msk.f32.gmra.mrb[10].mxu0 %vm388_vm4, %v9586_v41  ;;  %6503 = vmatprep.mubr.msk.f32.mxu1 %vm9131_vm0, %v12307_v11 }
  0x4d   : > { %8168 = vmatpush3.bf16.msra.mxu0 %v9583_v40  ;;  %6504 = vmatmul.mubr.msk.f32.gmra.mrb[10].mxu1 %vm388_vm4, %v9586_v41 }
  0x4e   : > { %8193 = vmatpush3.bf16.msra.mxu1 %v9590_v45  ;;  %8169 = vmatprep.subr.bf16.mxu0 %v12310_v3 }
  0x4f   : > { %8194 = vmatprep.subr.bf16.mxu1 %v12310_v3  ;;  %6453 = vmatprep.mubr.msk.f32.mxu0 %vm9131_vm0, %v12307_v11 }
  0x50   : > { %6454 = vmatmul.mubr.msk.f32.gmra.mrb[12].mxu0 %vm388_vm4, %v9617_v54  ;;  %6506 = vmatprep.mubr.msk.f32.mxu1 %vm9131_vm0, %v12307_v11 }
  0x51   : > { %8171 = vmatpush3.bf16.msra.mxu0 %v9614_v53  ;;  %6507 = vmatmul.mubr.msk.f32.gmra.mrb[12].mxu1 %vm388_vm4, %v9617_v54 }
  0x52   : > { %8196 = vmatpush3.bf16.msra.mxu1 %v9621_v58  ;;  %8172 = vmatprep.subr.bf16.mxu0 %v12310_v3 }
  0x53   : > { %8197 = vmatprep.subr.bf16.mxu1 %v12310_v3  ;;  %6541 = vmatprep.mubr.msk.f32.mxu0 %vm9131_vm0, %v12307_v11 }
  0x54   : > { %6594 = vmatprep.mubr.msk.f32.mxu1 %vm9131_vm0, %v12307_v11 }
  0x55   : > { %8175 = vmatpush3.bf16.msk.msra.mxu0 %vm9403_vm3, %v9645_v2 }
  0x56   : > { %8200 = vmatpush3.bf16.msk.msra.mxu1 %vm9403_vm3, %v9649_v5  ;;  %8201 = vmatprep.subr.bf16.mxu0 %v12310_v3 }
  0x57   : > { %8226 = vmatprep.subr.bf16.mxu1 %v12310_v3 }
  0x58   : > { %6542 = vmatmul.mubr.msk.f32.vlgmr.msra.gmra.mrb[14].mxu0 %vm388_vm4, %v9431_v55 }
  0x59   : > { %6595 = vmatmul.mubr.msk.f32.vlgmr.msra.gmra.mrb[14].mxu1 %vm388_vm4, %v9431_v55  ;;  %8203 = vmatpush3.bf16.msra.mxu0 %v9248_v4  ;;  %v5242_v55 = vld [vmem:[%s9412_s27 + $0x60] sm:$0xff] }
  0x5a   : > { %8228 = vmatpush3.bf16.msra.mxu1 %v9260_v8  ;;  %8204 = vmatprep.subr.bf16.mxu0 %v12310_v3 }
  0x5b   : > { %8229 = vmatprep.subr.bf16.mxu1 %v12310_v3  ;;  %6544 = vmatprep.mubr.msk.f32.mxu0 %vm9131_vm0, %v12307_v11 }
  0x5c   : > { %6545 = vmatmul.mubr.msk.f32.gmra.mrb[16].mxu0 %vm388_vm4, %v9462_v63  ;;  %6597 = vmatprep.mubr.msk.f32.mxu1 %vm9131_vm0, %v12307_v11 }
  0x5d   : > { %8206 = vmatpush3.bf16.msra.mxu0 %v9273_v12  ;;  %6598 = vmatmul.mubr.msk.f32.gmra.mrb[16].mxu1 %vm388_vm4, %v9462_v63  ;;  %v9932_v63 = vld [vmem:[%s9412_s27 + $0x70] sm:$0xff] }
  0x5e   : > { %8231 = vmatpush3.bf16.msra.mxu1 %v9277_v13  ;;  %8207 = vmatprep.subr.bf16.mxu0 %v12310_v3 }
  0x5f   : > { %8232 = vmatprep.subr.bf16.mxu1 %v12310_v3  ;;  %6547 = vmatprep.mubr.msk.f32.mxu0 %vm9131_vm0, %v12307_v11 }
  0x60   : > { %6548 = vmatmul.mubr.msk.f32.gmra.mrb[18].mxu0 %vm388_vm4, %v9493_v9  ;;  %6600 = vmatprep.mubr.msk.f32.mxu1 %vm9131_vm0, %v12307_v11 }
  0x61   : > { %8209 = vmatpush3.bf16.msra.mxu0 %v9293_v18  ;;  %6601 = vmatmul.mubr.msk.f32.gmra.mrb[18].mxu1 %vm388_vm4, %v9493_v9  ;;  %v9957_v9 = vld [vmem:[%s9412_s27 + $0x80] sm:$0xff] }
  0x62   : > { %8234 = vmatpush3.bf16.msra.mxu1 %v9297_v19  ;;  %8210 = vmatprep.subr.bf16.mxu0 %v12310_v3 }
  0x63   : > { %8235 = vmatprep.subr.bf16.mxu1 %v12310_v3  ;;  %6550 = vmatprep.mubr.msk.f32.mxu0 %vm9131_vm0, %v12307_v11 }
  0x64   : > { %6551 = vmatmul.mubr.msk.f32.gmra.mrb[20].mxu0 %vm388_vm4, %v9524_v21  ;;  %6603 = vmatprep.mubr.msk.f32.mxu1 %vm9131_vm0, %v12307_v11 }
  0x65   : > { %8212 = vmatpush3.bf16.msra.mxu0 %v9313_v24  ;;  %6604 = vmatmul.mubr.msk.f32.gmra.mrb[20].mxu1 %vm388_vm4, %v9524_v21  ;;  %v9990_v21 = vld [vmem:[%s9412_s27 + $0x90] sm:$0xff] }
  0x66   : > { %8237 = vmatpush3.bf16.msra.mxu1 %v9317_v25  ;;  %8213 = vmatprep.subr.bf16.mxu0 %v12310_v3 }
  0x67   : > { %8238 = vmatprep.subr.bf16.mxu1 %v12310_v3  ;;  %6553 = vmatprep.mubr.msk.f32.mxu0 %vm9131_vm0, %v12307_v11 }
  0x68   : > { %6554 = vmatmul.mubr.msk.f32.gmra.mrb[22].mxu0 %vm388_vm4, %v9555_v32  ;;  %6606 = vmatprep.mubr.msk.f32.mxu1 %vm9131_vm0, %v12307_v11 }
  0x69   : > { %8215 = vmatpush3.bf16.msra.mxu0 %v9333_v30  ;;  %6607 = vmatmul.mubr.msk.f32.gmra.mrb[22].mxu1 %vm388_vm4, %v9555_v32  ;;  %v10013_v32 = vld [vmem:[%s9412_s27 + $0x98] sm:$0xff] }
  0x6a   : > { %8240 = vmatpush3.bf16.msra.mxu1 %v9337_v31  ;;  %8216 = vmatprep.subr.bf16.mxu0 %v12310_v3  ;;  %v9752_v31 = vld [vmem:[%s9412_s27 + $0x38] sm:$0xff] }
  0x6b   : > { %8241 = vmatprep.subr.bf16.mxu1 %v12310_v3  ;;  %6556 = vmatprep.mubr.msk.f32.mxu0 %vm9131_vm0, %v12307_v11 }
  0x6c   : > { %6557 = vmatmul.mubr.msk.f32.gmra.mrb[24].mxu0 %vm388_vm4, %v9586_v41  ;;  %6609 = vmatprep.mubr.msk.f32.mxu1 %vm9131_vm0, %v12307_v11 }
  0x6d   : > { %8218 = vmatpush3.bf16.msra.mxu0 %v9354_v36  ;;  %6610 = vmatmul.mubr.msk.f32.gmra.mrb[24].mxu1 %vm388_vm4, %v9586_v41  ;;  %v10039_v41 = vld [vmem:[%s9412_s27 + $0xa0] sm:$0xff] }
  0x6e   : > { %8243 = vmatpush3.bf16.msra.mxu1 %v9358_v37  ;;  %8219 = vmatprep.subr.bf16.mxu0 %v12310_v3  ;;  %v9765_v37 = vld [vmem:[%s9412_s27 + $0x40] sm:$0xff] }
  0x6f   : > { %8244 = vmatprep.subr.bf16.mxu1 %v12310_v3  ;;  %6559 = vmatprep.mubr.msk.f32.mxu0 %vm9131_vm0, %v12307_v11 }
  0x70   : > { %6560 = vmatmul.mubr.msk.f32.gmra.mrb[26].mxu0 %vm388_vm4, %v9617_v54  ;;  %6612 = vmatprep.mubr.msk.f32.mxu1 %vm9131_vm0, %v12307_v11 }
  0x71   : > { %8221 = vmatpush3.bf16.msra.mxu0 %v9375_v42  ;;  %6613 = vmatmul.mubr.msk.f32.gmra.mrb[26].mxu1 %vm388_vm4, %v9617_v54 }
  0x72   : > { %8246 = vmatpush3.bf16.msra.mxu1 %v9379_v43  ;;  %8222 = vmatprep.subr.bf16.mxu0 %v12310_v3  ;;  %v9780_v43 = vld [vmem:[%s9412_s27 + $0x48] sm:$0xff] }
  0x73   : > { %8247 = vmatprep.subr.bf16.mxu1 %v12310_v3  ;;  %6647 = vmatprep.mubr.msk.f32.mxu0 %vm9131_vm0, %v12307_v11 }
  0x74   : > { %6700 = vmatprep.mubr.msk.f32.mxu1 %vm9131_vm0, %v12307_v11 }
  0x75   : > { %8225 = vmatpush3.bf16.msk.msra.mxu0 %vm9403_vm3, %v9398_v48  ;;  %v9795_v48 = vld [vmem:[%s9412_s27 + $0x50] sm:$0xff] }
  0x76   : > { %8250 = vmatpush3.bf16.msk.msra.mxu1 %vm9403_vm3, %v9407_v50  ;;  %8251 = vmatprep.subr.bf16.mxu0 %v12310_v3  ;;  %v5241_v50 = vld [vmem:[%s9412_s27 + $0x58] sm:$0xff] }
  0x77   : > { %8276 = vmatprep.subr.bf16.mxu1 %v12310_v3 }
  0x78   : > { %6648 = vmatmul.mubr.msk.f32.vlgmr.msra.gmra.mrb[28].mxu0 %vm388_vm4, %v9752_v31 }
  0x79   : > { %8253 = vmatpush3.bf16.msra.mxu0 %v9433_v56  ;;  %6701 = vmatmul.mubr.msk.f32.vlgmr.msra.gmra.mrb[28].mxu1 %vm388_vm4, %v9752_v31  ;;  %v5243_v56 = vld [vmem:[%s9412_s27 + $0x68] sm:$0xff] }
  0x7a   : > { %8278 = vmatpush3.bf16.msra.mxu1 %v9439_v57  ;;  %6650 = vmatprep.mubr.msk.f32.mxu0 %vm9131_vm0, %v12307_v11  ;;  %v1672_v57 = vld [vmem:[%s12297_s1 + $0x78] sm:$0x3f] }
  0x7b   : > { %8254 = vmatprep.subr.bf16.mxu0 %v12310_v3  ;;  %6703 = vmatprep.mubr.msk.f32.mxu1 %vm9131_vm0, %v12307_v11 }
  0x7c   : > { %6651 = vmatmul.mubr.msk.f32.gmra.mrb[30].mxu0 %vm388_vm4, %v9765_v37  ;;  %8279 = vmatprep.subr.bf16.mxu1 %v12310_v3 }
  0x7d   : > { %8256 = vmatpush3.bf16.msra.mxu0 %v9459_v62  ;;  %6704 = vmatmul.mubr.msk.f32.gmra.mrb[30].mxu1 %vm388_vm4, %v9765_v37  ;;  %v9925_v62 = vpack.c.bf16 %v1672_v57, %v9384_v44  ;;  %v9942_v44 = vld [vmem:[%s9412_s27 + $0x78] sm:$0xff] }
  0x7e   : > { %8281 = vmatpush3.bf16.msra.mxu1 %v9466_v0  ;;  %6653 = vmatprep.mubr.msk.f32.mxu0 %vm9131_vm0, %v12307_v11  ;;  %v5277_v0 = vld [vmem:[%s12299_s3 + $0x30] sm:$0xff] }
  0x7f   : > { %8257 = vmatprep.subr.bf16.mxu0 %v12310_v3  ;;  %6706 = vmatprep.mubr.msk.f32.mxu1 %vm9131_vm0, %v12307_v11  ;;  %12329 = vst [vmem:[#allocation7_spill] sm:$0xff] %v9925_v62 }
  0x80   : > { %6654 = vmatmul.mubr.msk.f32.gmra.mrb[32].mxu0 %vm388_vm4, %v9780_v43  ;;  %8282 = vmatprep.subr.bf16.mxu1 %v12310_v3 }
  0x81   : > { %8259 = vmatpush3.bf16.msra.mxu0 %v9490_v7  ;;  %6707 = vmatmul.mubr.msk.f32.gmra.mrb[32].mxu1 %vm388_vm4, %v9780_v43  ;;  %v8302_v7 = vpack.c.bf16 %v5278_v6, %v5277_v0 }
  0x82   : > { %8284 = vmatpush3.bf16.msra.mxu1 %v9497_v10  ;;  %6656 = vmatprep.mubr.msk.f32.mxu0 %vm9131_vm0, %v12307_v11  ;;  %v5322_v10 = vld [vmem:[%s12297_s1 + $0xc0] sm:$0xff] }
  0x83   : > { %8260 = vmatprep.subr.bf16.mxu0 %v12310_v3  ;;  %6709 = vmatprep.mubr.msk.f32.mxu1 %vm9131_vm0, %v12307_v11  ;;  %v9976_v16 = vpack.c.bf16 %v5323_v14, %v5322_v10  ;;  %v5367_v10 = vld [vmem:[%s12297_s1 + $0x1a8] sm:$0xff] }
  0x84   : > { %6657 = vmatmul.mubr.msk.f32.gmra.mrb[34].mxu0 %vm388_vm4, %v9795_v48  ;;  %8285 = vmatprep.subr.bf16.mxu1 %v12310_v3 }
  0x85   : > { %8262 = vmatpush3.bf16.msra.mxu0 %v9521_v20  ;;  %6710 = vmatmul.mubr.msk.f32.gmra.mrb[34].mxu1 %vm388_vm4, %v9795_v48  ;;  %v5325_v20 = vld [vmem:[%s12297_s1 + $0xd8] sm:$0xff] }
  0x86   : > { %8287 = vmatpush3.bf16.msra.mxu1 %v9528_v22  ;;  %6659 = vmatprep.mubr.msk.f32.mxu0 %vm9131_vm0, %v12307_v11  ;;  %v9993_v22 = vpack.c.bf16 %v5325_v20, %v5324_v17 }
  0x87   : > { %8263 = vmatprep.subr.bf16.mxu0 %v12310_v3  ;;  %6712 = vmatprep.mubr.msk.f32.mxu1 %vm9131_vm0, %v12307_v11 }
  0x88   : > { %6660 = vmatmul.mubr.msk.f32.gmra.mrb[36].mxu0 %vm388_vm4, %v5241_v50  ;;  %8288 = vmatprep.subr.bf16.mxu1 %v12310_v3 }
  0x89   : > { %8265 = vmatpush3.bf16.msra.mxu0 %v9552_v29  ;;  %6713 = vmatmul.mubr.msk.f32.gmra.mrb[36].mxu1 %vm388_vm4, %v5241_v50  ;;  %v5327_v29 = vld [vmem:[%s12297_s1 + $0xe8] sm:$0xff] }
  0x8a   : > { %8290 = vmatpush3.bf16.msra.mxu1 %v9559_v33  ;;  %6662 = vmatprep.mubr.msk.f32.mxu0 %vm9131_vm0, %v12307_v11  ;;  %v10016_v33 = vpack.c.bf16 %v5327_v29, %v5326_v28  ;;  %v5368_v28 = vld [vmem:[%s12297_s1 + $0x1b0] sm:$0xff]  ;;  %v5369_v29 = vld [vmem:[%s12297_s1 + $0x1b8] sm:$0xff] }
  0x8b   : > { %8266 = vmatprep.subr.bf16.mxu0 %v12310_v3  ;;  %6715 = vmatprep.mubr.msk.f32.mxu1 %vm9131_vm0, %v12307_v11 }
  0x8c   : > { %6663 = vmatmul.mubr.msk.f32.gmra.mrb[38].mxu0 %vm388_vm4, %v5242_v55  ;;  %8291 = vmatprep.subr.bf16.mxu1 %v12310_v3 }
  0x8d   : > { %8268 = vmatpush3.bf16.msra.mxu0 %v9583_v40  ;;  %6716 = vmatmul.mubr.msk.f32.gmra.mrb[38].mxu1 %vm388_vm4, %v5242_v55 }
  0x8e   : > { %8293 = vmatpush3.bf16.msra.mxu1 %v9590_v45  ;;  %6665 = vmatprep.mubr.msk.f32.mxu0 %vm9131_vm0, %v12307_v11  ;;  %v5329_v45 = vld [vmem:[%s12297_s1 + $0xf8] sm:$0x3f] }
  0x8f   : > { %8269 = vmatprep.subr.bf16.mxu0 %v12310_v3  ;;  %6718 = vmatprep.mubr.msk.f32.mxu1 %vm9131_vm0, %v12307_v11  ;;  %v10047_v46 = vpack.c.bf16 %v5329_v45, %v5328_v38  ;;  %v10150_v38 = vpack.c.bf16 %v5369_v29, %v5368_v28 }
  0x90   : > { %6666 = vmatmul.mubr.msk.f32.gmra.mrb[40].mxu0 %vm388_vm4, %v5243_v56  ;;  %8294 = vmatprep.subr.bf16.mxu1 %v12310_v3 }
  0x91   : > { %8271 = vmatpush3.bf16.msra.mxu0 %v9614_v53  ;;  %6719 = vmatmul.mubr.msk.f32.gmra.mrb[40].mxu1 %vm388_vm4, %v5243_v56 }
  0x92   : > { %8296 = vmatpush3.bf16.msra.mxu1 %v9621_v58  ;;  %8272 = vmatprep.subr.bf16.mxu0 %v12310_v3 }
  0x93   : > { %8297 = vmatprep.subr.bf16.mxu1 %v12310_v3  ;;  %6753 = vmatprep.mubr.msk.f32.mxu0 %vm9131_vm0, %v12307_v11 }
  0x94   : > { %6806 = vmatprep.mubr.msk.f32.mxu1 %vm9131_vm0, %v12307_v11 }
  0x95   : > { %8275 = vmatpush3.bf16.msk.msra.mxu0 %vm9403_vm3, %v9645_v2  ;;  %v10102_v2 = vpack.c.bf16 %v5363_v60, %v5362_v59  ;;  %v5371_v59 = vld [vmem:[%s12297_s1 + $0x1c8] sm:$0xff] }
  0x96   : > { %8300 = vmatpush3.bf16.msk.msra.mxu1 %vm9403_vm3, %v9649_v5  ;;  %8301 = vmatprep.subr.bf16.mxu0 %v12310_v3 }
  0x97   : > { %8321 = vmatprep.subr.bf16.mxu1 %v12310_v3 }
  0x98   : > { %6754 = vmatmul.mubr.msk.f32.vlgmr.msra.gmra.mrb[42].mxu0 %vm388_vm4, %v9752_v31 }
  0x99   : > { %6807 = vmatmul.mubr.msk.f32.vlgmr.msra.gmra.mrb[42].mxu1 %vm388_vm4, %v9752_v31  ;;  %6756 = vmatprep.mubr.msk.f32.mxu0 %vm9131_vm0, %v12307_v11 }
  0x9a   : > { %6809 = vmatprep.mubr.msk.f32.mxu1 %vm9131_vm0, %v12307_v11  ;;  %8323 = vmatpush3.bf16.msra.mxu1 %v9248_v4 }
  0x9b   : > { %8324 = vmatprep.subr.bf16.mxu1 %v12310_v3  ;;  %8303 = vmatpush3.bf16.msra.mxu0 %v8302_v7  ;;  %v5366_v7 = vld [vmem:[%s12297_s1 + $0x1a0] sm:$0xff] }
  0x9c   : > { %6757 = vmatmul.mubr.msk.f32.gmra.mrb[44].mxu0 %vm388_vm4, %v9765_v37  ;;  %8304 = vmatprep.subr.bf16.mxu0 %v12310_v3  ;;  %v10134_v20 = vpack.c.bf16 %v5367_v10, %v5366_v7  ;;  %v5373_v7 = vld [vmem:[%s12297_s1 + $0x1d8] sm:$0xff] }
  0x9d   : > { %6810 = vmatmul.mubr.msk.f32.gmra.mrb[44].mxu1 %vm388_vm4, %v9765_v37  ;;  %6759 = vmatprep.mubr.msk.f32.mxu0 %vm9131_vm0, %v12307_v11 }
  0x9e   : > { %6812 = vmatprep.mubr.msk.f32.mxu1 %vm9131_vm0, %v12307_v11  ;;  %8326 = vmatpush3.bf16.msra.mxu1 %v9273_v12 }
  0x9f   : > { %8327 = vmatprep.subr.bf16.mxu1 %v12310_v3  ;;  %8306 = vmatpush3.bf16.msra.mxu0 %v8305_v27 }
  0xa0   : > { %6760 = vmatmul.mubr.msk.f32.gmra.mrb[46].mxu0 %vm388_vm4, %v9780_v43  ;;  %8307 = vmatprep.subr.bf16.mxu0 %v12310_v3 }
  0xa1   : > { %6813 = vmatmul.mubr.msk.f32.gmra.mrb[46].mxu1 %vm388_vm4, %v9780_v43  ;;  %6762 = vmatprep.mubr.msk.f32.mxu0 %vm9131_vm0, %v12307_v11  ;;  %v5364_v43 = vld [vmem:[%s12297_s1 + $0x190] sm:$0xff] }
  0xa2   : > { %6815 = vmatprep.mubr.msk.f32.mxu1 %vm9131_vm0, %v12307_v11  ;;  %8329 = vmatpush3.bf16.msra.mxu1 %v9293_v18 }
  0xa3   : > { %8330 = vmatprep.subr.bf16.mxu1 %v12310_v3  ;;  %8310 = vmatpush3.bf16.msk.msra.mxu0 %vm10034_vm6, %v8308_v39 }
  0xa4   : > { %6763 = vmatmul.mubr.msk.f32.gmra.mrb[48].mxu0 %vm388_vm4, %v9795_v48  ;;  %8311 = vmatprep.subr.bf16.mxu0 %v12310_v3 }
  0xa5   : > { %6816 = vmatmul.mubr.msk.f32.gmra.mrb[48].mxu1 %vm388_vm4, %v9795_v48  ;;  %6765 = vmatprep.mubr.msk.f32.mxu0 %vm9131_vm0, %v12307_v11  ;;  %v5365_v48 = vld [vmem:[%s12297_s1 + $0x198] sm:$0xff] }
  0xa6   : > { %6818 = vmatprep.mubr.msk.f32.mxu1 %vm9131_vm0, %v12307_v11  ;;  %8332 = vmatpush3.bf16.msra.mxu1 %v9313_v24 }
  0xa7   : > { %8333 = vmatprep.subr.bf16.mxu1 %v12310_v3 }
  0xa8   : > { %6766 = vmatmul.mubr.msk.f32.gmra.mrb[50].mxu0 %vm388_vm4, %v5241_v50 }
  0xa9   : > { %6819 = vmatmul.mubr.msk.f32.gmra.mrb[50].mxu1 %vm388_vm4, %v5241_v50  ;;  %6768 = vmatprep.mubr.msk.f32.mxu0 %vm9131_vm0, %v12307_v11 }
  0xaa   : > { %6821 = vmatprep.mubr.msk.f32.mxu1 %vm9131_vm0, %v12307_v11  ;;  %8335 = vmatpush3.bf16.msra.mxu1 %v9333_v30 }
  0xab   : > { %8336 = vmatprep.subr.bf16.mxu1 %v12310_v3 }
  0xac   : > { %6769 = vmatmul.mubr.msk.f32.gmra.mrb[52].mxu0 %vm388_vm4, %v5242_v55 }
  0xad   : > { %6822 = vmatmul.mubr.msk.f32.gmra.mrb[52].mxu1 %vm388_vm4, %v5242_v55  ;;  %6771 = vmatprep.mubr.msk.f32.mxu0 %vm9131_vm0, %v12307_v11 }
  0xae   : > { %6824 = vmatprep.mubr.msk.f32.mxu1 %vm9131_vm0, %v12307_v11  ;;  %8338 = vmatpush3.bf16.msra.mxu1 %v9354_v36 }
  0xaf   : > { %8339 = vmatprep.subr.bf16.mxu1 %v12310_v3 }
  0xb0   : > { %6772 = vmatmul.mubr.msk.f32.gmra.mrb[54].mxu0 %vm388_vm4, %v5243_v56 }
  0xb1   : > { %6825 = vmatmul.mubr.msk.f32.gmra.mrb[54].mxu1 %vm388_vm4, %v5243_v56  ;;  %6839 = vmatprep.mubr.msk.f32.mxu0 %vm9131_vm0, %v12307_v11  ;;  %v10118_v56 = vpack.c.bf16 %v5365_v48, %v5364_v43 }
  0xb2   : > { %8341 = vmatpush3.bf16.msra.mxu1 %v9375_v42  ;;  %6925 = vmatprep.mubr.msk.f32.mxu1 %vm9131_vm0, %v12307_v11 }
  0xb3   : > { %8342 = vmatprep.subr.bf16.mxu1 %v12310_v3 }
  0xb6   : > { %8345 = vmatpush3.bf16.msk.msra.mxu1 %vm9403_vm3, %v9925_v62 }
  0xb7   : > { %8346 = vmatprep.subr.bf16.mxu1 %v12310_v3 }
  0xb9   : > { %6926 = vmatmul.mubr.msk.f32.vlgmr.msra.gmra.mrb[56].mxu1 %vm388_vm4, %v9932_v63 }
  0xba   : > { %8348 = vmatpush3.bf16.msra.mxu1 %v9260_v8  ;;  %6928 = vmatprep.mubr.msk.f32.mxu1 %vm9131_vm0, %v12307_v11 }
  0xbb   : > { %8349 = vmatprep.subr.bf16.mxu1 %v12310_v3 }
  0xbd   : > { %6929 = vmatmul.mubr.msk.f32.gmra.mrb[58].mxu1 %vm388_vm4, %v9942_v44 }
  0xbe   : > { %8351 = vmatpush3.bf16.msra.mxu1 %v9277_v13  ;;  %6931 = vmatprep.mubr.msk.f32.mxu1 %vm9131_vm0, %v12307_v11 }
  0xbf   : > { %8352 = vmatprep.subr.bf16.mxu1 %v12310_v3 }
  0xc1   : > { %6932 = vmatmul.mubr.msk.f32.gmra.mrb[60].mxu1 %vm388_vm4, %v9957_v9 }
  0xc2   : > { %8354 = vmatpush3.bf16.msra.mxu1 %v9297_v19  ;;  %6934 = vmatprep.mubr.msk.f32.mxu1 %vm9131_vm0, %v12307_v11 }
  0xc3   : > { %8355 = vmatprep.subr.bf16.mxu1 %v12310_v3 }
  0xc5   : > { %6935 = vmatmul.mubr.msk.f32.gmra.mrb[62].mxu1 %vm388_vm4, %v9973_v15 }
  0xc6   : > { %8357 = vmatpush3.bf16.msra.mxu1 %v9317_v25  ;;  %6937 = vmatprep.mubr.msk.f32.mxu1 %vm9131_vm0, %v12307_v11 }
  0xc7   : > { %8358 = vmatprep.subr.bf16.mxu1 %v12310_v3 }
  0xc9   : > { %6938 = vmatmul.mubr.msk.f32.gmra.mrb[64].mxu1 %vm388_vm4, %v9990_v21 }
  0xca   : > { %8360 = vmatpush3.bf16.msra.mxu1 %v9976_v16  ;;  %6940 = vmatprep.mubr.msk.f32.mxu1 %vm9131_vm0, %v12307_v11 }
  0xcb   : > { %8361 = vmatprep.subr.bf16.mxu1 %v12310_v3 }
  0xcd   : > { %6941 = vmatmul.mubr.msk.f32.gmra.mrb[66].mxu1 %vm388_vm4, %v10013_v32 }
  0xce   : > { %8363 = vmatpush3.bf16.msra.mxu1 %v9993_v22  ;;  %6943 = vmatprep.mubr.msk.f32.mxu1 %vm9131_vm0, %v12307_v11 }
  0xcf   : > { %8364 = vmatprep.subr.bf16.mxu1 %v12310_v3 }
  0xd1   : > { %6944 = vmatmul.mubr.msk.f32.gmra.mrb[68].mxu1 %vm388_vm4, %v10039_v41 }
  0xd2   : > { %8366 = vmatpush3.bf16.msra.mxu1 %v10016_v33  ;;  %6978 = vmatprep.mubr.msk.f32.mxu1 %vm9131_vm0, %v12307_v11 }
  0xd3   : > { %8367 = vmatprep.subr.bf16.mxu1 %v12310_v3 }
  0xd6   : > { %8370 = vmatpush3.bf16.msk.msra.mxu1 %vm9403_vm3, %v10047_v46 }
  0xd7   : > { %8396 = vmatprep.subr.bf16.mxu1 %v12310_v3 }
  0xd9   : > { %6979 = vmatmul.mubr.msk.f32.vlgmr.msra.gmra.mrb[70].mxu1 %vm388_vm4, %v9932_v63 }
  0xda   : > { %6981 = vmatprep.mubr.msk.f32.mxu1 %vm9131_vm0, %v12307_v11  ;;  %8398 = vmatpush3.bf16.msra.mxu1 %v10102_v2 }
  0xdb   : > { %8399 = vmatprep.subr.bf16.mxu1 %v12310_v3 }
  0xdd   : > { %6982 = vmatmul.mubr.msk.f32.gmra.mrb[72].mxu1 %vm388_vm4, %v9942_v44 }
  0xde   : > { %6984 = vmatprep.mubr.msk.f32.mxu1 %vm9131_vm0, %v12307_v11  ;;  %8401 = vmatpush3.bf16.msra.mxu1 %v10118_v56 }
  0xdf   : > { %8402 = vmatprep.subr.bf16.mxu1 %v12310_v3 }
  0xe1   : > { %6985 = vmatmul.mubr.msk.f32.gmra.mrb[74].mxu1 %vm388_vm4, %v9957_v9 }
  0xe2   : > { %6987 = vmatprep.mubr.msk.f32.mxu1 %vm9131_vm0, %v12307_v11  ;;  %8404 = vmatpush3.bf16.msra.mxu1 %v10134_v20 }
  0xe3   : > { %8405 = vmatprep.subr.bf16.mxu1 %v12310_v3 }
  0xe5   : > { %6988 = vmatmul.mubr.msk.f32.gmra.mrb[76].mxu1 %vm388_vm4, %v9973_v15 }
  0xe6   : > { %6990 = vmatprep.mubr.msk.f32.mxu1 %vm9131_vm0, %v12307_v11  ;;  %8407 = vmatpush3.bf16.msra.mxu1 %v10150_v38 }
  0xe7   : > { %8408 = vmatprep.subr.bf16.mxu1 %v12310_v3 }
  0xe9   : > { %6991 = vmatmul.mubr.msk.f32.gmra.mrb[78].mxu1 %vm388_vm4, %v9990_v21 }
  0xea   : > { %6993 = vmatprep.mubr.msk.f32.mxu1 %vm9131_vm0, %v12307_v11 }
  0xed   : > { %6994 = vmatmul.mubr.msk.f32.gmra.mrb[80].mxu1 %vm388_vm4, %v10013_v32 }
  0xee   : > { %6996 = vmatprep.mubr.msk.f32.mxu1 %vm9131_vm0, %v12307_v11 }
  0xf1   : > { %6997 = vmatmul.mubr.msk.f32.gmra.mrb[82].mxu1 %vm388_vm4, %v10039_v41 }
  0xf2   : > { %7084 = vmatprep.mubr.msk.f32.mxu1 %vm9131_vm0, %v12307_v11 }
 0x10b   : > { %v10082_v47 = vpop.f32.mrb[0].mxu0 }
 0x10c   : > { %v6437_v51 = vpop.f32.mrb[1].mxu0  ;;  %v10086_v52 = vpop.f32.mrb[0].mxu1 }
 0x10d   : > { %v634_v53 = vmax.f32 %v10082_v47, %v10086_v52  ;;  %v6490_v54 = vpop.f32.mrb[1].mxu1 }
 0x10e   : > { %v5370_v54 = vld [vmem:[%s12297_s1 + $0x1c0] sm:$0xff] }
 0x10f   : > { %v10092_v58 = vpop.f32.mrb[2].mxu0 }
 0x110   : > { %v6440_v61 = vpop.f32.mrb[3].mxu0  ;;  %v10100_v1 = vpop.f32.mrb[2].mxu1 }
 0x111   : > { %v6493_v31 = vpop.f32.mrb[3].mxu1  ;;  %v12332_v47 = vmax.f32 %v10092_v58, %v10100_v1 }
 0x112   : > { %v10166_v31 = vpack.c.bf16 %v5371_v59, %v5370_v54 }
 0x113   : > { %v10107_v37 = vpop.f32.mrb[4].mxu0 }
 0x114   : > { %v6443_v50 = vpop.f32.mrb[5].mxu0  ;;  %v10116_v55 = vpop.f32.mrb[4].mxu1  ;;  %8410 = vmatpush3.bf16.msra.mxu1 %v10166_v31 }
 0x115   : > { %v6496_v0 = vpop.f32.mrb[5].mxu1  ;;  %8411 = vmatprep.subr.bf16.mxu1 %v12310_v3  ;;  %v12334_v1 = vmax.f32 %v10107_v37, %v10116_v55 }
 0x116   : > { %v5372_v0 = vld [vmem:[%s12297_s1 + $0x1d0] sm:$0xff] }
 0x117   : > { %v10123_v6 = vpop.f32.mrb[6].mxu0 }
 0x118   : > { %v6446_v14 = vpop.f32.mrb[7].mxu0  ;;  %v10132_v17 = vpop.f32.mrb[6].mxu1 }
 0x119   : > { %v6499_v26 = vpop.f32.mrb[7].mxu1  ;;  %v12335_v55 = vmax.f32 %v10123_v6, %v10132_v17 }
 0x11a   : > { %v10182_v26 = vpack.c.bf16 %v5373_v7, %v5372_v0 }
 0x11b   : > { %v10139_v27 = vpop.f32.mrb[8].mxu0 }
 0x11c   : > { %v6449_v34 = vpop.f32.mrb[9].mxu0  ;;  %v10148_v35 = vpop.f32.mrb[8].mxu1  ;;  %8413 = vmatpush3.bf16.msra.mxu1 %v10182_v26 }
 0x11d   : > { %v6502_v45 = vpop.f32.mrb[9].mxu1  ;;  %8414 = vmatprep.subr.bf16.mxu1 %v12310_v3  ;;  %v5374_v34 = vld [vmem:[%s12297_s1 + $0x1e0] sm:$0xff]  ;;  %v12336_v17 = vmax.f32 %v10139_v27, %v10148_v35 }
 0x11e   : > { %v5375_v45 = vld [vmem:[%s12297_s1 + $0x1e8] sm:$0xff] }
 0x11f   : > { %v10155_v51 = vpop.f32.mrb[10].mxu0  ;;  %v10194_v54 = vpack.c.bf16 %v5375_v45, %v5374_v34 }
 0x120   : > { %v6452_v60 = vpop.f32.mrb[11].mxu0  ;;  %v10164_v61 = vpop.f32.mrb[10].mxu1 }
 0x121   : > { %v6505_v48 = vpop.f32.mrb[11].mxu1  ;;  %8416 = vmatpush3.bf16.msra.mxu1 %v10194_v54  ;;  %v5376_v60 = vld [vmem:[%s12297_s1 + $0x1f0] sm:$0xff]  ;;  %v12337_v35 = vmax.f32 %v10155_v51, %v10164_v61 }
 0x122   : > { %8417 = vmatprep.subr.bf16.mxu1 %v12310_v3  ;;  %v5377_v48 = vld [vmem:[%s12297_s1 + $0x1f8] sm:$0x3f] }
 0x123   : > { %v10171_v50 = vpop.f32.mrb[12].mxu0 }
 0x124   : > { %v6455_v10 = vpop.f32.mrb[13].mxu0  ;;  %v10180_v14 = vpop.f32.mrb[12].mxu1 }
 0x125   : > { %v6508_v29 = vpop.f32.mrb[13].mxu1  ;;  %v10208_v10 = vpack.c.bf16 %v5377_v48, %v5376_v60  ;;  %v12338_v61 = vmax.f32 %v10171_v50, %v10180_v14  ;;  %v10416_v50 = vld [vmem:[%s9412_s27 + $0xd8] sm:$0xff] }
 0x127   : > { %8420 = vmatpush3.bf16.msk.msra.mxu1 %vm9403_vm3, %v10208_v10 }
 0x128   : > { %8446 = vmatprep.subr.bf16.mxu1 %v12310_v3 }
 0x12a   : > { %7085 = vmatmul.mubr.msk.f32.vlgmr.msra.gmra.mrb[84].mxu1 %vm388_vm4, %v9932_v63 }
 0x12b   : > { %v10197_v59 = vpop.f32.mrb[14].mxu0  ;;  %8448 = vmatpush3.bf16.msra.mxu1 %v9260_v8  ;;  %7087 = vmatprep.mubr.msk.f32.mxu1 %vm9131_vm0, %v12307_v11 }
 0x12c   : > { %v6543_v0 = vpop.f32.mrb[15].mxu0  ;;  %v10206_v7 = vpop.f32.mrb[14].mxu1  ;;  %8449 = vmatprep.subr.bf16.mxu1 %v12310_v3 }
 0x12d   : > { %v6596_v34 = vpop.f32.mrb[15].mxu1  ;;  %v12339_v14 = vmax.f32 %v10197_v59, %v10206_v7  ;;  %v10439_v59 = vld [vmem:[%s12298_s2] ss:$0 sm:$0xff] }
 0x12e   : > { %7088 = vmatmul.mubr.msk.f32.gmra.mrb[86].mxu1 %vm388_vm4, %v9942_v44 }
 0x12f   : > { %v10215_v45 = vpop.f32.mrb[16].mxu0  ;;  %8451 = vmatpush3.bf16.msra.mxu1 %v9277_v13  ;;  %7090 = vmatprep.mubr.msk.f32.mxu1 %vm9131_vm0, %v12307_v11 }
 0x130   : > { %v6546_v28 = vpop.f32.mrb[17].mxu0  ;;  %v10218_v43 = vpop.f32.mrb[16].mxu1  ;;  %8452 = vmatprep.subr.bf16.mxu1 %v12310_v3 }
 0x131   : > { %v6599_v60 = vpop.f32.mrb[17].mxu1 }
 0x132   : > { %7091 = vmatmul.mubr.msk.f32.gmra.mrb[88].mxu1 %vm388_vm4, %v9957_v9 }
 0x133   : > { %v10227_v48 = vpop.f32.mrb[18].mxu0  ;;  %8454 = vmatpush3.bf16.msra.mxu1 %v9297_v19  ;;  %7093 = vmatprep.mubr.msk.f32.mxu1 %vm9131_vm0, %v12307_v11 }
 0x134   : > { %v6549_v34 = vpop.f32.mrb[19].mxu0  ;;  %v10230_v28 = vpop.f32.mrb[18].mxu1  ;;  %8455 = vmatprep.subr.bf16.mxu1 %v12310_v3 }
 0x135   : > { %v6602_v0 = vpop.f32.mrb[19].mxu1 }
 0x136   : > { %7094 = vmatmul.mubr.msk.f32.gmra.mrb[90].mxu1 %vm388_vm4, %v9973_v15 }
 0x137   : > { %v10239_v8 = vpop.f32.mrb[20].mxu0  ;;  %8457 = vmatpush3.bf16.msra.mxu1 %v9317_v25  ;;  %7096 = vmatprep.mubr.msk.f32.mxu1 %vm9131_vm0, %v12307_v11 }
 0x138   : > { %v6552_v60 = vpop.f32.mrb[21].mxu0  ;;  %v10242_v34 = vpop.f32.mrb[20].mxu1  ;;  %8458 = vmatprep.subr.bf16.mxu1 %v12310_v3 }
 0x139   : > { %v6605_v29 = vpop.f32.mrb[21].mxu1 }
 0x13a   : > { %7097 = vmatmul.mubr.msk.f32.gmra.mrb[92].mxu1 %vm388_vm4, %v9990_v21 }
 0x13b   : > { %v10251_v13 = vpop.f32.mrb[22].mxu0  ;;  %8460 = vmatpush3.bf16.msra.mxu1 %v9976_v16  ;;  %7099 = vmatprep.mubr.msk.f32.mxu1 %vm9131_vm0, %v12307_v11 }
 0x13c   : > { %v6555_v0 = vpop.f32.mrb[23].mxu0  ;;  %v10254_v60 = vpop.f32.mrb[22].mxu1  ;;  %8461 = vmatprep.subr.bf16.mxu1 %v12310_v3 }
 0x13d   : > { %v6608_v39 = vpop.f32.mrb[23].mxu1 }
 0x13e   : > { %7100 = vmatmul.mubr.msk.f32.gmra.mrb[94].mxu1 %vm388_vm4, %v10013_v32 }
 0x13f   : > { %v10263_v19 = vpop.f32.mrb[24].mxu0  ;;  %8463 = vmatpush3.bf16.msra.mxu1 %v9993_v22  ;;  %7102 = vmatprep.mubr.msk.f32.mxu1 %vm9131_vm0, %v12307_v11 }
 0x140   : > { %v6558_v29 = vpop.f32.mrb[25].mxu0  ;;  %v10266_v0 = vpop.f32.mrb[24].mxu1  ;;  %8464 = vmatprep.subr.bf16.mxu1 %v12310_v3 }
 0x141   : > { %v6611_v23 = vpop.f32.mrb[25].mxu1 }
 0x142   : > { %7103 = vmatmul.mubr.msk.f32.gmra.mrb[96].mxu1 %vm388_vm4, %v10039_v41 }
 0x143   : > { %v10275_v25 = vpop.f32.mrb[26].mxu0  ;;  %8466 = vmatpush3.bf16.msra.mxu1 %v10016_v33  ;;  %7190 = vmatprep.mubr.msk.f32.mxu1 %vm9131_vm0, %v12307_v11 }
 0x144   : > { %v6561_v39 = vpop.f32.mrb[27].mxu0  ;;  %v10278_v29 = vpop.f32.mrb[26].mxu1  ;;  %8467 = vmatprep.subr.bf16.mxu1 %v12310_v3 }
 0x145   : > { %v6614_v57 = vpop.f32.mrb[27].mxu1 }
 0x147   : > { %8470 = vmatpush3.bf16.msk.msra.mxu1 %vm9403_vm3, %v10047_v46 }
 0x148   : > { %8496 = vmatprep.subr.bf16.mxu1 %v12310_v3 }
 0x14b   : > { %v983_v16 = vpop.f32.mrb[28].mxu0 }
 0x14c   : > { %v10297_v22 = vmax.f32 %v634_v53, %v983_v16  ;;  %v6649_v57 = vpop.f32.mrb[29].mxu0  ;;  %v10299_v23 = vpop.f32.mrb[28].mxu1 }
 0x14d   : > { %v6702_v39 = vpop.f32.mrb[29].mxu1  ;;  %v10315_v57 = vld [vmem:[%s9412_s27 + $0xa8] sm:$0xff] }
 0x14e   : > { %12333 = vst [vmem:[#allocation8_spill] sm:$0xff] %v10315_v57  ;;  %7191 = vmatmul.mubr.msk.f32.vlgmr.msra.gmra.mrb[98].mxu1 %vm388_vm4, %v10315_v57 }
 0x14f   : > { %v988_v33 = vpop.f32.mrb[30].mxu0  ;;  %8498 = vmatpush3.bf16.msra.mxu1 %v10102_v2  ;;  %7193 = vmatprep.mubr.msk.f32.mxu1 %vm9131_vm0, %v12307_v11 }
 0x150   : > { %v10310_v52 = vmax.f32 %v12332_v47, %v988_v33  ;;  %v10312_v53 = vpop.f32.mrb[30].mxu1  ;;  %v6652_v16 = vpop.f32.mrb[31].mxu0  ;;  %8499 = vmatprep.subr.bf16.mxu1 %v12310_v3 }
 0x151   : > { %v6705_v39 = vpop.f32.mrb[31].mxu1 }
 0x152   : > { %v10333_v39 = vld [vmem:[%s9412_s27 + $0xb0] sm:$0xff] }
 0x153   : > { %v993_v58 = vpop.f32.mrb[32].mxu0  ;;  %7194 = vmatmul.mubr.msk.f32.gmra.mrb[100].mxu1 %vm388_vm4, %v10333_v39 }
 0x154   : > { %v10328_v33 = vmax.f32 %v12334_v1, %v993_v58  ;;  %v10330_v47 = vpop.f32.mrb[32].mxu1  ;;  %v6655_v16 = vpop.f32.mrb[33].mxu0  ;;  %8501 = vmatpush3.bf16.msra.mxu1 %v10118_v56  ;;  %7196 = vmatprep.mubr.msk.f32.mxu1 %vm9131_vm0, %v12307_v11 }
 0x155   : > { %v6708_v46 = vpop.f32.mrb[33].mxu1  ;;  %8502 = vmatprep.subr.bf16.mxu1 %v12310_v3  ;;  %v10351_v16 = vld [vmem:[%s9412_s27 + $0xb8] sm:$0xff] }
 0x157   : > { %v998_v37 = vpop.f32.mrb[34].mxu0  ;;  %7197 = vmatmul.mubr.msk.f32.gmra.mrb[102].mxu1 %vm388_vm4, %v10351_v16 }
 0x158   : > { %v10346_v58 = vmax.f32 %v12335_v55, %v998_v37  ;;  %v10348_v46 = vpop.f32.mrb[34].mxu1  ;;  %v6658_v1 = vpop.f32.mrb[35].mxu0  ;;  %8504 = vmatpush3.bf16.msra.mxu1 %v10134_v20  ;;  %7199 = vmatprep.mubr.msk.f32.mxu1 %vm9131_vm0, %v12307_v11 }
 0x159   : > { %v6711_v2 = vpop.f32.mrb[35].mxu1  ;;  %8505 = vmatprep.subr.bf16.mxu1 %v12310_v3  ;;  %v10369_v1 = vld [vmem:[%s9412_s27 + $0xc0] sm:$0xff] }
 0x15b   : > { %v1003_v6 = vpop.f32.mrb[36].mxu0  ;;  %7200 = vmatmul.mubr.msk.f32.gmra.mrb[104].mxu1 %vm388_vm4, %v10369_v1 }
 0x15c   : > { %v10364_v37 = vmax.f32 %v12336_v17, %v1003_v6  ;;  %v10366_v2 = vpop.f32.mrb[36].mxu1  ;;  %v6661_v55 = vpop.f32.mrb[37].mxu0  ;;  %8507 = vmatpush3.bf16.msra.mxu1 %v10150_v38  ;;  %7202 = vmatprep.mubr.msk.f32.mxu1 %vm9131_vm0, %v12307_v11  ;;  %v1379_v38 = vld [vmem:[%s12299_s3] sm:$0xff] }
 0x15d   : > { %v6714_v56 = vpop.f32.mrb[37].mxu1  ;;  %8508 = vmatprep.subr.bf16.mxu1 %v12310_v3  ;;  %v10387_v55 = vld [vmem:[%s9412_s27 + $0xc8] sm:$0xff] }
 0x15f   : > { %v1008_v27 = vpop.f32.mrb[38].mxu0  ;;  %7203 = vmatmul.mubr.msk.f32.gmra.mrb[106].mxu1 %vm388_vm4, %v10387_v55 }
 0x160   : > { %v10382_v6 = vmax.f32 %v12337_v35, %v1008_v27  ;;  %v10384_v56 = vpop.f32.mrb[38].mxu1  ;;  %v6664_v17 = vpop.f32.mrb[39].mxu0  ;;  %8510 = vmatpush3.bf16.msra.mxu1 %v10166_v31  ;;  %7205 = vmatprep.mubr.msk.f32.mxu1 %vm9131_vm0, %v12307_v11 }
 0x161   : > { %v6717_v20 = vpop.f32.mrb[39].mxu1  ;;  %8511 = vmatprep.subr.bf16.mxu1 %v12310_v3  ;;  %v10405_v17 = vld [vmem:[%s9412_s27 + $0xd0] sm:$0xff]  ;;  %s5079_s27 = scalar_lea.sflag [#allocation4], %s350_s21 }
 0x163   : > { %v1013_v51 = vpop.f32.mrb[40].mxu0  ;;  %7206 = vmatmul.mubr.msk.f32.gmra.mrb[108].mxu1 %vm388_vm4, %v10405_v17 }
 0x164   : > { %v10400_v27 = vmax.f32 %v12338_v61, %v1013_v51  ;;  %v10402_v20 = vpop.f32.mrb[40].mxu1  ;;  %v6667_v35 = vpop.f32.mrb[41].mxu0  ;;  %8513 = vmatpush3.bf16.msra.mxu1 %v10182_v26  ;;  %7208 = vmatprep.mubr.msk.f32.mxu1 %vm9131_vm0, %v12307_v11 }
 0x165   : > { %v6720_v5 = vpop.f32.mrb[41].mxu1  ;;  %8514 = vmatprep.subr.bf16.mxu1 %v12310_v3 }
 0x167   : > { %7209 = vmatmul.mubr.msk.f32.gmra.mrb[110].mxu1 %vm388_vm4, %v10416_v50 }
 0x168   : > { %8516 = vmatpush3.bf16.msra.mxu1 %v10194_v54  ;;  %7296 = vmatprep.mubr.msk.f32.mxu1 %vm9131_vm0, %v12307_v11  ;;  %v1380_v54 = vld [vmem:[%s12299_s3 + $0x8] sm:$0xff] }
 0x169   : > { %8517 = vmatprep.subr.bf16.mxu1 %v12310_v3  ;;  %v8312_v11 = vpack.c.bf16 %v1380_v54, %v1379_v38  ;;  %v12342_v38 = vmax.f32 %v10227_v48, %v10230_v28  ;;  %v1384_v48 = vld [vmem:[%s12299_s3 + $0x28] sm:$0x3]  ;;  %v12344_v28 = vmax.f32 %v10239_v8, %v10242_v34  ;;  %v12345_v34 = vmax.f32 %v10251_v13, %v10254_v60 }
 0x16b   : > { %v1197_v5 = vpop.f32.mrb[42].mxu0 }
 0x16c   : > { %v1231_v26 = vmax.f32 %v12339_v14, %v1197_v5  ;;  %v6755_v51 = vpop.f32.mrb[43].mxu0  ;;  %v1304_v61 = vpop.f32.mrb[42].mxu1  ;;  %8520 = vmatpush3.bf16.msk.msra.mxu1 %vm9403_vm3, %v10208_v10  ;;  %v12340_v14 = vmax.f32 %v10215_v45, %v10218_v43  ;;  %v12341_v43 = vmov 0.0  }
 0x16d   : > { %v6808_v35 = vpop.f32.mrb[43].mxu1  ;;  %8541 = vmatprep.subr.bf16.mxu1 %v12310_v3  ;;  %v1381_v3 = vld [vmem:[%s12299_s3 + $0x10] sm:$0xff]  ;;  %360 = vst.msk [vmem:[#allocation2 + $0x40] sm:$0xff] %vm358_vm8, %v12341_v43  ;;  %362 = vst.msk [vmem:[#allocation2 + $0x48] sm:$0xff] %vm358_vm8, %v12341_v43 }
 0x16e   : > { %v1338_v31 = vmax.f32 %v1231_v26, %v1304_v61 }
 0x16f   : > { %v1202_v7 = vpop.f32.mrb[44].mxu0  ;;  %7297 = vmatmul.mubr.msk.f32.vlgmr.msra.gmra.mrb[112].mxu1 %vm388_vm4, %v10315_v57  ;;  %v12343_v57 = vmov 0.0|0.0  }
 0x170   : > { %v1365_v5 = vadd.f32 %v10439_v59, %v1338_v31  ;;  %v1232_v26 = vmax.f32 %v12340_v14, %v1202_v7  ;;  %v6758_v51 = vpop.f32.mrb[45].mxu0  ;;  %v1309_v61 = vpop.f32.mrb[44].mxu1  ;;  %v1382_v31 = vld [vmem:[%s12299_s3 + $0x18] sm:$0xff]  ;;  %7299 = vmatprep.mubr.msk.f32.mxu1 %vm9131_vm0, %v12341_v43 }
 0x171   : > { %v6811_v35 = vpop.f32.mrb[45].mxu1  ;;  %v8315_v51 = vpack.c.bf16 %v1382_v31, %v1381_v3 }
 0x172   : > { %v1372_v10 = vmax.f32 %v1365_v5, 0.0  ;;  %v1339_v62 = vmax.f32 %v1232_v26, %v1309_v61 }
 0x173   : > { %v1207_v45 = vpop.f32.mrb[46].mxu0  ;;  %7300 = vmatmul.mubr.msk.f32.gmra.mrb[114].mxu1 %vm388_vm4, %v10333_v39 }
 0x174   : > { %v1366_v7 = vadd.f32 %v10439_v59, %v1339_v62  ;;  %v1233_v54 = vmax.f32 %v12342_v38, %v1207_v45  ;;  %v6761_v5 = vpop.f32.mrb[47].mxu0  ;;  %v1314_v14 = vpop.f32.mrb[46].mxu1  ;;  %6840 = vmatmul.mubr.msk.f32.vlgmr.msra.gmra.mrb[56].mxu0 %vm1392_vm7, %v1372_v10  ;;  %v1383_v62 = vld [vmem:[%s12299_s3 + $0x20] sm:$0xff]  ;;  %7302 = vmatprep.mubr.msk.f32.mxu1 %vm9131_vm0, %v12341_v43 }
 0x175   : > { %8313 = vmatpush3.bf16.msra.mxu0 %v8312_v11  ;;  %v6814_v26 = vpop.f32.mrb[47].mxu1  ;;  %6842 = vmatprep.mubr.msk.f32.mxu0 %vm9131_vm0, %v12341_v43  ;;  %v8318_v38 = vpack.c.bf16 %v1384_v48, %v1383_v62 }
 0x176   : > { %v1373_v61 = vmax.f32 %v1366_v7, 0.0  ;;  %v1340_v35 = vmax.f32 %v1233_v54, %v1314_v14  ;;  %8314 = vmatprep.subr.bf16.mxu0 %v12343_v57 }
 0x177   : > { %v1212_v11 = vpop.f32.mrb[48].mxu0  ;;  %7303 = vmatmul.mubr.msk.f32.gmra.mrb[116].mxu1 %vm388_vm4, %v10351_v16 }
 0x178   : > { %v1367_v3 = vadd.f32 %v10439_v59, %v1340_v35  ;;  %v1234_v10 = vmax.f32 %v12344_v28, %v1212_v11  ;;  %v6764_v31 = vpop.f32.mrb[49].mxu0  ;;  %v1319_v45 = vpop.f32.mrb[48].mxu1  ;;  %6843 = vmatmul.mubr.msk.f32.gmra.mrb[58].mxu0 %vm1392_vm7, %v1373_v61  ;;  %7305 = vmatprep.mubr.msk.f32.mxu1 %vm9131_vm0, %v12341_v43  ;;  %v12346_v11 = vmax.f32 %v10263_v19, %v10266_v0 }
 0x179   : > { %v6817_v7 = vpop.f32.mrb[49].mxu1  ;;  %6845 = vmatprep.mubr.msk.f32.mxu0 %vm9131_vm0, %v12341_v43  ;;  %8316 = vmatpush3.bf16.msra.mxu0 %v8315_v51  ;;  %v12347_v0 = vmax.f32 %v10275_v25, %v10278_v29  ;;  %v5447_v25 = vld [vmem:[%s12300_s4 + $0x70] sm:$0xff]  ;;  %v5448_v29 = vld [vmem:[%s12300_s4 + $0x78] sm:$0xff] }
 0x17a   : > { %v1374_v54 = vmax.f32 %v1367_v3, 0.0  ;;  %v1341_v5 = vmax.f32 %v1234_v10, %v1319_v45  ;;  %8317 = vmatprep.subr.bf16.mxu0 %v12343_v57 }
 0x17b   : > { %v1217_v14 = vpop.f32.mrb[50].mxu0  ;;  %7306 = vmatmul.mubr.msk.f32.gmra.mrb[118].mxu1 %vm388_vm4, %v10369_v1 }
 0x17c   : > { %v1368_v8 = vadd.f32 %v10439_v59, %v1341_v5  ;;  %v1235_v26 = vmax.f32 %v12345_v34, %v1217_v14  ;;  %v6767_v61 = vpop.f32.mrb[51].mxu0  ;;  %v1324_v51 = vpop.f32.mrb[50].mxu1  ;;  %6846 = vmatmul.mubr.msk.f32.gmra.mrb[60].mxu0 %vm1392_vm7, %v1374_v54  ;;  %7308 = vmatprep.mubr.msk.f32.mxu1 %vm9131_vm0, %v12341_v43 }
 0x17d   : > { %v6820_v35 = vpop.f32.mrb[51].mxu1  ;;  %6848 = vmatprep.mubr.msk.f32.mxu0 %vm9131_vm0, %v12341_v43  ;;  %8320 = vmatpush3.bf16.msk.msra.mxu0 %vm10034_vm6, %v8318_v38 }
 0x17e   : > { %v1375_v62 = vmax.f32 %v1368_v8, 0.0  ;;  %v1342_v48 = vmax.f32 %v1235_v26, %v1324_v51  ;;  %8371 = vmatprep.subr.bf16.mxu0 %v12343_v57  ;;  %v5449_v51 = vld [vmem:[%s12300_s4 + $0x80] sm:$0xff]  ;;  %v10535_v35 = vpack.c.bf16 %v5448_v29, %v5447_v25 }
 0x17f   : > { %v1222_v13 = vpop.f32.mrb[52].mxu0  ;;  %7309 = vmatmul.mubr.msk.f32.gmra.mrb[120].mxu1 %vm388_vm4, %v10387_v55 }
 0x180   : > { %v1369_v60 = vadd.f32 %v10439_v59, %v1342_v48  ;;  %v1236_v3 = vmax.f32 %v12346_v11, %v1222_v13  ;;  %v6770_v28 = vpop.f32.mrb[53].mxu0  ;;  %v1329_v10 = vpop.f32.mrb[52].mxu1  ;;  %6849 = vmatmul.mubr.msk.f32.gmra.mrb[62].mxu0 %vm1392_vm7, %v1375_v62  ;;  %7311 = vmatprep.mubr.msk.f32.mxu1 %vm9131_vm0, %v12341_v43  ;;  %12348 = vst [vmem:[#allocation9_spill] sm:$0xff] %v10535_v35  ;;  %v5450_v62 = vld [vmem:[%s12300_s4 + $0x88] sm:$0xff]  ;;  %v5338_v11 = vld [vmem:[%s12297_s1 + $0x100] sm:$0xff] }
 0x181   : > { %v6823_v31 = vpop.f32.mrb[53].mxu1  ;;  %6851 = vmatprep.mubr.msk.f32.mxu0 %vm9131_vm0, %v12341_v43  ;;  %v12349_v48 = vmax.f32 %v10297_v22, %v10299_v23  ;;  %8543 = vmatpush3.bf16.msra.mxu1 %v10535_v35  ;;  %v10557_v28 = vpack.c.bf16 %v5450_v62, %v5449_v51  ;;  %v5451_v22 = vld [vmem:[%s12300_s4 + $0x90] sm:$0xff]  ;;  %v5452_v23 = vld [vmem:[%s12300_s4 + $0x98] sm:$0xff]  ;;  %v12355_v51 = vmax.f32 %v10346_v58, %v10348_v46 }
 0x182   : > { %v1376_v45 = vmax.f32 %v1369_v60, 0.0  ;;  %v1343_v7 = vmax.f32 %v1236_v3, %v1329_v10  ;;  %v5339_v3 = vld [vmem:[%s12297_s1 + $0x108] sm:$0xff]  ;;  %8544 = vmatprep.subr.bf16.mxu1 %v12343_v57  ;;  %v2934_v35 = vld [vmem:[%s12300_s4 + $0x38] sm:$0xff] }
 0x183   : > { %v1227_v38 = vpop.f32.mrb[54].mxu0  ;;  %7312 = vmatmul.mubr.msk.f32.gmra.mrb[122].mxu1 %vm388_vm4, %v10405_v17  ;;  %v1351_v13 = vadd.f32 %v10439_v59, %v12349_v48  ;;  %12350 = vst [vmem:[#allocation10_spill] sm:$0xff] %v10557_v28  ;;  %v10571_v10 = vpack.c.bf16 %v5339_v3, %v5338_v11  ;;  %v1354_v62 = vadd.f32 %v10439_v59, %v12355_v51  ;;  %v5344_v48 = vld [vmem:[%s12297_s1 + $0x130] sm:$0xff] }
 0x184   : > { %v1370_v19 = vadd.f32 %v10439_v59, %v1343_v7  ;;  %v1237_v54 = vmax.f32 %v12347_v0, %v1227_v38  ;;  %v6773_v5 = vpop.f32.mrb[55].mxu0  ;;  %v1334_v14 = vpop.f32.mrb[54].mxu1  ;;  %6852 = vmatmul.mubr.msk.f32.gmra.mrb[64].mxu0 %vm1392_vm7, %v1376_v45  ;;  %7314 = vmatprep.mubr.msk.f32.mxu1 %vm9131_vm0, %v12341_v43  ;;  %v12351_v45 = vmax.f32 %v10310_v52, %v10312_v53  ;;  %v5340_v38 = vld [vmem:[%s12297_s1 + $0x110] sm:$0xff]  ;;  %v5453_v52 = vld [vmem:[%s12300_s4 + $0xa0] sm:$0xff]  ;;  %v5454_v53 = vld [vmem:[%s12300_s4 + $0xa8] sm:$0xff] }
 0x185   : > { %v6826_v8 = vpop.f32.mrb[55].mxu1  ;;  %6854 = vmatprep.mubr.msk.f32.mxu0 %vm9131_vm0, %v12341_v43  ;;  %v1358_v31 = vmax.f32 %v1351_v13, 0.0  ;;  %8546 = vmatpush3.bf16.msra.mxu1 %v10557_v28  ;;  %v10584_v0 = vpack.c.bf16 %v5452_v23, %v5451_v22  ;;  %v5345_v13 = vld [vmem:[%s12297_s1 + $0x138] sm:$0xff]  ;;  %v1361_v46 = vmax.f32 %v1354_v62, 0.0  ;;  %v12357_v11 = vmax.f32 %v10364_v37, %v10366_v2  ;;  %v5346_v22 = vld [vmem:[%s12297_s1 + $0x140] sm:$0xff]  ;;  %v5347_v23 = vld [vmem:[%s12297_s1 + $0x148] sm:$0xff] }
 0x186   : > { %v1377_v34 = vmax.f32 %v1370_v19, 0.0  ;;  %v1344_v26 = vmax.f32 %v1237_v54, %v1334_v14  ;;  %v1352_v7 = vadd.f32 %v10439_v59, %v12351_v45  ;;  %v5341_v19 = vld [vmem:[%s12297_s1 + $0x118] sm:$0xff]  ;;  %8547 = vmatprep.subr.bf16.mxu1 %v12343_v57  ;;  %v12353_v14 = vmax.f32 %v10328_v33, %v10330_v47  ;;  %v5455_v33 = vld [vmem:[%s12300_s4 + $0xb0] sm:$0xff] }
 0x187   : > { %7315 = vmatmul.mubr.msk.f32.gmra.mrb[124].mxu1 %vm388_vm4, %v10416_v50  ;;  %12352 = vst [vmem:[#allocation11_spill] sm:$0xff] %v10584_v0  ;;  %v10597_v54 = vpack.c.bf16 %v5341_v19, %v5340_v38  ;;  %v5456_v47 = vld [vmem:[%s12300_s4 + $0xb8] sm:$0xff]  ;;  %v10645_v58 = vpack.c.bf16 %v5345_v13, %v5344_v48  ;;  %v1355_v3 = vadd.f32 %v10439_v59, %v12357_v11  ;;  %v2933_v28 = vld [vmem:[%s12300_s4 + $0x30] sm:$0xff] }
 0x188   : > { %v1371_v61 = vadd.f32 %v10439_v59, %v1344_v26  ;;  %6855 = vmatmul.mubr.msk.f32.gmra.mrb[66].mxu0 %vm1392_vm7, %v1377_v34  ;;  %7411 = vmatprep.mubr.msk.f32.mxu1 %vm9131_vm0, %v12341_v43  ;;  %v1359_v5 = vmax.f32 %v1352_v7, 0.0  ;;  %v1353_v8 = vadd.f32 %v10439_v59, %v12353_v14  ;;  %v5342_v34 = vld [vmem:[%s12297_s1 + $0x120] sm:$0xff]  ;;  %v5343_v26 = vld [vmem:[%s12297_s1 + $0x128] sm:$0xff]  ;;  %v10664_v37 = vpack.c.bf16 %v5347_v23, %v5346_v22  ;;  %v5348_v7 = vld [vmem:[%s12297_s1 + $0x150] sm:$0xff] }
 0x189   : > { %6857 = vmatprep.mubr.msk.f32.mxu0 %vm9131_vm0, %v12341_v43  ;;  %8549 = vmatpush3.bf16.msra.mxu1 %v10584_v0  ;;  %v10624_v25 = vpack.c.bf16 %v5343_v26, %v5342_v34  ;;  %v1362_v2 = vmax.f32 %v1355_v3, 0.0  ;;  %v5349_v38 = vld [vmem:[%s12297_s1 + $0x158] sm:$0xff]  ;;  %v12359_v19 = vmax.f32 %v10400_v27, %v10402_v20  ;;  %v5352_v14 = vld [vmem:[%s12297_s1 + $0x170] sm:$0xff]  ;;  %v12361_v3 = vld [vmem:[#allocation8_spill] sm:$0xff] }
 0x18a   : > { %v1378_v60 = vmax.f32 %v1371_v61, 0.0  ;;  %v10611_v61 = vpack.c.bf16 %v5454_v53, %v5453_v52  ;;  %8550 = vmatprep.subr.bf16.mxu1 %v12343_v57  ;;  %v1360_v29 = vmax.f32 %v1353_v8, 0.0  ;;  %v5350_v53 = vld [vmem:[%s12297_s1 + $0x160] sm:$0xff]  ;;  %v5353_v8 = vld [vmem:[%s12297_s1 + $0x178] sm:$0x3f] }
 0x18b   : > { %v1357_v52 = vadd.f32 %v10439_v59, %v12359_v19 }
 0x18c   : > { %6858 = vmatmul.mubr.msk.f32.gmra.mrb[68].mxu0 %vm1392_vm7, %v1378_v60  ;;  %12354 = vst [vmem:[#allocation12_spill] sm:$0xff] %v10611_v61  ;;  %v10638_v60 = vpack.c.bf16 %v5456_v47, %v5455_v33  ;;  %v10707_v34 = vpop.f32.mrb[56].mxu1  ;;  %v10711_v33 = vpack.c.bf16 %v5353_v8, %v5352_v14 }
 0x18d   : > { %6872 = vmatprep.mubr.msk.f32.mxu0 %vm9131_vm0, %v12341_v43  ;;  %8552 = vmatpush3.bf16.msra.mxu1 %v10611_v61  ;;  %v1364_v20 = vmax.f32 %v1357_v52, 0.0  ;;  %v6927_v26 = vpop.f32.mrb[57].mxu1  ;;  %v5458_v52 = vld [vmem:[%s12300_s4 + $0xc8] sm:$0xff] }
 0x18e   : > { %12356 = vst [vmem:[#allocation13_spill] sm:$0xff] %v10638_v60  ;;  %8553 = vmatprep.subr.bf16.mxu1 %v12343_v57 }
 0x190   : > { %6873 = vmatmul.mubr.msk.f32.vlgmr.msra.gmra.mrb[56].mxu0 %vm1392_vm7, %v1358_v31  ;;  %v12358_v31 = vmax.f32 %v10382_v6, %v10384_v56  ;;  %v10681_v6 = vpack.c.bf16 %v5349_v38, %v5348_v7  ;;  %v10719_v47 = vpop.f32.mrb[58].mxu1 }
 0x191   : > { %8373 = vmatpush3.bf16.msra.mxu0 %v10571_v10  ;;  %6875 = vmatprep.mubr.msk.f32.mxu0 %vm9131_vm0, %v12341_v43 }
 0x192   : > { %8374 = vmatprep.subr.bf16.mxu0 %v12343_v57  ;;  %8555 = vmatpush3.bf16.msra.mxu1 %v10638_v60  ;;  %v1356_v45 = vadd.f32 %v10439_v59, %v12358_v31 }
 0x193   : > { %8556 = vmatprep.subr.bf16.mxu1 %v12343_v57 }
 0x194   : > { %6876 = vmatmul.mubr.msk.f32.gmra.mrb[58].mxu0 %vm1392_vm7, %v1359_v5  ;;  %v1363_v56 = vmax.f32 %v1356_v45, 0.0  ;;  %v5351_v5 = vld [vmem:[%s12297_s1 + $0x168] sm:$0xff] }
 0x195   : > { %8376 = vmatpush3.bf16.msra.mxu0 %v10597_v54  ;;  %6878 = vmatprep.mubr.msk.f32.mxu0 %vm9131_vm0, %v12341_v43  ;;  %v10698_v27 = vpack.c.bf16 %v5351_v5, %v5350_v53  ;;  %v5460_v5 = vld [vmem:[%s12300_s4 + $0xd8] sm:$0xf] }
 0x196   : > { %8377 = vmatprep.subr.bf16.mxu0 %v12343_v57 }
 0x198   : > { %6879 = vmatmul.mubr.msk.f32.gmra.mrb[60].mxu0 %vm1392_vm7, %v1360_v29  ;;  %v6930_v29 = vpop.f32.mrb[59].mxu1 }
 0x199   : > { %8379 = vmatpush3.bf16.msra.mxu0 %v10624_v25  ;;  %6881 = vmatprep.mubr.msk.f32.mxu0 %vm9131_vm0, %v12341_v43  ;;  %v10727_v51 = vpop.f32.mrb[60].mxu1 }
 0x19a   : > { %8380 = vmatprep.subr.bf16.mxu0 %v12343_v57  ;;  %v6933_v62 = vpop.f32.mrb[61].mxu1 }
 0x19b   : > { %v10735_v48 = vpop.f32.mrb[62].mxu1 }
 0x19c   : > { %6882 = vmatmul.mubr.msk.f32.gmra.mrb[62].mxu0 %vm1392_vm7, %v1361_v46  ;;  %v12360_v46 = vld [vmem:[#allocation7_spill] sm:$0xff] }
 0x19d   : > { %8382 = vmatpush3.bf16.msra.mxu0 %v10645_v58  ;;  %6884 = vmatprep.mubr.msk.f32.mxu0 %vm9131_vm0, %v12341_v43 }
 0x19e   : > { %8383 = vmatprep.subr.bf16.mxu0 %v12343_v57 }
 0x1a0   : > { %6885 = vmatmul.mubr.msk.f32.gmra.mrb[64].mxu0 %vm1392_vm7, %v1362_v2 }
 0x1a1   : > { %8385 = vmatpush3.bf16.msra.mxu0 %v10664_v37  ;;  %6887 = vmatprep.mubr.msk.f32.mxu0 %vm9131_vm0, %v12341_v43 }
 0x1a2   : > { %8386 = vmatprep.subr.bf16.mxu0 %v12343_v57 }
 0x1a4   : > { %6888 = vmatmul.mubr.msk.f32.gmra.mrb[66].mxu0 %vm1392_vm7, %v1363_v56 }
 0x1a5   : > { %8388 = vmatpush3.bf16.msra.mxu0 %v10681_v6  ;;  %6890 = vmatprep.mubr.msk.f32.mxu0 %vm9131_vm0, %v12341_v43 }
 0x1a6   : > { %8389 = vmatprep.subr.bf16.mxu0 %v12343_v57 }
 0x1a8   : > { %6891 = vmatmul.mubr.msk.f32.gmra.mrb[68].mxu0 %vm1392_vm7, %v1364_v20 }
 0x1a9   : > { %8391 = vmatpush3.bf16.msra.mxu0 %v10698_v27  ;;  %7031 = vmatprep.mubr.msk.f32.mxu0 %vm9131_vm0, %v12341_v43 }
 0x1aa   : > { %8392 = vmatprep.subr.bf16.mxu0 %v12343_v57 }
 0x1ad   : > { %8395 = vmatpush3.bf16.msk.msra.mxu0 %vm9403_vm3, %v10711_v33 }
 0x1ae   : > { %8421 = vmatprep.subr.bf16.mxu0 %v12343_v57 }
 0x1b0   : > { %7032 = vmatmul.mubr.msk.f32.vlgmr.msra.gmra.mrb[70].mxu0 %vm388_vm4, %v9932_v63 }
 0x1b1   : > { %8423 = vmatpush3.bf16.msra.mxu0 %v9248_v4  ;;  %7034 = vmatprep.mubr.msk.f32.mxu0 %vm9131_vm0, %v12341_v43  ;;  %v6936_v4 = vpop.f32.mrb[63].mxu1 }
 0x1b2   : > { %8424 = vmatprep.subr.bf16.mxu0 %v12343_v57  ;;  %v10743_v63 = vpop.f32.mrb[64].mxu1 }
 0x1b4   : > { %7035 = vmatmul.mubr.msk.f32.gmra.mrb[72].mxu0 %vm388_vm4, %v9942_v44 }
 0x1b5   : > { %8426 = vmatpush3.bf16.msra.mxu0 %v9273_v12  ;;  %7037 = vmatprep.mubr.msk.f32.mxu0 %vm9131_vm0, %v12341_v43  ;;  %v6939_v12 = vpop.f32.mrb[65].mxu1 }
 0x1b6   : > { %8427 = vmatprep.subr.bf16.mxu0 %v12343_v57  ;;  %v10751_v44 = vpop.f32.mrb[66].mxu1 }
 0x1b8   : > { %7038 = vmatmul.mubr.msk.f32.gmra.mrb[74].mxu0 %vm388_vm4, %v9957_v9 }
 0x1b9   : > { %8429 = vmatpush3.bf16.msra.mxu0 %v9293_v18  ;;  %7040 = vmatprep.mubr.msk.f32.mxu0 %vm9131_vm0, %v12341_v43  ;;  %v6942_v18 = vpop.f32.mrb[67].mxu1 }
 0x1ba   : > { %8430 = vmatprep.subr.bf16.mxu0 %v12343_v57  ;;  %v10759_v9 = vpop.f32.mrb[68].mxu1 }
 0x1bc   : > { %7041 = vmatmul.mubr.msk.f32.gmra.mrb[76].mxu0 %vm388_vm4, %v9973_v15 }
 0x1bd   : > { %8432 = vmatpush3.bf16.msra.mxu0 %v9313_v24  ;;  %7043 = vmatprep.mubr.msk.f32.mxu0 %vm9131_vm0, %v12341_v43  ;;  %v6945_v24 = vpop.f32.mrb[69].mxu1 }
 0x1be   : > { %8433 = vmatprep.subr.bf16.mxu0 %v12343_v57  ;;  %v10768_v15 = vpop.f32.mrb[70].mxu1 }
 0x1c0   : > { %7044 = vmatmul.mubr.msk.f32.gmra.mrb[78].mxu0 %vm388_vm4, %v9990_v21  ;;  %v6980_v21 = vpop.f32.mrb[71].mxu1 }
 0x1c1   : > { %8435 = vmatpush3.bf16.msra.mxu0 %v9333_v30  ;;  %7046 = vmatprep.mubr.msk.f32.mxu0 %vm9131_vm0, %v12341_v43  ;;  %v2927_v30 = vld [vmem:[%s12300_s4] sm:$0xff] }
 0x1c2   : > { %8436 = vmatprep.subr.bf16.mxu0 %v12343_v57 }
 0x1c4   : > { %7047 = vmatmul.mubr.msk.f32.gmra.mrb[80].mxu0 %vm388_vm4, %v10013_v32 }
 0x1c5   : > { %8438 = vmatpush3.bf16.msra.mxu0 %v9354_v36  ;;  %7049 = vmatprep.mubr.msk.f32.mxu0 %vm9131_vm0, %v12341_v43  ;;  %v10778_v36 = vpop.f32.mrb[72].mxu1 }
 0x1c6   : > { %8439 = vmatprep.subr.bf16.mxu0 %v12343_v57  ;;  %v6983_v13 = vpop.f32.mrb[73].mxu1 }
 0x1c8   : > { %7050 = vmatmul.mubr.msk.f32.gmra.mrb[82].mxu0 %vm388_vm4, %v10039_v41  ;;  %v10786_v41 = vpop.f32.mrb[74].mxu1 }
 0x1c9   : > { %8441 = vmatpush3.bf16.msra.mxu0 %v9375_v42  ;;  %7137 = vmatprep.mubr.msk.f32.mxu0 %vm9131_vm0, %v12341_v43  ;;  %v6986_v11 = vpop.f32.mrb[75].mxu1 }
 0x1ca   : > { %8442 = vmatprep.subr.bf16.mxu0 %v12343_v57  ;;  %v10796_v22 = vpop.f32.mrb[76].mxu1  ;;  %v5425_v11 = vld [vmem:[%s12299_s3 + $0x30] sm:$0xff] }
 0x1cb   : > { %v6989_v2 = vpop.f32.mrb[77].mxu1 }
 0x1cd   : > { %8445 = vmatpush3.bf16.msk.msra.mxu0 %vm9403_vm3, %v12360_v46 }
 0x1ce   : > { %8471 = vmatprep.subr.bf16.mxu0 %v12343_v57 }
 0x1d0   : > { %7138 = vmatmul.mubr.msk.f32.vlgmr.msra.gmra.mrb[84].mxu0 %vm388_vm4, %v12361_v3 }
 0x1d1   : > { %8473 = vmatpush3.bf16.msra.mxu0 %v10571_v10  ;;  %7140 = vmatprep.mubr.msk.f32.mxu0 %vm9131_vm0, %v12341_v43  ;;  %v10806_v10 = vpop.f32.mrb[78].mxu1 }
 0x1d2   : > { %8474 = vmatprep.subr.bf16.mxu0 %v12343_v57  ;;  %v6992_v45 = vpop.f32.mrb[79].mxu1 }
 0x1d4   : > { %7141 = vmatmul.mubr.msk.f32.gmra.mrb[86].mxu0 %vm388_vm4, %v10333_v39 }
 0x1d5   : > { %8476 = vmatpush3.bf16.msra.mxu0 %v10597_v54  ;;  %7143 = vmatprep.mubr.msk.f32.mxu0 %vm9131_vm0, %v12341_v43  ;;  %v10816_v54 = vpop.f32.mrb[80].mxu1 }
 0x1d6   : > { %8477 = vmatprep.subr.bf16.mxu0 %v12343_v57  ;;  %v6995_v38 = vpop.f32.mrb[81].mxu1 }
 0x1d8   : > { %7144 = vmatmul.mubr.msk.f32.gmra.mrb[88].mxu0 %vm388_vm4, %v10351_v16 }
 0x1d9   : > { %8479 = vmatpush3.bf16.msra.mxu0 %v10624_v25  ;;  %7146 = vmatprep.mubr.msk.f32.mxu0 %vm9131_vm0, %v12341_v43  ;;  %v10826_v25 = vpop.f32.mrb[82].mxu1 }
 0x1da   : > { %8480 = vmatprep.subr.bf16.mxu0 %v12343_v57  ;;  %v6998_v19 = vpop.f32.mrb[83].mxu1 }
 0x1dc   : > { %7147 = vmatmul.mubr.msk.f32.gmra.mrb[90].mxu0 %vm388_vm4, %v10369_v1 }
 0x1dd   : > { %8482 = vmatpush3.bf16.msra.mxu0 %v10645_v58  ;;  %7149 = vmatprep.mubr.msk.f32.mxu0 %vm9131_vm0, %v12341_v43  ;;  %v5457_v58 = vld [vmem:[%s12300_s4 + $0xc0] sm:$0xff] }
 0x1de   : > { %8483 = vmatprep.subr.bf16.mxu0 %v12343_v57  ;;  %v10844_v53 = vpack.c.bf16 %v5458_v52, %v5457_v58 }
 0x1e0   : > { %7150 = vmatmul.mubr.msk.f32.gmra.mrb[92].mxu0 %vm388_vm4, %v10387_v55  ;;  %12362 = vst [vmem:[#allocation7_spill] sm:$0xff] %v10844_v53  ;;  %8558 = vmatpush3.bf16.msra.mxu1 %v10844_v53 }
 0x1e1   : > { %8485 = vmatpush3.bf16.msra.mxu0 %v10664_v37  ;;  %7152 = vmatprep.mubr.msk.f32.mxu0 %vm9131_vm0, %v12341_v43  ;;  %v5459_v37 = vld [vmem:[%s12300_s4 + $0xd0] sm:$0xff] }
 0x1e2   : > { %8486 = vmatprep.subr.bf16.mxu0 %v12343_v57  ;;  %8559 = vmatprep.subr.bf16.mxu1 %v12343_v57 }
 0x1e4   : > { %7153 = vmatmul.mubr.msk.f32.gmra.mrb[94].mxu0 %vm388_vm4, %v10405_v17 }
 0x1e5   : > { %8488 = vmatpush3.bf16.msra.mxu0 %v10681_v6  ;;  %7155 = vmatprep.mubr.msk.f32.mxu0 %vm9131_vm0, %v12341_v43  ;;  %v10860_v6 = vpack.c.bf16 %v5460_v5, %v5459_v37  ;;  %v5427_v5 = vld [vmem:[%s12299_s3 + $0x40] sm:$0xff] }
 0x1e6   : > { %8489 = vmatprep.subr.bf16.mxu0 %v12343_v57 }
 0x1e7   : > { %12363 = vst [vmem:[#allocation8_spill] sm:$0xff] %v10860_v6  ;;  %8562 = vmatpush3.bf16.msk.msra.mxu1 %vm10866_vm10, %v10860_v6 }
 0x1e8   : > { %7156 = vmatmul.mubr.msk.f32.gmra.mrb[96].mxu0 %vm388_vm4, %v10416_v50  ;;  %8563 = vmatprep.subr.bf16.mxu1 %v12343_v57 }
 0x1e9   : > { %8491 = vmatpush3.bf16.msra.mxu0 %v10698_v27  ;;  %7243 = vmatprep.mubr.msk.f32.mxu0 %vm9131_vm0, %v12341_v43 }
 0x1ea   : > { %8492 = vmatprep.subr.bf16.mxu0 %v12343_v57 }
 0x1ed   : > { %8495 = vmatpush3.bf16.msk.msra.mxu0 %vm9403_vm3, %v10711_v33 }
 0x1ee   : > { %8521 = vmatprep.subr.bf16.mxu0 %v12343_v57 }
 0x1f0   : > { %7244 = vmatmul.mubr.msk.f32.vlgmr.msra.gmra.mrb[98].mxu0 %vm388_vm4, %v12361_v3  ;;  %v5426_v3 = vld [vmem:[%s12299_s3 + $0x38] sm:$0xff] }
 0x1f1   : > { %7246 = vmatprep.mubr.msk.f32.mxu0 %vm9131_vm0, %v12341_v43  ;;  %v8522_v45 = vpack.c.bf16 %v5426_v3, %v5425_v11 }
 0x1f3   : > { %8523 = vmatpush3.bf16.msra.mxu0 %v8522_v45 }
 0x1f4   : > { %7247 = vmatmul.mubr.msk.f32.gmra.mrb[100].mxu0 %vm388_vm4, %v10333_v39  ;;  %8524 = vmatprep.subr.bf16.mxu0 %v12343_v57 }
 0x1f5   : > { %7249 = vmatprep.mubr.msk.f32.mxu0 %vm9131_vm0, %v12341_v43 }
 0x1f8   : > { %7250 = vmatmul.mubr.msk.f32.gmra.mrb[102].mxu0 %vm388_vm4, %v10351_v16 }
 0x1f9   : > { %7252 = vmatprep.mubr.msk.f32.mxu0 %vm9131_vm0, %v12341_v43 }
 0x1fc   : > { %7253 = vmatmul.mubr.msk.f32.gmra.mrb[104].mxu0 %vm388_vm4, %v10369_v1 }
 0x1fd   : > { %7255 = vmatprep.mubr.msk.f32.mxu0 %vm9131_vm0, %v12341_v43  ;;  %v10901_v49 = vpop.f32.mrb[84].mxu1 }
 0x1fe   : > { %v7086_v39 = vpop.f32.mrb[85].mxu1 }
 0x1ff   : > { %v5428_v39 = vld [vmem:[%s12299_s3 + $0x48] sm:$0xff] }
 0x200   : > { %7256 = vmatmul.mubr.msk.f32.gmra.mrb[106].mxu0 %vm388_vm4, %v10387_v55 }
 0x201   : > { %7258 = vmatprep.mubr.msk.f32.mxu0 %vm9131_vm0, %v12341_v43  ;;  %v10907_v16 = vpop.f32.mrb[86].mxu1 }
 0x202   : > { %v7089_v1 = vpop.f32.mrb[87].mxu1 }
 0x204   : > { %7259 = vmatmul.mubr.msk.f32.gmra.mrb[108].mxu0 %vm388_vm4, %v10405_v17 }
 0x205   : > { %7261 = vmatprep.mubr.msk.f32.mxu0 %vm9131_vm0, %v12341_v43  ;;  %v10911_v55 = vpop.f32.mrb[88].mxu1 }
 0x206   : > { %v7092_v27 = vpop.f32.mrb[89].mxu1 }
 0x207   : > { %v8525_v27 = vpack.c.bf16 %v5428_v39, %v5427_v5 }
 0x208   : > { %7262 = vmatmul.mubr.msk.f32.gmra.mrb[110].mxu0 %vm388_vm4, %v10416_v50 }
 0x209   : > { %7329 = vmatprep.mubr.msk.f32.mxu0 %vm9131_vm0, %v12341_v43  ;;  %v10913_v14 = vpop.f32.mrb[90].mxu1  ;;  %8526 = vmatpush3.bf16.msra.mxu0 %v8525_v27 }
 0x20a   : > { %v7095_v17 = vpop.f32.mrb[91].mxu1  ;;  %8527 = vmatprep.subr.bf16.mxu0 %v12343_v57 }
 0x20b   : > { %v5429_v17 = vld [vmem:[%s12299_s3 + $0x50] sm:$0xff] }
 0x20d   : > { %v10915_v8 = vpop.f32.mrb[92].mxu1 }
 0x20e   : > { %v7098_v26 = vpop.f32.mrb[93].mxu1 }
 0x20f   : > { %v5430_v26 = vld [vmem:[%s12299_s3 + $0x58] sm:$0x3] }
 0x211   : > { %v10917_v33 = vpop.f32.mrb[94].mxu1 }
 0x212   : > { %v7101_v29 = vpop.f32.mrb[95].mxu1 }
 0x215   : > { %v10919_v62 = vpop.f32.mrb[96].mxu1 }
 0x216   : > { %v7104_v50 = vpop.f32.mrb[97].mxu1 }
 0x217   : > { %v8528_v50 = vpack.c.bf16 %v5430_v26, %v5429_v17 }
 0x219   : > { %8530 = vmatpush3.bf16.msk.msra.mxu0 %vm10034_vm6, %v8528_v50 }
 0x21a   : > { %8531 = vmatprep.subr.bf16.mxu0 %v12343_v57 }
 0x221   : > { %v10921_v4 = vpop.f32.mrb[98].mxu1 }
 0x222   : > { %v7192_v12 = vpop.f32.mrb[99].mxu1 }
 0x226   : > { %v10923_v18 = vpop.f32.mrb[100].mxu1 }
 0x227   : > { %v7195_v24 = vpop.f32.mrb[101].mxu1 }
 0x22a   : > { %v10925_v21 = vpop.f32.mrb[102].mxu1 }
 0x22b   : > { %v7198_v13 = vpop.f32.mrb[103].mxu1 }
 0x22e   : > { %v10927_v46 = vpop.f32.mrb[104].mxu1 }
 0x22f   : > { %v7201_v2 = vpop.f32.mrb[105].mxu1 }
 0x232   : > { %v10935_v38 = vpop.f32.mrb[106].mxu1 }
 0x233   : > { %v7204_v19 = vpop.f32.mrb[107].mxu1 }
 0x236   : > { %v10938_v58 = vpop.f32.mrb[108].mxu1 }
 0x237   : > { %v7207_v52 = vpop.f32.mrb[109].mxu1 }
 0x23a   : > { %v10940_v37 = vpop.f32.mrb[110].mxu1 }
 0x23b   : > { %v7210_v1 = vpop.f32.mrb[111].mxu1 }
 0x242   : > { %v10955_v29 = vpop.f32.mrb[112].mxu1 }
 0x243   : > { %v7298_v12 = vpop.f32.mrb[113].mxu1 }
 0x246   : > { %v10960_v24 = vpop.f32.mrb[114].mxu1 }
 0x247   : > { %v7301_v13 = vpop.f32.mrb[115].mxu1 }
 0x24a   : > { %v10962_v11 = vpop.f32.mrb[116].mxu1 }
 0x24b   : > { %v7304_v3 = vpop.f32.mrb[117].mxu1 }
 0x24e   : > { %v10964_v2 = vpop.f32.mrb[118].mxu1 }
 0x24f   : > { %v7307_v45 = vpop.f32.mrb[119].mxu1 }
 0x252   : > { %v10966_v19 = vpop.f32.mrb[120].mxu1 }
 0x253   : > { %v7310_v52 = vpop.f32.mrb[121].mxu1 }
 0x256   : > { %v10968_v5 = vpop.f32.mrb[122].mxu1 }
 0x257   : > { %v7313_v39 = vpop.f32.mrb[123].mxu1 }
 0x25a   : > { %v10970_v1 = vpop.f32.mrb[124].mxu1 }
 0x25b   : > { %v7316_v27 = vpop.f32.mrb[125].mxu1 }
 0x263   : > { %v1608_v17 = vpop.f32.mrb[56].mxu0 }
 0x264   : > { %1642 = vst.msk [vmem:[#allocation2 + $0x8] sm:$0xff] %vm358_vm8, %v1608_v17  ;;  %v6874_v26 = vpop.f32.mrb[57].mxu0 }
 0x267   : > { %v1613_v50 = vpop.f32.mrb[58].mxu0 }
 0x268   : > { %1643 = vst.msk [vmem:[#allocation2 + $0x10] sm:$0xff] %vm358_vm8, %v1613_v50  ;;  %v6877_v12 = vpop.f32.mrb[59].mxu0 }
 0x26b   : > { %v1618_v13 = vpop.f32.mrb[60].mxu0  ;;  %v10974_v3 = vld [vmem:[#allocation2 + $0x8] sm:$0xff] }
 0x26c   : > { %1644 = vst.msk [vmem:[#allocation2 + $0x18] sm:$0xff] %vm358_vm8, %v1618_v13  ;;  %v6880_v45 = vpop.f32.mrb[61].mxu0  ;;  %7412 = vmatmul.mubr.msk.f32.vlgmr.msra.gmra.mrb[126].mxu1 %vm358_vm8, %v10974_v3 }
 0x26d   : > { %7414 = vmatprep.mubr.msk.f32.mxu1 %vm9131_vm0, %v12341_v43 }
 0x26f   : > { %v1623_v52 = vpop.f32.mrb[62].mxu0  ;;  %v10981_v39 = vld [vmem:[#allocation2 + $0x10] sm:$0xff] }
 0x270   : > { %1645 = vst.msk [vmem:[#allocation2 + $0x20] sm:$0xff] %vm358_vm8, %v1623_v52  ;;  %v6883_v27 = vpop.f32.mrb[63].mxu0  ;;  %7415 = vmatmul.mubr.msk.f32.gmra.mrb[128].mxu1 %vm358_vm8, %v10981_v39 }
 0x271   : > { %7417 = vmatprep.mubr.msk.f32.mxu1 %vm9131_vm0, %v12341_v43 }
 0x273   : > { %v1628_v17 = vpop.f32.mrb[64].mxu0  ;;  %v10988_v26 = vld [vmem:[#allocation2 + $0x18] sm:$0xff] }
 0x274   : > { %1646 = vst.msk [vmem:[#allocation2 + $0x28] sm:$0xff] %vm358_vm8, %v1628_v17  ;;  %v6886_v50 = vpop.f32.mrb[65].mxu0  ;;  %7418 = vmatmul.mubr.msk.f32.gmra.mrb[130].mxu1 %vm358_vm8, %v10988_v26  ;;  %v3934_v20 = vld [vmem:[#allocation2 + $0x18] sm:$0xff] }
 0x275   : > { %7420 = vmatprep.mubr.msk.f32.mxu1 %vm9131_vm0, %v12341_v43 }
 0x277   : > { %v1633_v12 = vpop.f32.mrb[66].mxu0  ;;  %v10995_v13 = vld [vmem:[#allocation2 + $0x20] sm:$0xff] }
 0x278   : > { %1647 = vst.msk [vmem:[#allocation2 + $0x30] sm:$0xff] %vm358_vm8, %v1633_v12  ;;  %v6889_v45 = vpop.f32.mrb[67].mxu0  ;;  %7421 = vmatmul.mubr.msk.f32.gmra.mrb[132].mxu1 %vm358_vm8, %v10995_v13 }
 0x279   : > { %7423 = vmatprep.mubr.msk.f32.mxu1 %vm9131_vm0, %v12341_v43 }
 0x27b   : > { %v1638_v52 = vpop.f32.mrb[68].mxu0  ;;  %v11002_v27 = vld [vmem:[#allocation2 + $0x28] sm:$0xff] }
 0x27c   : > { %1648 = vst.msk [vmem:[#allocation2 + $0x38] sm:$0xff] %vm358_vm8, %v1638_v52  ;;  %v6892_v17 = vpop.f32.mrb[69].mxu0  ;;  %7424 = vmatmul.mubr.msk.f32.gmra.mrb[134].mxu1 %vm358_vm8, %v11002_v27 }
 0x27d   : > { %7426 = vmatprep.mubr.msk.f32.mxu1 %vm9131_vm0, %v12341_v43 }
 0x27f   : > { %v11009_v50 = vld [vmem:[#allocation2 + $0x30] sm:$0xff] }
 0x280   : > { %7427 = vmatmul.mubr.msk.f32.gmra.mrb[136].mxu1 %vm358_vm8, %v11009_v50 }
 0x281   : > { %7429 = vmatprep.mubr.msk.f32.mxu1 %vm9131_vm0, %v12341_v43 }
 0x283   : > { %v11015_v12 = vpop.f32.mrb[70].mxu0  ;;  %v11017_v45 = vld [vmem:[#allocation2 + $0x38] sm:$0xff] }
 0x284   : > { %v7033_v52 = vpop.f32.mrb[71].mxu0  ;;  %7430 = vmatmul.mubr.msk.f32.gmra.mrb[138].mxu1 %vm358_vm8, %v11017_v45 }
 0x285   : > { %7460 = vmatprep.mubr.msk.f32.mxu1 %vm9131_vm0, %v12341_v43 }
 0x287   : > { %v11025_v56 = vpop.f32.mrb[72].mxu0 }
 0x288   : > { %v7036_v7 = vpop.f32.mrb[73].mxu0 }
 0x28b   : > { %v11029_v23 = vpop.f32.mrb[74].mxu0 }
 0x28c   : > { %v7039_v42 = vpop.f32.mrb[75].mxu0 }
 0x28d   : > { %v2931_v42 = vld [vmem:[%s12300_s4 + $0x20] sm:$0xff] }
 0x28f   : > { %v11033_v32 = vpop.f32.mrb[76].mxu0 }
 0x290   : > { %v7042_v17 = vpop.f32.mrb[77].mxu0 }
 0x293   : > { %v11037_v6 = vpop.f32.mrb[78].mxu0 }
 0x294   : > { %v7045_v53 = vpop.f32.mrb[79].mxu0 }
 0x295   : > { %v2928_v53 = vld [vmem:[%s12300_s4 + $0x8] sm:$0xff] }
 0x296   : > { %v11055_v7 = vpack.c.bf16 %v2928_v53, %v2927_v30  ;;  %v2932_v30 = vld [vmem:[%s12300_s4 + $0x28] sm:$0xff] }
 0x297   : > { %v11041_v60 = vpop.f32.mrb[80].mxu0  ;;  %v11074_v0 = vpack.c.bf16 %v2932_v30, %v2931_v42  ;;  %v2936_v42 = vld [vmem:[%s12300_s4 + $0x48] sm:$0xff] }
 0x298   : > { %v7048_v31 = vpop.f32.mrb[81].mxu0  ;;  %12366 = vst [vmem:[#allocation14_spill] sm:$0xff] %v11055_v7  ;;  %8565 = vmatpush3.bf16.msra.mxu1 %v11055_v7  ;;  %v12367_v7 = vmax.f32 %v10707_v34, %v10768_v15  ;;  %v11091_v34 = vpack.c.bf16 %v2934_v35, %v2933_v28  ;;  %v12369_v15 = vmax.f32 %v10719_v47, %v10778_v36  ;;  %v2938_v35 = vld [vmem:[%s12300_s4 + $0x58] sm:$0xff] }
 0x299   : > { %v2929_v31 = vld [vmem:[%s12300_s4 + $0x10] sm:$0xff]  ;;  %8566 = vmatprep.subr.bf16.mxu1 %v12343_v57  ;;  %v12371_v36 = vmax.f32 %v10727_v51, %v10786_v41  ;;  %v12372_v41 = vmax.f32 %v10735_v48, %v10796_v22 }
 0x29a   : > { %12368 = vst [vmem:[#allocation15_spill] sm:$0xff] %v11091_v34 }
 0x29b   : > { %v11045_v61 = vpop.f32.mrb[82].mxu0 }
 0x29c   : > { %v7051_v52 = vpop.f32.mrb[83].mxu0 }
 0x29d   : > { %v2930_v52 = vld [vmem:[%s12300_s4 + $0x18] sm:$0xff] }
 0x29e   : > { %v11064_v17 = vpack.c.bf16 %v2930_v52, %v2929_v31 }
 0x2a0   : > { %8568 = vmatpush3.bf16.msra.mxu1 %v11064_v17 }
 0x2a1   : > { %8569 = vmatprep.subr.bf16.mxu1 %v12343_v57 }
 0x2a3   : > { %v2263_v53 = vpop.f32.mrb[84].mxu0 }
 0x2a4   : > { %v11079_v31 = vmax.f32 %v12367_v7, %v2263_v53  ;;  %v7139_v52 = vpop.f32.mrb[85].mxu0  ;;  %8571 = vmatpush3.bf16.msra.mxu1 %v11074_v0 }
 0x2a5   : > { %8572 = vmatprep.subr.bf16.mxu1 %v12343_v57  ;;  %v2935_v52 = vld [vmem:[%s12300_s4 + $0x40] sm:$0xff] }
 0x2a6   : > { %v11108_v47 = vpack.c.bf16 %v2936_v42, %v2935_v52  ;;  %v12373_v42 = vmax.f32 %v10743_v63, %v10806_v10  ;;  %v12375_v63 = vmax.f32 %v10759_v9, %v10826_v25  ;;  %v2654_v9 = vld [vmem:[%s12299_s3 + $0x8] sm:$0xff] }
 0x2a7   : > { %v2268_v30 = vpop.f32.mrb[86].mxu0 }
 0x2a8   : > { %v11096_v7 = vmax.f32 %v12369_v15, %v2268_v30  ;;  %v7142_v53 = vpop.f32.mrb[87].mxu0  ;;  %8574 = vmatpush3.bf16.msra.mxu1 %v11091_v34  ;;  %12370 = vst [vmem:[#allocation16_spill] sm:$0xff] %v11108_v47 }
 0x2a9   : > { %8575 = vmatprep.subr.bf16.mxu1 %v12343_v57  ;;  %v2937_v53 = vld [vmem:[%s12300_s4 + $0x50] sm:$0xff] }
 0x2aa   : > { %v11125_v51 = vpack.c.bf16 %v2938_v35, %v2937_v53  ;;  %v12374_v53 = vmax.f32 %v10751_v44, %v10816_v54  ;;  %v12376_v44 = vmax.f32 %v11015_v12, %v10901_v49 }
 0x2ab   : > { %v2273_v28 = vpop.f32.mrb[88].mxu0 }
 0x2ac   : > { %v11113_v30 = vmax.f32 %v12371_v36, %v2273_v28  ;;  %v7145_v15 = vpop.f32.mrb[89].mxu0  ;;  %8577 = vmatpush3.bf16.msra.mxu1 %v11108_v47 }
 0x2ad   : > { %8578 = vmatprep.subr.bf16.mxu1 %v12343_v57 }
 0x2af   : > { %v2278_v52 = vpop.f32.mrb[90].mxu0 }
 0x2b0   : > { %v11130_v28 = vmax.f32 %v12372_v41, %v2278_v52  ;;  %v7148_v36 = vpop.f32.mrb[91].mxu0  ;;  %8580 = vmatpush3.bf16.msra.mxu1 %v11125_v51 }
 0x2b1   : > { %8581 = vmatprep.subr.bf16.mxu1 %v12343_v57 }
 0x2b3   : > { %v2283_v34 = vpop.f32.mrb[92].mxu0 }
 0x2b4   : > { %v11139_v47 = vmax.f32 %v12373_v42, %v2283_v34  ;;  %v7151_v35 = vpop.f32.mrb[93].mxu0 }
 0x2b6   : > { %v2408_v48 = vmax.f32 %v11139_v47, %v10935_v38 }
 0x2b7   : > { %v2288_v22 = vpop.f32.mrb[94].mxu0 }
 0x2b8   : > { %v11147_v52 = vmax.f32 %v12374_v53, %v2288_v22  ;;  %v7154_v41 = vpop.f32.mrb[95].mxu0 }
 0x2b9   : > { %v2653_v41 = vld [vmem:[%s12299_s3] sm:$0xff] }
 0x2ba   : > { %v2409_v36 = vmax.f32 %v11147_v52, %v10938_v58  ;;  %v8532_v12 = vpack.c.bf16 %v2654_v9, %v2653_v41 }
 0x2bb   : > { %v2293_v15 = vpop.f32.mrb[96].mxu0 }
 0x2bc   : > { %v11154_v10 = vmax.f32 %v12375_v63, %v2293_v15  ;;  %v7157_v34 = vpop.f32.mrb[97].mxu0  ;;  %v12377_v63 = vmax.f32 %v11025_v56, %v10907_v16  ;;  %v12378_v56 = vmax.f32 %v11029_v23, %v10911_v55  ;;  %v2658_v23 = vld [vmem:[%s12299_s3 + $0x28] sm:$0x3] }
 0x2be   : > { %v2410_v42 = vmax.f32 %v11154_v10, %v10940_v37 }
 0x2c3   : > { %v2477_v35 = vpop.f32.mrb[98].mxu0 }
 0x2c4   : > { %v2511_v54 = vmax.f32 %v12376_v44, %v2477_v35  ;;  %v7245_v22 = vpop.f32.mrb[99].mxu0  ;;  %v2655_v44 = vld [vmem:[%s12299_s3 + $0x10] sm:$0xff] }
 0x2c6   : > { %v2618_v53 = vmax.f32 %v2511_v54, %v10955_v29  ;;  %v2656_v54 = vld [vmem:[%s12299_s3 + $0x18] sm:$0xff] }
 0x2c7   : > { %v2482_v25 = vpop.f32.mrb[100].mxu0 }
 0x2c8   : > { %v2639_v15 = vadd.f32 %v10439_v59, %v2618_v53  ;;  %v2512_v34 = vmax.f32 %v12377_v63, %v2482_v25  ;;  %v7248_v49 = vpop.f32.mrb[101].mxu0 }
 0x2ca   : > { %v2646_v35 = vmax.f32 %v2639_v15, 0.0  ;;  %v2619_v29 = vmax.f32 %v2512_v34, %v10960_v24  ;;  %v8535_v24 = vpack.c.bf16 %v2656_v54, %v2655_v44  ;;  %v11197_v15 = vld [vmem:[%s12298_s2] ss:$0 sm:$0xff] }
 0x2cb   : > { %v2487_v22 = vpop.f32.mrb[102].mxu0 }
 0x2cc   : > { %v2640_v53 = vadd.f32 %v10439_v59, %v2619_v29  ;;  %v2513_v16 = vmax.f32 %v12378_v56, %v2487_v22  ;;  %v7251_v25 = vpop.f32.mrb[103].mxu0  ;;  %7330 = vmatmul.mubr.msk.f32.vlgmr.msra.gmra.mrb[112].mxu0 %vm1392_vm7, %v2646_v35  ;;  %v2657_v59 = vld [vmem:[%s12299_s3 + $0x20] sm:$0xff] }
 0x2cd   : > { %8533 = vmatpush3.bf16.msra.mxu0 %v8532_v12  ;;  %7332 = vmatprep.mubr.msk.f32.mxu0 %vm9131_vm0, %v12341_v43  ;;  %v8538_v12 = vpack.c.bf16 %v2658_v23, %v2657_v59 }
 0x2ce   : > { %v2647_v41 = vmax.f32 %v2640_v53, 0.0  ;;  %v2620_v9 = vmax.f32 %v2513_v16, %v10962_v11  ;;  %8534 = vmatprep.subr.bf16.mxu0 %v12343_v57  ;;  %v12379_v11 = vmax.f32 %v11033_v32, %v10913_v14  ;;  %v12380_v32 = vmax.f32 %v11037_v6, %v10915_v8 }
 0x2cf   : > { %v2492_v55 = vpop.f32.mrb[104].mxu0  ;;  %v12381_v6 = vmax.f32 %v11041_v60, %v10917_v33 }
 0x2d0   : > { %v2641_v63 = vadd.f32 %v11197_v15, %v2620_v9  ;;  %v2514_v34 = vmax.f32 %v12379_v11, %v2492_v55  ;;  %v7254_v49 = vpop.f32.mrb[105].mxu0  ;;  %7333 = vmatmul.mubr.msk.f32.gmra.mrb[114].mxu0 %vm1392_vm7, %v2647_v41  ;;  %v12382_v9 = vmax.f32 %v11045_v61, %v10919_v62  ;;  %v12383_v61 = vmax.f32 %v11079_v31, %v10921_v4 }
 0x2d1   : > { %7335 = vmatprep.mubr.msk.f32.mxu0 %vm9131_vm0, %v12341_v43  ;;  %8536 = vmatpush3.bf16.msra.mxu0 %v8535_v24  ;;  %v12384_v4 = vmax.f32 %v11096_v7, %v10923_v18  ;;  %v5515_v49 = vld [vmem:[%s12300_s4 + $0x1d0] sm:$0xff]  ;;  %v12385_v7 = vmax.f32 %v11113_v30, %v10925_v21 }
 0x2d2   : > { %v2648_v35 = vmax.f32 %v2641_v63, 0.0  ;;  %v2621_v29 = vmax.f32 %v2514_v34, %v10964_v2  ;;  %8537 = vmatprep.subr.bf16.mxu0 %v12343_v57  ;;  %v2625_v62 = vadd.f32 %v11197_v15, %v12383_v61  ;;  %v5513_v63 = vld [vmem:[%s12300_s4 + $0x1c0] sm:$0xff]  ;;  %v5508_v61 = vld [vmem:[%s12300_s4 + $0x198] sm:$0xff] }
 0x2d3   : > { %v2497_v44 = vpop.f32.mrb[106].mxu0  ;;  %v2626_v31 = vadd.f32 %v11197_v15, %v12384_v4  ;;  %v5477_v4 = vld [vmem:[%s12300_s4 + $0xe0] sm:$0xff] }
 0x2d4   : > { %v2642_v54 = vadd.f32 %v11197_v15, %v2621_v29  ;;  %v2515_v14 = vmax.f32 %v12380_v32, %v2497_v44  ;;  %v7257_v22 = vpop.f32.mrb[107].mxu0  ;;  %7336 = vmatmul.mubr.msk.f32.gmra.mrb[116].mxu0 %vm1392_vm7, %v2648_v35  ;;  %v2632_v34 = vmax.f32 %v2625_v62, 0.0  ;;  %v2627_v29 = vadd.f32 %v11197_v15, %v12385_v7  ;;  %v5517_v44 = vld [vmem:[%s12300_s4 + $0x1e0] sm:$0xff]  ;;  %v5544_v7 = vld [vmem:[%s12300_s4 + $0x238] sm:$0xff] }
 0x2d5   : > { %7338 = vmatprep.mubr.msk.f32.mxu0 %vm9131_vm0, %v12341_v43  ;;  %8540 = vmatpush3.bf16.msk.msra.mxu0 %vm10034_vm6, %v8538_v12  ;;  %v5516_v12 = vld [vmem:[%s12300_s4 + $0x1d8] sm:$0xff]  ;;  %v2633_v18 = vmax.f32 %v2626_v31, 0.0  ;;  %v12386_v32 = vmax.f32 %v11130_v28, %v10927_v46  ;;  %v5519_v22 = vld [vmem:[%s12300_s4 + $0x1f0] sm:$0xff]  ;;  %v5509_v62 = vld [vmem:[%s12300_s4 + $0x1a0] sm:$0xff] }
 0x2d6   : > { %v2649_v53 = vmax.f32 %v2642_v54, 0.0  ;;  %v2622_v2 = vmax.f32 %v2515_v14, %v10966_v19  ;;  %8607 = vmatprep.subr.bf16.mxu0 %v12343_v57  ;;  %v11268_v35 = vpack.c.bf16 %v5516_v12, %v5515_v49  ;;  %v5518_v54 = vld [vmem:[%s12300_s4 + $0x1e8] sm:$0xff]  ;;  %v2634_v30 = vmax.f32 %v2627_v29, 0.0  ;;  %v5543_v49 = vld [vmem:[%s12300_s4 + $0x230] sm:$0xff] }
 0x2d7   : > { %v2502_v56 = vpop.f32.mrb[108].mxu0  ;;  %v11285_v21 = vpack.c.bf16 %v5518_v54, %v5517_v44  ;;  %v2628_v14 = vadd.f32 %v11197_v15, %v12386_v32  ;;  %v5478_v31 = vld [vmem:[%s12300_s4 + $0xe8] sm:$0xff]  ;;  %v11490_v29 = vpack.c.bf16 %v5544_v7, %v5543_v49  ;;  %v5479_v44 = vld [vmem:[%s12300_s4 + $0xf0] sm:$0xff]  ;;  %v5480_v54 = vld [vmem:[%s12300_s4 + $0xf8] sm:$0xff] }
 0x2d8   : > { %v2643_v16 = vadd.f32 %v11197_v15, %v2622_v2  ;;  %v2516_v8 = vmax.f32 %v12381_v6, %v2502_v56  ;;  %v7260_v25 = vpop.f32.mrb[109].mxu0  ;;  %7339 = vmatmul.mubr.msk.f32.gmra.mrb[118].mxu0 %vm1392_vm7, %v2649_v53  ;;  %v5520_v53 = vld [vmem:[%s12300_s4 + $0x1f8] sm:$0xff]  ;;  %v2629_v2 = vadd.f32 %v11197_v15, %v2408_v48  ;;  %v5521_v56 = vld [vmem:[%s12300_s4 + $0x200] sm:$0xff]  ;;  %v2630_v48 = vadd.f32 %v11197_v15, %v2409_v36  ;;  %v5523_v6 = vld [vmem:[%s12300_s4 + $0x210] sm:$0xff] }
 0x2d9   : > { %7341 = vmatprep.mubr.msk.f32.mxu0 %vm9131_vm0, %v12341_v43  ;;  %v11302_v46 = vpack.c.bf16 %v5520_v53, %v5519_v22  ;;  %v2635_v28 = vmax.f32 %v2628_v14, 0.0  ;;  %v2631_v36 = vadd.f32 %v11197_v15, %v2410_v42  ;;  %v5525_v25 = vld [vmem:[%s12300_s4 + $0x220] sm:$0xff]  ;;  %v5499_v42 = vld [vmem:[%s12300_s4 + $0x150] sm:$0xff]  ;;  %v2920_v12 = vld [vmem:[#allocation2 + $0x48] sm:$0xff]  ;;  %v11509_v32 = vpack.c.bf16 %v5480_v54, %v5479_v44 }
 0x2da   : > { %v2650_v40 = vmax.f32 %v2643_v16, 0.0  ;;  %v2623_v24 = vmax.f32 %v2516_v8, %v10968_v5  ;;  %v5522_v16 = vld [vmem:[%s12300_s4 + $0x208] sm:$0xff]  ;;  %v2636_v47 = vmax.f32 %v2629_v2, 0.0  ;;  %v5524_v8 = vld [vmem:[%s12300_s4 + $0x218] sm:$0xff]  ;;  %v2637_v52 = vmax.f32 %v2630_v48, 0.0  ;;  %v5481_v53 = vld [vmem:[%s12300_s4 + $0x100] sm:$0xff] }
 0x2db   : > { %v2507_v41 = vpop.f32.mrb[110].mxu0  ;;  %v11319_v38 = vpack.c.bf16 %v5522_v16, %v5521_v56  ;;  %v11336_v58 = vpack.c.bf16 %v5524_v8, %v5523_v6  ;;  %v2638_v10 = vmax.f32 %v2631_v36, 0.0  ;;  %v5546_v14 = vld [vmem:[%s12300_s4 + $0x248] sm:$0xff]  ;;  %v5547_v2 = vld [vmem:[%s12300_s4 + $0x250] sm:$0xff]  ;;  %v5548_v16 = vld [vmem:[%s12300_s4 + $0x258] sm:$0xff] }
 0x2dc   : > { %v2644_v19 = vadd.f32 %v11197_v15, %v2623_v24  ;;  %v2517_v59 = vmax.f32 %v12382_v9, %v2507_v41  ;;  %v7263_v23 = vpop.f32.mrb[111].mxu0  ;;  %7342 = vmatmul.mubr.msk.f32.gmra.mrb[120].mxu0 %vm1392_vm7, %v2650_v40  ;;  %v5526_v40 = vld [vmem:[%s12300_s4 + $0x228] sm:$0xf]  ;;  %v5501_v41 = vld [vmem:[%s12300_s4 + $0x160] sm:$0xff]  ;;  %v5483_v48 = vld [vmem:[%s12300_s4 + $0x110] sm:$0xff] }
 0x2dd   : > { %7344 = vmatprep.mubr.msk.f32.mxu0 %vm9131_vm0, %v12341_v43  ;;  %v11353_v37 = vpack.c.bf16 %v5526_v40, %v5525_v25  ;;  %v5504_v23 = vld [vmem:[%s12300_s4 + $0x178] sm:$0xff]  ;;  %v5549_v8 = vld [vmem:[%s12300_s4 + $0x260] sm:$0xff]  ;;  %v5550_v36 = vld [vmem:[%s12300_s4 + $0x268] sm:$0xff] }
 0x2de   : > { %v2651_v60 = vmax.f32 %v2644_v19, 0.0  ;;  %v2624_v33 = vmax.f32 %v2517_v59, %v10970_v1  ;;  %v5514_v1 = vld [vmem:[%s12300_s4 + $0x1c8] sm:$0xff]  ;;  %v5503_v59 = vld [vmem:[%s12300_s4 + $0x170] sm:$0xff]  ;;  %v5484_v6 = vld [vmem:[%s12300_s4 + $0x118] sm:$0xff]  ;;  %v11555_v25 = vpack.c.bf16 %v5550_v36, %v5549_v8 }
 0x2df   : > { %v11252_v11 = vpack.c.bf16 %v5514_v1, %v5513_v63  ;;  %v5502_v19 = vld [vmem:[%s12300_s4 + $0x168] sm:$0xff]  ;;  %v5511_v63 = vld [vmem:[%s12300_s4 + $0x1b0] sm:$0xff]  ;;  %v5485_v40 = vld [vmem:[%s12300_s4 + $0x120] sm:$0xff] }
 0x2e0   : > { %v2645_v55 = vadd.f32 %v11197_v15, %v2624_v33  ;;  %7345 = vmatmul.mubr.msk.f32.gmra.mrb[122].mxu0 %vm1392_vm7, %v2651_v60  ;;  %v5500_v15 = vld [vmem:[%s12300_s4 + $0x158] sm:$0xff]  ;;  %v11382_v9 = vpack.c.bf16 %v5502_v19, %v5501_v41  ;;  %v5505_v60 = vld [vmem:[%s12300_s4 + $0x180] sm:$0xff]  ;;  %v5506_v33 = vld [vmem:[%s12300_s4 + $0x188] sm:$0xff] }
 0x2e1   : > { %7347 = vmatprep.mubr.msk.f32.mxu0 %vm9131_vm0, %v12341_v43  ;;  %v11368_v24 = vpack.c.bf16 %v5500_v15, %v5499_v42  ;;  %v5551_v42 = vld [vmem:[%s12300_s4 + $0x270] sm:$0xff]  ;;  %v5552_v41 = vld [vmem:[%s12300_s4 + $0x278] sm:$0xff] }
 0x2e2   : > { %v2652_v5 = vmax.f32 %v2645_v55, 0.0  ;;  %v5507_v55 = vld [vmem:[%s12300_s4 + $0x190] sm:$0xff]  ;;  %v11575_v19 = vpack.c.bf16 %v5552_v41, %v5551_v42 }
 0x2e3   : > { %v12387_v41 = vld [vmem:[#allocation9_spill] sm:$0xff] }
 0x2e4   : > { %7348 = vmatmul.mubr.msk.f32.gmra.mrb[124].mxu0 %vm1392_vm7, %v2652_v5  ;;  %v5510_v5 = vld [vmem:[%s12300_s4 + $0x1a8] sm:$0xff] }
 0x2e5   : > { %7362 = vmatprep.mubr.msk.f32.mxu0 %vm9131_vm0, %v12341_v43 }
 0x2e8   : > { %7363 = vmatmul.mubr.msk.f32.vlgmr.msra.gmra.mrb[112].mxu0 %vm1392_vm7, %v2632_v34 }
 0x2e9   : > { %8609 = vmatpush3.bf16.msra.mxu0 %v11252_v11  ;;  %7365 = vmatprep.mubr.msk.f32.mxu0 %vm9131_vm0, %v12341_v43 }
 0x2ea   : > { %8610 = vmatprep.subr.bf16.mxu0 %v12343_v57 }
 0x2ec   : > { %7366 = vmatmul.mubr.msk.f32.gmra.mrb[114].mxu0 %vm1392_vm7, %v2633_v18  ;;  %v11483_v18 = vpack.c.bf16 %v5478_v31, %v5477_v4 }
 0x2ed   : > { %8612 = vmatpush3.bf16.msra.mxu0 %v11268_v35  ;;  %7368 = vmatprep.mubr.msk.f32.mxu0 %vm9131_vm0, %v12341_v43 }
 0x2ee   : > { %8613 = vmatprep.subr.bf16.mxu0 %v12343_v57 }
 0x2f0   : > { %7369 = vmatmul.mubr.msk.f32.gmra.mrb[116].mxu0 %vm1392_vm7, %v2634_v30  ;;  %v5545_v30 = vld [vmem:[%s12300_s4 + $0x240] sm:$0xff] }
 0x2f1   : > { %8615 = vmatpush3.bf16.msra.mxu0 %v11285_v21  ;;  %7371 = vmatprep.mubr.msk.f32.mxu0 %vm9131_vm0, %v12341_v43  ;;  %v11515_v22 = vpack.c.bf16 %v5546_v14, %v5545_v30 }
 0x2f2   : > { %8616 = vmatprep.subr.bf16.mxu0 %v12343_v57 }
 0x2f4   : > { %7372 = vmatmul.mubr.msk.f32.gmra.mrb[118].mxu0 %vm1392_vm7, %v2635_v28  ;;  %v5482_v28 = vld [vmem:[%s12300_s4 + $0x108] sm:$0xff] }
 0x2f5   : > { %8618 = vmatpush3.bf16.msra.mxu0 %v11302_v46  ;;  %7374 = vmatprep.mubr.msk.f32.mxu0 %vm9131_vm0, %v12341_v43  ;;  %v11529_v56 = vpack.c.bf16 %v5482_v28, %v5481_v53 }
 0x2f6   : > { %8619 = vmatprep.subr.bf16.mxu0 %v12343_v57 }
 0x2f8   : > { %7375 = vmatmul.mubr.msk.f32.gmra.mrb[120].mxu0 %vm1392_vm7, %v2636_v47  ;;  %v11535_v47 = vpack.c.bf16 %v5548_v16, %v5547_v2 }
 0x2f9   : > { %8621 = vmatpush3.bf16.msra.mxu0 %v11319_v38  ;;  %7377 = vmatprep.mubr.msk.f32.mxu0 %vm9131_vm0, %v12341_v43 }
 0x2fa   : > { %8622 = vmatprep.subr.bf16.mxu0 %v12343_v57 }
 0x2fc   : > { %7378 = vmatmul.mubr.msk.f32.gmra.mrb[122].mxu0 %vm1392_vm7, %v2637_v52  ;;  %v11549_v52 = vpack.c.bf16 %v5484_v6, %v5483_v48 }
 0x2fd   : > { %8624 = vmatpush3.bf16.msra.mxu0 %v11336_v58  ;;  %7380 = vmatprep.mubr.msk.f32.mxu0 %vm9131_vm0, %v12341_v43 }
 0x2fe   : > { %8625 = vmatprep.subr.bf16.mxu0 %v12343_v57 }
 0x300   : > { %7381 = vmatmul.mubr.msk.f32.gmra.mrb[124].mxu0 %vm1392_vm7, %v2638_v10  ;;  %v5486_v10 = vld [vmem:[%s12300_s4 + $0x128] sm:$0xff] }
 0x301   : > { %8628 = vmatpush3.bf16.msk.msra.mxu0 %vm10866_vm10, %v11353_v37  ;;  %7558 = vmatprep.mubr.msk.f32.mxu0 %vm9131_vm0, %v12341_v43  ;;  %v11569_v15 = vpack.c.bf16 %v5486_v10, %v5485_v40 }
 0x302   : > { %8629 = vmatprep.subr.bf16.mxu0 %v12343_v57 }
 0x304   : > { %7559 = vmatmul.mubr.msk.f32.vlgmr.msra.gmra.mrb[126].mxu0 %vm358_vm8, %v10974_v3  ;;  %v11396_v3 = vpack.c.bf16 %v5504_v23, %v5503_v59  ;;  %v5487_v59 = vld [vmem:[%s12300_s4 + $0x130] sm:$0xff]  ;;  %v5488_v23 = vld [vmem:[%s12300_s4 + $0x138] sm:$0xff] }
 0x305   : > { %7561 = vmatprep.mubr.msk.f32.mxu0 %vm9131_vm0, %v12341_v43  ;;  %8631 = vmatpush3.bf16.msra.mxu0 %v11368_v24 }
 0x306   : > { %8632 = vmatprep.subr.bf16.mxu0 %v12343_v57 }
 0x308   : > { %7562 = vmatmul.mubr.msk.f32.gmra.mrb[128].mxu0 %vm358_vm8, %v10981_v39  ;;  %v11410_v39 = vpack.c.bf16 %v5506_v33, %v5505_v60  ;;  %v5553_v60 = vld [vmem:[%s12300_s4 + $0x280] sm:$0xff]  ;;  %v11589_v33 = vpack.c.bf16 %v5488_v23, %v5487_v59  ;;  %v12388_v59 = vld [vmem:[#allocation10_spill] sm:$0xff]  ;;  %v12393_v23 = vld [vmem:[#allocation8_spill] sm:$0xff] }
 0x309   : > { %7564 = vmatprep.mubr.msk.f32.mxu0 %vm9131_vm0, %v12341_v43  ;;  %8634 = vmatpush3.bf16.msra.mxu0 %v11382_v9 }
 0x30a   : > { %8635 = vmatprep.subr.bf16.mxu0 %v12343_v57 }
 0x30c   : > { %7565 = vmatmul.mubr.msk.f32.gmra.mrb[130].mxu0 %vm358_vm8, %v10988_v26  ;;  %v11424_v26 = vpack.c.bf16 %v5508_v61, %v5507_v55  ;;  %v5554_v55 = vld [vmem:[%s12300_s4 + $0x288] sm:$0xff] }
 0x30d   : > { %7567 = vmatprep.mubr.msk.f32.mxu0 %vm9131_vm0, %v12341_v43  ;;  %8637 = vmatpush3.bf16.msra.mxu0 %v11396_v3  ;;  %v11595_v61 = vpack.c.bf16 %v5554_v55, %v5553_v60  ;;  %v5619_v60 = vld [vmem:[%s12302_s6 + $0x60] sm:$0xff] }
 0x30e   : > { %8638 = vmatprep.subr.bf16.mxu0 %v12343_v57  ;;  %v5639_v55 = vld [vmem:[%s12302_s6 + $0xe0] sm:$0xff] }
 0x310   : > { %7568 = vmatmul.mubr.msk.f32.gmra.mrb[132].mxu0 %vm358_vm8, %v10995_v13  ;;  %v11438_v13 = vpack.c.bf16 %v5510_v5, %v5509_v62  ;;  %v5489_v62 = vld [vmem:[%s12300_s4 + $0x140] sm:$0xff]  ;;  %v5490_v5 = vld [vmem:[%s12300_s4 + $0x148] sm:$0xf] }
 0x311   : > { %7570 = vmatprep.mubr.msk.f32.mxu0 %vm9131_vm0, %v12341_v43  ;;  %8640 = vmatpush3.bf16.msra.mxu0 %v11410_v39 }
 0x312   : > { %8641 = vmatprep.subr.bf16.mxu0 %v12343_v57 }
 0x314   : > { %7571 = vmatmul.mubr.msk.f32.gmra.mrb[134].mxu0 %vm358_vm8, %v11002_v27  ;;  %v2939_v27 = vld [vmem:[%s12300_s4 + $0x60] sm:$0xff] }
 0x315   : > { %7573 = vmatprep.mubr.msk.f32.mxu0 %vm9131_vm0, %v12341_v43  ;;  %8643 = vmatpush3.bf16.msra.mxu0 %v11424_v26 }
 0x316   : > { %8644 = vmatprep.subr.bf16.mxu0 %v12343_v57 }
 0x318   : > { %7574 = vmatmul.mubr.msk.f32.gmra.mrb[136].mxu0 %vm358_vm8, %v11009_v50  ;;  %v2940_v50 = vld [vmem:[%s12300_s4 + $0x68] sm:$0xf] }
 0x319   : > { %7576 = vmatprep.mubr.msk.f32.mxu0 %vm9131_vm0, %v12341_v43  ;;  %8646 = vmatpush3.bf16.msra.mxu0 %v11438_v13  ;;  %v11460_v1 = vpack.c.bf16 %v2940_v50, %v2939_v27  ;;  %v5555_v27 = vld [vmem:[%s12300_s4 + $0x290] sm:$0xff]  ;;  %v11609_v50 = vpack.c.bf16 %v5490_v5, %v5489_v62  ;;  %v5620_v5 = vld [vmem:[%s12302_s6 + $0x68] sm:$0xff] }
 0x31a   : > { %8647 = vmatprep.subr.bf16.mxu0 %v12343_v57 }
 0x31b   : > { %8584 = vmatpush3.bf16.msk.msra.mxu1 %vm10866_vm10, %v11460_v1 }
 0x31c   : > { %7577 = vmatmul.mubr.msk.f32.gmra.mrb[138].mxu0 %vm358_vm8, %v11017_v45  ;;  %v5512_v45 = vld [vmem:[%s12300_s4 + $0x1b8] sm:$0xf]  ;;  %8585 = vmatprep.subr.bf16.mxu1 %v12343_v57 }
 0x31d   : > { %7607 = vmatprep.mubr.msk.f32.mxu0 %vm9131_vm0, %v12341_v43  ;;  %v11465_v34 = vpack.c.bf16 %v5512_v45, %v5511_v63  ;;  %v5556_v63 = vld [vmem:[%s12300_s4 + $0x298] sm:$0xf] }
 0x31e   : > { %7461 = vmatmul.mubr.msk.f32.vlgmr.msra.gmra.mrb[126].mxu1 %vm358_vm8, %v2920_v12  ;;  %v11615_v45 = vpack.c.bf16 %v5556_v63, %v5555_v27  ;;  %v5641_v27 = vld [vmem:[%s12302_s6 + $0xf0] sm:$0xff] }
 0x31f   : > { %8650 = vmatpush3.bf16.msk.msra.mxu0 %vm10866_vm10, %v11465_v34  ;;  %8587 = vmatpush3.bf16.msra.mxu1 %v11483_v18 }
 0x320   : > { %8651 = vmatprep.subr.bf16.mxu0 %v12343_v57  ;;  %7463 = vmatprep.mubr.msk.f32.mxu1 %vm9131_vm0, %v12341_v43 }
 0x321   : > { %8588 = vmatprep.subr.bf16.mxu1 %v12343_v57 }
 0x322   : > { %7608 = vmatmul.mubr.msk.f32.vlgmr.msra.gmra.mrb[126].mxu0 %vm358_vm8, %v2920_v12 }
 0x323   : > { %8653 = vmatpush3.bf16.msra.mxu0 %v11490_v29  ;;  %7610 = vmatprep.mubr.msk.f32.mxu0 %vm9131_vm0, %v12341_v43 }
 0x324   : > { %8654 = vmatprep.subr.bf16.mxu0 %v12343_v57  ;;  %8590 = vmatpush3.bf16.msra.mxu1 %v11509_v32 }
 0x325   : > { %8591 = vmatprep.subr.bf16.mxu1 %v12343_v57 }
 0x327   : > { %8656 = vmatpush3.bf16.msra.mxu0 %v11515_v22 }
 0x328   : > { %8657 = vmatprep.subr.bf16.mxu0 %v12343_v57  ;;  %8593 = vmatpush3.bf16.msra.mxu1 %v11529_v56 }
 0x329   : > { %8594 = vmatprep.subr.bf16.mxu1 %v12343_v57 }
 0x32b   : > { %8659 = vmatpush3.bf16.msra.mxu0 %v11535_v47 }
 0x32c   : > { %8660 = vmatprep.subr.bf16.mxu0 %v12343_v57  ;;  %8596 = vmatpush3.bf16.msra.mxu1 %v11549_v52 }
 0x32d   : > { %8597 = vmatprep.subr.bf16.mxu1 %v12343_v57 }
 0x32f   : > { %8662 = vmatpush3.bf16.msra.mxu0 %v11555_v25 }
 0x330   : > { %8663 = vmatprep.subr.bf16.mxu0 %v12343_v57  ;;  %8599 = vmatpush3.bf16.msra.mxu1 %v11569_v15 }
 0x331   : > { %8600 = vmatprep.subr.bf16.mxu1 %v12343_v57 }
 0x333   : > { %8665 = vmatpush3.bf16.msra.mxu0 %v11575_v19 }
 0x334   : > { %8666 = vmatprep.subr.bf16.mxu0 %v12343_v57  ;;  %8602 = vmatpush3.bf16.msra.mxu1 %v11589_v33 }
 0x335   : > { %8603 = vmatprep.subr.bf16.mxu1 %v12343_v57 }
 0x337   : > { %8668 = vmatpush3.bf16.msra.mxu0 %v11595_v61 }
 0x338   : > { %8669 = vmatprep.subr.bf16.mxu0 %v12343_v57  ;;  %8606 = vmatpush3.bf16.msk.msra.mxu1 %vm10866_vm10, %v11609_v50 }
 0x339   : > { %8673 = vmatprep.subr.bf16.mxu1 %v12343_v57 }
 0x33b   : > { %8672 = vmatpush3.bf16.msk.msra.mxu0 %vm10866_vm10, %v11615_v45 }
 0x33c   : > { %8739 = vmatprep.subr.bf16.mxu0 %v12343_v57 }
 0x3bb   : > { %v2879_v4 = vpop.f32.mrb[112].mxu0 }
 0x3bc   : > { %2913 = vst.msk [vmem:[#allocation2 + $0x50] sm:$0xff] %vm358_vm8, %v2879_v4  ;;  %v7364_v31 = vpop.f32.mrb[113].mxu0  ;;  %v5644_v4 = vld [vmem:[%s12302_s6 + $0x108] sm:$0xff] }
 0x3bf   : > { %v2884_v49 = vpop.f32.mrb[114].mxu0 }
 0x3c0   : > { %2914 = vst.msk [vmem:[#allocation2 + $0x58] sm:$0xff] %vm358_vm8, %v2884_v49  ;;  %v7367_v12 = vpop.f32.mrb[115].mxu0  ;;  %v5645_v49 = vld [vmem:[%s12302_s6 + $0x110] sm:$0xff] }
 0x3c3   : > { %v2889_v7 = vpop.f32.mrb[116].mxu0  ;;  %v11627_v44 = vld [vmem:[#allocation2 + $0x50] sm:$0xff] }
 0x3c4   : > { %2915 = vst.msk [vmem:[#allocation2 + $0x60] sm:$0xff] %vm358_vm8, %v2889_v7  ;;  %v7370_v54 = vpop.f32.mrb[117].mxu0  ;;  %7464 = vmatmul.mubr.msk.f32.gmra.mrb[128].mxu1 %vm358_vm8, %v11627_v44  ;;  %7611 = vmatmul.mubr.msk.f32.gmra.mrb[128].mxu0 %vm358_vm8, %v11627_v44 }
 0x3c5   : > { %7466 = vmatprep.mubr.msk.f32.mxu1 %vm9131_vm0, %v12341_v43  ;;  %7613 = vmatprep.mubr.msk.f32.mxu0 %vm9131_vm0, %v12341_v43 }
 0x3c7   : > { %v2894_v30 = vpop.f32.mrb[118].mxu0  ;;  %v11638_v14 = vld [vmem:[#allocation2 + $0x58] sm:$0xff] }
 0x3c8   : > { %2916 = vst.msk [vmem:[#allocation2 + $0x68] sm:$0xff] %vm358_vm8, %v2894_v30  ;;  %v7373_v53 = vpop.f32.mrb[119].mxu0  ;;  %7467 = vmatmul.mubr.msk.f32.gmra.mrb[130].mxu1 %vm358_vm8, %v11638_v14  ;;  %7614 = vmatmul.mubr.msk.f32.gmra.mrb[130].mxu0 %vm358_vm8, %v11638_v14 }
 0x3c9   : > { %7469 = vmatprep.mubr.msk.f32.mxu1 %vm9131_vm0, %v12341_v43  ;;  %7616 = vmatprep.mubr.msk.f32.mxu0 %vm9131_vm0, %v12341_v43 }
 0x3cb   : > { %v2899_v28 = vpop.f32.mrb[120].mxu0  ;;  %v11649_v2 = vld [vmem:[#allocation2 + $0x60] sm:$0xff] }
 0x3cc   : > { %2917 = vst.msk [vmem:[#allocation2 + $0x70] sm:$0xff] %vm358_vm8, %v2899_v28  ;;  %v7376_v16 = vpop.f32.mrb[121].mxu0  ;;  %7470 = vmatmul.mubr.msk.f32.gmra.mrb[132].mxu1 %vm358_vm8, %v11649_v2  ;;  %7617 = vmatmul.mubr.msk.f32.gmra.mrb[132].mxu0 %vm358_vm8, %v11649_v2 }
 0x3cd   : > { %7472 = vmatprep.mubr.msk.f32.mxu1 %vm9131_vm0, %v12341_v43  ;;  %7619 = vmatprep.mubr.msk.f32.mxu0 %vm9131_vm0, %v12341_v43 }
 0x3cf   : > { %v2904_v48 = vpop.f32.mrb[122].mxu0  ;;  %v11660_v6 = vld [vmem:[#allocation2 + $0x68] sm:$0xff] }
 0x3d0   : > { %2918 = vst.msk [vmem:[#allocation2 + $0x78] sm:$0xff] %vm358_vm8, %v2904_v48  ;;  %v7379_v8 = vpop.f32.mrb[123].mxu0  ;;  %7473 = vmatmul.mubr.msk.f32.gmra.mrb[134].mxu1 %vm358_vm8, %v11660_v6  ;;  %7620 = vmatmul.mubr.msk.f32.gmra.mrb[134].mxu0 %vm358_vm8, %v11660_v6 }
 0x3d1   : > { %7475 = vmatprep.mubr.msk.f32.mxu1 %vm9131_vm0, %v12341_v43  ;;  %7622 = vmatprep.mubr.msk.f32.mxu0 %vm9131_vm0, %v12341_v43 }
 0x3d3   : > { %v2909_v36 = vpop.f32.mrb[124].mxu0  ;;  %v11671_v40 = vld [vmem:[#allocation2 + $0x70] sm:$0xff] }
 0x3d4   : > { %2919 = vst.msk [vmem:[#allocation2 + $0x80] sm:$0xff] %vm358_vm8, %v2909_v36  ;;  %v7382_v10 = vpop.f32.mrb[125].mxu0  ;;  %7476 = vmatmul.mubr.msk.f32.gmra.mrb[136].mxu1 %vm358_vm8, %v11671_v40  ;;  %7623 = vmatmul.mubr.msk.f32.gmra.mrb[136].mxu0 %vm358_vm8, %v11671_v40 }
 0x3d5   : > { %7478 = vmatprep.mubr.msk.f32.mxu1 %vm9131_vm0, %v12341_v43  ;;  %7625 = vmatprep.mubr.msk.f32.mxu0 %vm9131_vm0, %v12341_v43 }
 0x3d7   : > { %v11682_v42 = vld [vmem:[#allocation2 + $0x78] sm:$0xff] }
 0x3d8   : > { %7479 = vmatmul.mubr.msk.f32.gmra.mrb[138].mxu1 %vm358_vm8, %v11682_v42  ;;  %7626 = vmatmul.mubr.msk.f32.gmra.mrb[138].mxu0 %vm358_vm8, %v11682_v42 }
 0x3d9   : > { %7509 = vmatprep.mubr.msk.f32.mxu1 %vm9131_vm0, %v12341_v43  ;;  %7656 = vmatprep.mubr.msk.f32.mxu0 %vm9131_vm0, %v12341_v43 }
 0x3dc   : > { %7510 = vmatmul.mubr.msk.f32.vlgmr.msra.gmra.mrb[126].mxu1 %vm358_vm8, %v11627_v44  ;;  %7657 = vmatmul.mubr.msk.f32.vlgmr.msra.gmra.mrb[126].mxu0 %vm358_vm8, %v11627_v44 }
 0x3dd   : > { %8675 = vmatpush3.bf16.msra.mxu1 %v12387_v41  ;;  %8741 = vmatpush3.bf16.msra.mxu0 %v11252_v11  ;;  %v12389_v11 = vld [vmem:[#allocation11_spill] sm:$0xff] }
 0x3de   : > { %7512 = vmatprep.mubr.msk.f32.mxu1 %vm9131_vm0, %v12341_v43  ;;  %7659 = vmatprep.mubr.msk.f32.mxu0 %vm9131_vm0, %v12341_v43 }
 0x3df   : > { %8676 = vmatprep.subr.bf16.mxu1 %v12343_v57  ;;  %8742 = vmatprep.subr.bf16.mxu0 %v12343_v57 }
 0x3e0   : > { %7513 = vmatmul.mubr.msk.f32.gmra.mrb[128].mxu1 %vm358_vm8, %v11638_v14  ;;  %7660 = vmatmul.mubr.msk.f32.gmra.mrb[128].mxu0 %vm358_vm8, %v11638_v14 }
 0x3e1   : > { %8678 = vmatpush3.bf16.msra.mxu1 %v12388_v59  ;;  %8744 = vmatpush3.bf16.msra.mxu0 %v11268_v35  ;;  %v12390_v35 = vld [vmem:[#allocation12_spill] sm:$0xff] }
 0x3e2   : > { %7515 = vmatprep.mubr.msk.f32.mxu1 %vm9131_vm0, %v12341_v43  ;;  %7662 = vmatprep.mubr.msk.f32.mxu0 %vm9131_vm0, %v12341_v43 }
 0x3e3   : > { %8679 = vmatprep.subr.bf16.mxu1 %v12343_v57  ;;  %8745 = vmatprep.subr.bf16.mxu0 %v12343_v57 }
 0x3e4   : > { %7516 = vmatmul.mubr.msk.f32.gmra.mrb[130].mxu1 %vm358_vm8, %v11649_v2  ;;  %7663 = vmatmul.mubr.msk.f32.gmra.mrb[130].mxu0 %vm358_vm8, %v11649_v2 }
 0x3e5   : > { %8681 = vmatpush3.bf16.msra.mxu1 %v12389_v11  ;;  %8747 = vmatpush3.bf16.msra.mxu0 %v11285_v21  ;;  %v12391_v21 = vld [vmem:[#allocation13_spill] sm:$0xff] }
 0x3e6   : > { %7518 = vmatprep.mubr.msk.f32.mxu1 %vm9131_vm0, %v12341_v43  ;;  %7665 = vmatprep.mubr.msk.f32.mxu0 %vm9131_vm0, %v12341_v43 }
 0x3e7   : > { %8682 = vmatprep.subr.bf16.mxu1 %v12343_v57  ;;  %8748 = vmatprep.subr.bf16.mxu0 %v12343_v57 }
 0x3e8   : > { %7519 = vmatmul.mubr.msk.f32.gmra.mrb[132].mxu1 %vm358_vm8, %v11660_v6  ;;  %7666 = vmatmul.mubr.msk.f32.gmra.mrb[132].mxu0 %vm358_vm8, %v11660_v6 }
 0x3e9   : > { %8684 = vmatpush3.bf16.msra.mxu1 %v12390_v35  ;;  %8750 = vmatpush3.bf16.msra.mxu0 %v11302_v46  ;;  %v12392_v46 = vld [vmem:[#allocation7_spill] sm:$0xff] }
 0x3ea   : > { %7521 = vmatprep.mubr.msk.f32.mxu1 %vm9131_vm0, %v12341_v43  ;;  %7668 = vmatprep.mubr.msk.f32.mxu0 %vm9131_vm0, %v12341_v43 }
 0x3eb   : > { %8685 = vmatprep.subr.bf16.mxu1 %v12343_v57  ;;  %8751 = vmatprep.subr.bf16.mxu0 %v12343_v57 }
 0x3ec   : > { %7522 = vmatmul.mubr.msk.f32.gmra.mrb[134].mxu1 %vm358_vm8, %v11671_v40  ;;  %7669 = vmatmul.mubr.msk.f32.gmra.mrb[134].mxu0 %vm358_vm8, %v11671_v40 }
 0x3ed   : > { %8687 = vmatpush3.bf16.msra.mxu1 %v12391_v21  ;;  %8753 = vmatpush3.bf16.msra.mxu0 %v11319_v38  ;;  %v3218_v38 = vld [vmem:[#allocation2 + $0x80] sm:$0xff] }
 0x3ee   : > { %7524 = vmatprep.mubr.msk.f32.mxu1 %vm9131_vm0, %v12341_v43  ;;  %7671 = vmatprep.mubr.msk.f32.mxu0 %vm9131_vm0, %v12341_v43 }
 0x3ef   : > { %8688 = vmatprep.subr.bf16.mxu1 %v12343_v57  ;;  %8754 = vmatprep.subr.bf16.mxu0 %v12343_v57 }
 0x3f0   : > { %7525 = vmatmul.mubr.msk.f32.gmra.mrb[136].mxu1 %vm358_vm8, %v11682_v42  ;;  %7672 = vmatmul.mubr.msk.f32.gmra.mrb[136].mxu0 %vm358_vm8, %v11682_v42 }
 0x3f1   : > { %8690 = vmatpush3.bf16.msra.mxu1 %v12392_v46  ;;  %8756 = vmatpush3.bf16.msra.mxu0 %v11336_v58  ;;  %v12394_v58 = vld [vmem:[#allocation14_spill] sm:$0xff] }
 0x3f2   : > { %7527 = vmatprep.mubr.msk.f32.mxu1 %vm9131_vm0, %v12341_v43  ;;  %7674 = vmatprep.mubr.msk.f32.mxu0 %vm9131_vm0, %v12341_v43 }
 0x3f3   : > { %8691 = vmatprep.subr.bf16.mxu1 %v12343_v57  ;;  %8757 = vmatprep.subr.bf16.mxu0 %v12343_v57 }
 0x3f4   : > { %7528 = vmatmul.mubr.msk.f32.gmra.mrb[138].mxu1 %vm358_vm8, %v3218_v38  ;;  %7675 = vmatmul.mubr.msk.f32.gmra.mrb[138].mxu0 %vm358_vm8, %v3218_v38 }
 0x3f5   : > { %8694 = vmatpush3.bf16.msk.msra.mxu1 %vm10866_vm10, %v12393_v23  ;;  %8760 = vmatpush3.bf16.msk.msra.mxu0 %vm10866_vm10, %v11353_v37  ;;  %v9060_v37 = vld [vmem:[#allocation2 + $0x10] sm:$0xff] }
 0x3f6   : > { %7705 = vmatprep.mubr.msk.f32.mxu1 %vm9131_vm0, %v12341_v43  ;;  %8695 = vmatprep.subr.bf16.mxu1 %v12343_v57 }
 0x3f7   : > { %7852 = vmatprep.mubr.msk.f32.mxu0 %vm9131_vm0, %v12341_v43  ;;  %8761 = vmatprep.subr.bf16.mxu0 %v12343_v57 }
 0x3f8   : > { %7706 = vmatmul.mubr.msk.f32.vlgmr.msra.gmra.mrb[140].mxu1 %vm358_vm8, %v11627_v44  ;;  %7853 = vmatmul.mubr.msk.f32.vlgmr.msra.gmra.mrb[140].mxu0 %vm358_vm8, %v11627_v44 }
 0x3f9   : > { %8697 = vmatpush3.bf16.msra.mxu1 %v12394_v58  ;;  %8763 = vmatpush3.bf16.msra.mxu0 %v11368_v24  ;;  %v9061_v24 = vld [vmem:[#allocation2 + $0x18] sm:$0xff] }
 0x3fa   : > { %7708 = vmatprep.mubr.msk.f32.mxu1 %vm9131_vm0, %v12341_v43  ;;  %8698 = vmatprep.subr.bf16.mxu1 %v12343_v57 }
 0x3fb   : > { %7855 = vmatprep.mubr.msk.f32.mxu0 %vm9131_vm0, %v12341_v43  ;;  %8764 = vmatprep.subr.bf16.mxu0 %v12343_v57 }
 0x3fc   : > { %7709 = vmatmul.mubr.msk.f32.gmra.mrb[142].mxu1 %vm358_vm8, %v11638_v14  ;;  %7856 = vmatmul.mubr.msk.f32.gmra.mrb[142].mxu0 %vm358_vm8, %v11638_v14 }
 0x3fd   : > { %8700 = vmatpush3.bf16.msra.mxu1 %v11064_v17  ;;  %8766 = vmatpush3.bf16.msra.mxu0 %v11382_v9  ;;  %v12395_v17 = vld [vmem:[#allocation15_spill] sm:$0xff] }
 0x3fe   : > { %7711 = vmatprep.mubr.msk.f32.mxu1 %vm9131_vm0, %v12341_v43  ;;  %8701 = vmatprep.subr.bf16.mxu1 %v12343_v57  ;;  %v9062_v9 = vld [vmem:[#allocation2 + $0x20] sm:$0xff] }
 0x3ff   : > { %7858 = vmatprep.mubr.msk.f32.mxu0 %vm9131_vm0, %v12341_v43  ;;  %8767 = vmatprep.subr.bf16.mxu0 %v12343_v57 }
 0x400   : > { %7712 = vmatmul.mubr.msk.f32.gmra.mrb[144].mxu1 %vm358_vm8, %v11649_v2  ;;  %7859 = vmatmul.mubr.msk.f32.gmra.mrb[144].mxu0 %vm358_vm8, %v11649_v2 }
 0x401   : > { %8703 = vmatpush3.bf16.msra.mxu1 %v11074_v0  ;;  %8769 = vmatpush3.bf16.msra.mxu0 %v11396_v3  ;;  %v12396_v0 = vld [vmem:[#allocation16_spill] sm:$0xff] }
 0x402   : > { %7714 = vmatprep.mubr.msk.f32.mxu1 %vm9131_vm0, %v12341_v43  ;;  %8704 = vmatprep.subr.bf16.mxu1 %v12343_v57  ;;  %v9063_v3 = vld [vmem:[#allocation2 + $0x28] sm:$0xff] }
 0x403   : > { %7861 = vmatprep.mubr.msk.f32.mxu0 %vm9131_vm0, %v12341_v43  ;;  %8770 = vmatprep.subr.bf16.mxu0 %v12343_v57 }
 0x404   : > { %7715 = vmatmul.mubr.msk.f32.gmra.mrb[146].mxu1 %vm358_vm8, %v11660_v6  ;;  %7862 = vmatmul.mubr.msk.f32.gmra.mrb[146].mxu0 %vm358_vm8, %v11660_v6 }
 0x405   : > { %8706 = vmatpush3.bf16.msra.mxu1 %v12395_v17  ;;  %8772 = vmatpush3.bf16.msra.mxu0 %v11410_v39  ;;  %v9064_v39 = vld [vmem:[#allocation2 + $0x30] sm:$0xff] }
 0x406   : > { %7717 = vmatprep.mubr.msk.f32.mxu1 %vm9131_vm0, %v12341_v43  ;;  %8707 = vmatprep.subr.bf16.mxu1 %v12343_v57 }
 0x407   : > { %7864 = vmatprep.mubr.msk.f32.mxu0 %vm9131_vm0, %v12341_v43  ;;  %8773 = vmatprep.subr.bf16.mxu0 %v12343_v57 }
 0x408   : > { %7718 = vmatmul.mubr.msk.f32.gmra.mrb[148].mxu1 %vm358_vm8, %v11671_v40  ;;  %7865 = vmatmul.mubr.msk.f32.gmra.mrb[148].mxu0 %vm358_vm8, %v11671_v40 }
 0x409   : > { %8709 = vmatpush3.bf16.msra.mxu1 %v12396_v0  ;;  %8775 = vmatpush3.bf16.msra.mxu0 %v11424_v26  ;;  %v9065_v26 = vld [vmem:[#allocation2 + $0x38] sm:$0xff] }
 0x40a   : > { %7720 = vmatprep.mubr.msk.f32.mxu1 %vm9131_vm0, %v12341_v43  ;;  %8710 = vmatprep.subr.bf16.mxu1 %v12343_v57 }
 0x40b   : > { %7867 = vmatprep.mubr.msk.f32.mxu0 %vm9131_vm0, %v12341_v43  ;;  %8776 = vmatprep.subr.bf16.mxu0 %v12343_v57 }
 0x40c   : > { %7721 = vmatmul.mubr.msk.f32.gmra.mrb[150].mxu1 %vm358_vm8, %v11682_v42  ;;  %7868 = vmatmul.mubr.msk.f32.gmra.mrb[150].mxu0 %vm358_vm8, %v11682_v42 }
 0x40d   : > { %8712 = vmatpush3.bf16.msra.mxu1 %v11125_v51  ;;  %8778 = vmatpush3.bf16.msra.mxu0 %v11438_v13  ;;  %v9059_v51 = vld [vmem:[#allocation2 + $0x8] sm:$0xff]  ;;  %v3933_v13 = vld [vmem:[#allocation2 + $0x10] sm:$0xff] }
 0x40e   : > { %7723 = vmatprep.mubr.msk.f32.mxu1 %vm9131_vm0, %v12341_v43  ;;  %8713 = vmatprep.subr.bf16.mxu1 %v12343_v57 }
 0x40f   : > { %7870 = vmatprep.mubr.msk.f32.mxu0 %vm9131_vm0, %v12341_v43  ;;  %8779 = vmatprep.subr.bf16.mxu0 %v12343_v57 }
 0x410   : > { %7724 = vmatmul.mubr.msk.f32.gmra.mrb[152].mxu1 %vm358_vm8, %v3218_v38  ;;  %7871 = vmatmul.mubr.msk.f32.gmra.mrb[152].mxu0 %vm358_vm8, %v3218_v38 }
 0x411   : > { %8716 = vmatpush3.bf16.msk.msra.mxu1 %vm10866_vm10, %v11460_v1  ;;  %8782 = vmatpush3.bf16.msk.msra.mxu0 %vm10866_vm10, %v11465_v34  ;;  %v3935_v1 = vld [vmem:[#allocation2 + $0x20] sm:$0xff]  ;;  %v3936_v34 = vld [vmem:[#allocation2 + $0x28] sm:$0xff] }
 0x412   : > { %7754 = vmatprep.mubr.msk.f32.mxu1 %vm9131_vm0, %v12341_v43  ;;  %8717 = vmatprep.subr.bf16.mxu1 %v12343_v57 }
 0x413   : > { %7901 = vmatprep.mubr.msk.f32.mxu0 %vm9131_vm0, %v12341_v43  ;;  %8783 = vmatprep.subr.bf16.mxu0 %v12343_v57 }
 0x414   : > { %7755 = vmatmul.mubr.msk.f32.vlgmr.msra.gmra.mrb[140].mxu1 %vm358_vm8, %v9059_v51  ;;  %7902 = vmatmul.mubr.msk.f32.vlgmr.msra.gmra.mrb[140].mxu0 %vm358_vm8, %v9059_v51 }
 0x415   : > { %8719 = vmatpush3.bf16.msra.mxu1 %v11483_v18  ;;  %8785 = vmatpush3.bf16.msra.mxu0 %v11490_v29  ;;  %v3937_v18 = vld [vmem:[#allocation2 + $0x30] sm:$0xff]  ;;  %v3938_v29 = vld [vmem:[#allocation2 + $0x38] sm:$0xff] }
 0x416   : > { %7757 = vmatprep.mubr.msk.f32.mxu1 %vm9131_vm0, %v12341_v43  ;;  %8720 = vmatprep.subr.bf16.mxu1 %v12343_v57 }
 0x417   : > { %7904 = vmatprep.mubr.msk.f32.mxu0 %vm9131_vm0, %v12341_v43  ;;  %8786 = vmatprep.subr.bf16.mxu0 %v12343_v57 }
 0x418   : > { %7758 = vmatmul.mubr.msk.f32.gmra.mrb[142].mxu1 %vm358_vm8, %v9060_v37  ;;  %7905 = vmatmul.mubr.msk.f32.gmra.mrb[142].mxu0 %vm358_vm8, %v9060_v37 }
 0x419   : > { %8722 = vmatpush3.bf16.msra.mxu1 %v11509_v32  ;;  %8788 = vmatpush3.bf16.msra.mxu0 %v11515_v22  ;;  %v3939_v32 = vld [vmem:[#allocation2 + $0x40] sm:$0xff]  ;;  %v5614_v22 = vld [vmem:[%s12302_s6 + $0x38] sm:$0xff] }
 0x41a   : > { %7760 = vmatprep.mubr.msk.f32.mxu1 %vm9131_vm0, %v12341_v43  ;;  %8723 = vmatprep.subr.bf16.mxu1 %v12343_v57 }
 0x41b   : > { %7907 = vmatprep.mubr.msk.f32.mxu0 %vm9131_vm0, %v12341_v43  ;;  %8789 = vmatprep.subr.bf16.mxu0 %v12343_v57 }
 0x41c   : > { %7761 = vmatmul.mubr.msk.f32.gmra.mrb[144].mxu1 %vm358_vm8, %v9061_v24  ;;  %7908 = vmatmul.mubr.msk.f32.gmra.mrb[144].mxu0 %vm358_vm8, %v9061_v24 }
 0x41d   : > { %8725 = vmatpush3.bf16.msra.mxu1 %v11529_v56  ;;  %8791 = vmatpush3.bf16.msra.mxu0 %v11535_v47  ;;  %v5615_v56 = vld [vmem:[%s12302_s6 + $0x40] sm:$0xff]  ;;  %v5616_v47 = vld [vmem:[%s12302_s6 + $0x48] sm:$0xff] }
 0x41e   : > { %7763 = vmatprep.mubr.msk.f32.mxu1 %vm9131_vm0, %v12341_v43  ;;  %8726 = vmatprep.subr.bf16.mxu1 %v12343_v57 }
 0x41f   : > { %7910 = vmatprep.mubr.msk.f32.mxu0 %vm9131_vm0, %v12341_v43  ;;  %8792 = vmatprep.subr.bf16.mxu0 %v12343_v57 }
 0x420   : > { %7764 = vmatmul.mubr.msk.f32.gmra.mrb[146].mxu1 %vm358_vm8, %v9062_v9  ;;  %7911 = vmatmul.mubr.msk.f32.gmra.mrb[146].mxu0 %vm358_vm8, %v9062_v9 }
 0x421   : > { %8728 = vmatpush3.bf16.msra.mxu1 %v11549_v52  ;;  %8794 = vmatpush3.bf16.msra.mxu0 %v11555_v25  ;;  %v8806_v52 = vpack.c.bf16 %v5615_v56, %v5614_v22  ;;  %v5617_v25 = vld [vmem:[%s12302_s6 + $0x50] sm:$0xff] }
 0x422   : > { %7766 = vmatprep.mubr.msk.f32.mxu1 %vm9131_vm0, %v12341_v43  ;;  %8729 = vmatprep.subr.bf16.mxu1 %v12343_v57 }
 0x423   : > { %7913 = vmatprep.mubr.msk.f32.mxu0 %vm9131_vm0, %v12341_v43  ;;  %8795 = vmatprep.subr.bf16.mxu0 %v12343_v57 }
 0x424   : > { %7767 = vmatmul.mubr.msk.f32.gmra.mrb[148].mxu1 %vm358_vm8, %v9063_v3  ;;  %7914 = vmatmul.mubr.msk.f32.gmra.mrb[148].mxu0 %vm358_vm8, %v9063_v3 }
 0x425   : > { %8731 = vmatpush3.bf16.msra.mxu1 %v11569_v15  ;;  %8797 = vmatpush3.bf16.msra.mxu0 %v11575_v19  ;;  %v8809_v15 = vpack.c.bf16 %v5617_v25, %v5616_v47  ;;  %v5618_v19 = vld [vmem:[%s12302_s6 + $0x58] sm:$0xff] }
 0x426   : > { %7769 = vmatprep.mubr.msk.f32.mxu1 %vm9131_vm0, %v12341_v43  ;;  %8732 = vmatprep.subr.bf16.mxu1 %v12343_v57 }
 0x427   : > { %7916 = vmatprep.mubr.msk.f32.mxu0 %vm9131_vm0, %v12341_v43  ;;  %8798 = vmatprep.subr.bf16.mxu0 %v12343_v57 }
 0x428   : > { %7770 = vmatmul.mubr.msk.f32.gmra.mrb[150].mxu1 %vm358_vm8, %v9064_v39  ;;  %7917 = vmatmul.mubr.msk.f32.gmra.mrb[150].mxu0 %vm358_vm8, %v9064_v39 }
 0x429   : > { %8734 = vmatpush3.bf16.msra.mxu1 %v11589_v33  ;;  %8800 = vmatpush3.bf16.msra.mxu0 %v11595_v61  ;;  %v8812_v33 = vpack.c.bf16 %v5619_v60, %v5618_v19  ;;  %v5640_v61 = vld [vmem:[%s12302_s6 + $0xe8] sm:$0xff]  ;;  %v12051_v60 = vld [vmem:[%s12301_s5] ss:$0 sm:$0xff] }
 0x42a   : > { %7772 = vmatprep.mubr.msk.f32.mxu1 %vm9131_vm0, %v12341_v43  ;;  %8735 = vmatprep.subr.bf16.mxu1 %v12343_v57  ;;  %v8842_v62 = vpack.c.bf16 %v5640_v61, %v5639_v55  ;;  %v4411_v19 = vld [vmem:[%s12302_s6 + $0x8] sm:$0xff] }
 0x42b   : > { %7919 = vmatprep.mubr.msk.f32.mxu0 %vm9131_vm0, %v12341_v43  ;;  %8801 = vmatprep.subr.bf16.mxu0 %v12343_v57 }
 0x42c   : > { %7773 = vmatmul.mubr.msk.f32.gmra.mrb[152].mxu1 %vm358_vm8, %v9065_v26  ;;  %7920 = vmatmul.mubr.msk.f32.gmra.mrb[152].mxu0 %vm358_vm8, %v9065_v26 }
 0x42d   : > { %8738 = vmatpush3.bf16.msk.msra.mxu1 %vm10866_vm10, %v11609_v50  ;;  %8804 = vmatpush3.bf16.msk.msra.mxu0 %vm10866_vm10, %v11615_v45  ;;  %v5642_v50 = vld [vmem:[%s12302_s6 + $0xf8] sm:$0xff]  ;;  %v5643_v45 = vld [vmem:[%s12302_s6 + $0x100] sm:$0xff] }
 0x42e   : > { %7803 = vmatprep.mubr.msk.f32.mxu1 %vm9131_vm0, %v12341_v43  ;;  %7950 = vmatprep.mubr.msk.f32.mxu0 %vm9131_vm0, %v12341_v43  ;;  %v8845_v63 = vpack.c.bf16 %v5642_v50, %v5641_v27  ;;  %v8848_v31 = vpack.c.bf16 %v5644_v4, %v5643_v45  ;;  %v4412_v4 = vld [vmem:[%s12302_s6 + $0x10] sm:$0xff] }
 0x42f   : > { %8805 = vmatprep.subr.bf16.mxu1 %v12343_v57  ;;  %8841 = vmatprep.subr.bf16.mxu0 %v12343_v57 }
 0x430   : > { %7804 = vmatmul.mubr.msk.f32.vlgmr.msra.gmra.mrb[140].mxu1 %vm358_vm8, %v3933_v13  ;;  %7951 = vmatmul.mubr.msk.f32.vlgmr.msra.gmra.mrb[140].mxu0 %vm358_vm8, %v3933_v13 }
 0x431   : > { %7806 = vmatprep.mubr.msk.f32.mxu1 %vm9131_vm0, %v12341_v43  ;;  %7953 = vmatprep.mubr.msk.f32.mxu0 %vm9131_vm0, %v12341_v43 }
 0x432   : > { %8807 = vmatpush3.bf16.msra.mxu1 %v8806_v52  ;;  %8843 = vmatpush3.bf16.msra.mxu0 %v8842_v62 }
 0x433   : > { %8808 = vmatprep.subr.bf16.mxu1 %v12343_v57  ;;  %8844 = vmatprep.subr.bf16.mxu0 %v12343_v57 }
 0x434   : > { %7807 = vmatmul.mubr.msk.f32.gmra.mrb[142].mxu1 %vm358_vm8, %v3934_v20  ;;  %7954 = vmatmul.mubr.msk.f32.gmra.mrb[142].mxu0 %vm358_vm8, %v3934_v20 }
 0x435   : > { %7809 = vmatprep.mubr.msk.f32.mxu1 %vm9131_vm0, %v12341_v43  ;;  %7956 = vmatprep.mubr.msk.f32.mxu0 %vm9131_vm0, %v12341_v43 }
 0x436   : > { %8810 = vmatpush3.bf16.msra.mxu1 %v8809_v15  ;;  %8846 = vmatpush3.bf16.msra.mxu0 %v8845_v63  ;;  %v4410_v15 = vld [vmem:[%s12302_s6] sm:$0xff] }
 0x437   : > { %8811 = vmatprep.subr.bf16.mxu1 %v12343_v57  ;;  %8847 = vmatprep.subr.bf16.mxu0 %v12343_v57  ;;  %v8815_v50 = vpack.c.bf16 %v4411_v19, %v4410_v15  ;;  %v5628_v15 = vld [vmem:[%s12302_s6 + $0x98] sm:$0xff] }
 0x438   : > { %7810 = vmatmul.mubr.msk.f32.gmra.mrb[144].mxu1 %vm358_vm8, %v3935_v1  ;;  %7957 = vmatmul.mubr.msk.f32.gmra.mrb[144].mxu0 %vm358_vm8, %v3935_v1 }
 0x439   : > { %7812 = vmatprep.mubr.msk.f32.mxu1 %vm9131_vm0, %v12341_v43  ;;  %7959 = vmatprep.mubr.msk.f32.mxu0 %vm9131_vm0, %v12341_v43 }
 0x43a   : > { %8813 = vmatpush3.bf16.msra.mxu1 %v8812_v33  ;;  %8849 = vmatpush3.bf16.msra.mxu0 %v8848_v31  ;;  %v4413_v31 = vld [vmem:[%s12302_s6 + $0x18] sm:$0xff] }
 0x43b   : > { %7983 = vmatprep.subr.mxu1 %v12341_v43  ;;  %8051 = vmatprep.subr.mxu0 %v12341_v43 }
 0x43c   : > { %7813 = vmatmul.mubr.msk.f32.gmra.mrb[146].mxu1 %vm358_vm8, %v3936_v34  ;;  %7960 = vmatmul.mubr.msk.f32.gmra.mrb[146].mxu0 %vm358_vm8, %v3936_v34 }
 0x43d   : > { %7815 = vmatprep.mubr.msk.f32.mxu1 %vm9131_vm0, %v12341_v43  ;;  %7962 = vmatprep.mubr.msk.f32.mxu0 %vm9131_vm0, %v12341_v43 }
 0x43e   : > { %7984 = vmatpush3.msra.mxu1 %v5620_v5  ;;  %8052 = vmatpush3.msra.mxu0 %v5645_v49 }
 0x43f   : > { %8814 = vmatprep.subr.bf16.mxu1 %v12343_v57  ;;  %8859 = vmatprep.subr.bf16.mxu0 %v12343_v57 }
 0x440   : > { %7816 = vmatmul.mubr.msk.f32.gmra.mrb[148].mxu1 %vm358_vm8, %v3937_v18  ;;  %7963 = vmatmul.mubr.msk.f32.gmra.mrb[148].mxu0 %vm358_vm8, %v3937_v18 }
 0x441   : > { %7818 = vmatprep.mubr.msk.f32.mxu1 %vm9131_vm0, %v12341_v43  ;;  %7965 = vmatprep.mubr.msk.f32.mxu0 %vm9131_vm0, %v12341_v43 }
 0x444   : > { %7819 = vmatmul.mubr.msk.f32.gmra.mrb[150].mxu1 %vm358_vm8, %v3938_v29  ;;  %7966 = vmatmul.mubr.msk.f32.gmra.mrb[150].mxu0 %vm358_vm8, %v3938_v29 }
 0x445   : > { %7821 = vmatprep.mubr.msk.f32.mxu1 %vm9131_vm0, %v12341_v43  ;;  %7968 = vmatprep.mubr.msk.f32.mxu0 %vm9131_vm0, %v12341_v43 }
 0x448   : > { %7822 = vmatmul.mubr.msk.f32.gmra.mrb[152].mxu1 %vm358_vm8, %v3939_v32  ;;  %7969 = vmatmul.mubr.msk.f32.gmra.mrb[152].mxu0 %vm358_vm8, %v3939_v32 }
 0x449   : > { %7985 = vmatprep.mubr.msk.f32.mxu1 %vm9131_vm0, %v12341_v43  ;;  %8053 = vmatprep.mubr.msk.f32.mxu0 %vm9131_vm0, %v12341_v43 }
 0x4af   : > { %v3324_v12 = vpop.f32.mrb[126].mxu1  ;;  %v3685_v7 = vpop.f32.mrb[126].mxu0 }
 0x4b0   : > { %v3726_v44 = vmax.f32 %v3324_v12, %v3685_v7  ;;  %v7511_v54 = vpop.f32.mrb[127].mxu1  ;;  %v7658_v30 = vpop.f32.mrb[127].mxu0 }
 0x4b1   : > { %v8818_v30 = vpack.c.bf16 %v4413_v31, %v4412_v4  ;;  %v5633_v31 = vld [vmem:[%s12302_s6 + $0xb8] sm:$0xff] }
 0x4b3   : > { %v3329_v14 = vpop.f32.mrb[128].mxu1  ;;  %v3690_v53 = vpop.f32.mrb[128].mxu0 }
 0x4b4   : > { %v3727_v28 = vmax.f32 %v3329_v14, %v3690_v53  ;;  %v7514_v2 = vpop.f32.mrb[129].mxu1  ;;  %v7661_v16 = vpop.f32.mrb[129].mxu0  ;;  %v4414_v53 = vld [vmem:[%s12302_s6 + $0x20] sm:$0xff] }
 0x4b7   : > { %v3334_v48 = vpop.f32.mrb[130].mxu1  ;;  %v3695_v6 = vpop.f32.mrb[130].mxu0 }
 0x4b8   : > { %v3728_v8 = vmax.f32 %v3334_v48, %v3695_v6  ;;  %v7517_v36 = vpop.f32.mrb[131].mxu1  ;;  %v7664_v40 = vpop.f32.mrb[131].mxu0 }
 0x4bb   : > { %v3339_v10 = vpop.f32.mrb[132].mxu1  ;;  %v3700_v42 = vpop.f32.mrb[132].mxu0 }
 0x4bc   : > { %v3729_v41 = vmax.f32 %v3339_v10, %v3700_v42  ;;  %v7520_v59 = vpop.f32.mrb[133].mxu1  ;;  %v7667_v11 = vpop.f32.mrb[133].mxu0  ;;  %v5655_v10 = vld [vmem:[%s12302_s6 + $0x150] sm:$0xff]  ;;  %v5656_v42 = vld [vmem:[%s12302_s6 + $0x158] sm:$0xff] }
 0x4bf   : > { %v3344_v35 = vpop.f32.mrb[134].mxu1  ;;  %v3705_v21 = vpop.f32.mrb[134].mxu0 }
 0x4c0   : > { %v3730_v46 = vmax.f32 %v3344_v35, %v3705_v21  ;;  %v7523_v38 = vpop.f32.mrb[135].mxu1  ;;  %v7670_v23 = vpop.f32.mrb[135].mxu0 }
 0x4c1   : > { %v5623_v23 = vld [vmem:[%s12302_s6 + $0x70] sm:$0xff] }
 0x4c3   : > { %v12030_v58 = vpop.f32.mrb[136].mxu1  ;;  %v12032_v17 = vpop.f32.mrb[136].mxu0 }
 0x4c4   : > { %v3731_v0 = vmax.f32 %v12030_v58, %v12032_v17  ;;  %v7526_v51 = vpop.f32.mrb[137].mxu1  ;;  %v7673_v37 = vpop.f32.mrb[137].mxu0  ;;  %v4416_v58 = vld [vmem:[%s12302_s6 + $0x30] sm:$0xff]  ;;  %v5657_v17 = vld [vmem:[%s12302_s6 + $0x160] sm:$0xff] }
 0x4c5   : > { %v5624_v51 = vld [vmem:[%s12302_s6 + $0x78] sm:$0xff]  ;;  %v8860_v37 = vpack.c.bf16 %v5656_v42, %v5655_v10 }
 0x4c7   : > { %v12036_v24 = vpop.f32.mrb[138].mxu1  ;;  %v12038_v9 = vpop.f32.mrb[138].mxu0 }
 0x4c8   : > { %v3732_v3 = vmax.f32 %v12036_v24, %v12038_v9  ;;  %v7529_v39 = vpop.f32.mrb[139].mxu1  ;;  %v7676_v26 = vpop.f32.mrb[139].mxu0  ;;  %v5659_v24 = vld [vmem:[%s12302_s6 + $0x170] sm:$0xff]  ;;  %v5660_v9 = vld [vmem:[%s12302_s6 + $0x178] sm:$0xff] }
 0x4c9   : > { %v8866_v19 = vpack.c.bf16 %v5660_v9, %v5659_v24 }
 0x503   : > { %v4027_v13 = vpop.f32.mrb[140].mxu1  ;;  %v4341_v20 = vpop.f32.mrb[140].mxu0 }
 0x504   : > { %v4068_v1 = vmax.f32 %v3726_v44, %v4027_v13  ;;  %v7805_v34 = vpop.f32.mrb[141].mxu1  ;;  %v7952_v18 = vpop.f32.mrb[141].mxu0 }
 0x506   : > { %v4382_v29 = vmax.f32 %v4068_v1, %v4341_v20  ;;  %v8824_v1 = vpack.c.bf16 %v5624_v51, %v5623_v23 }
 0x507   : > { %v4032_v32 = vpop.f32.mrb[142].mxu1  ;;  %v4346_v22 = vpop.f32.mrb[142].mxu0 }
 0x508   : > { %v4069_v56 = vmax.f32 %v3727_v28, %v4032_v32  ;;  %v7808_v47 = vpop.f32.mrb[143].mxu1  ;;  %v7955_v52 = vpop.f32.mrb[143].mxu0  ;;  %v4415_v28 = vld [vmem:[%s12302_s6 + $0x28] sm:$0xff]  ;;  %v4396_v11 = vadd.f32 %v12051_v60, %v4382_v29 }
 0x509   : > { %v8821_v36 = vpack.c.bf16 %v4415_v28, %v4414_v53 }
 0x50a   : > { %v4383_v25 = vmax.f32 %v4069_v56, %v4346_v22  ;;  %v4403_v34 = vmax.f32 %v4396_v11, 0.0  ;;  %v5625_v22 = vld [vmem:[%s12302_s6 + $0x80] sm:$0xff]  ;;  %v5626_v56 = vld [vmem:[%s12302_s6 + $0x88] sm:$0xff] }
 0x50b   : > { %v4037_v33 = vpop.f32.mrb[144].mxu1  ;;  %v12053_v55 = vpop.f32.mrb[144].mxu0 }
 0x50c   : > { %v4397_v61 = vadd.f32 %v12051_v60, %v4383_v25  ;;  %v12056_v62 = vmax.f32 %v3728_v8, %v4037_v33  ;;  %v7811_v5 = vpop.f32.mrb[145].mxu1  ;;  %v7958_v27 = vpop.f32.mrb[145].mxu0  ;;  %v5627_v25 = vld [vmem:[%s12302_s6 + $0x90] sm:$0xff] }
 0x50d   : > { %v8830_v33 = vpack.c.bf16 %v5628_v15, %v5627_v25  ;;  %v5661_v27 = vld [vmem:[%s12302_s6 + $0x180] sm:$0xff] }
 0x50e   : > { %v4404_v63 = vmax.f32 %v4397_v61, 0.0  ;;  %v4384_v45 = vmax.f32 %v12056_v62, %v12053_v55  ;;  %v5629_v55 = vld [vmem:[%s12302_s6 + $0xa0] sm:$0xff] }
 0x50f   : > { %v4042_v49 = vpop.f32.mrb[146].mxu1  ;;  %v12066_v12 = vpop.f32.mrb[146].mxu0 }
 0x510   : > { %v12068_v7 = vmax.f32 %v3729_v41, %v4042_v49  ;;  %v7814_v44 = vpop.f32.mrb[147].mxu1  ;;  %v7961_v54 = vpop.f32.mrb[147].mxu0  ;;  %7986 = vmatmul.mubr.msk.f32.vlgmr.msra.gmra.mrb[154].mxu1 %vm4425_vm11, %v4404_v63  ;;  %v4398_v5 = vadd.f32 %v12051_v60, %v4384_v45  ;;  %v5632_v63 = vld [vmem:[%s12302_s6 + $0xb0] sm:$0xff]  ;;  %v5634_v49 = vld [vmem:[%s12302_s6 + $0xc0] sm:$0xff] }
 0x511   : > { %8816 = vmatpush3.bf16.msra.mxu1 %v8815_v50  ;;  %8002 = vmatprep.mubr.msk.f32.mxu1 %vm9131_vm0, %v12341_v43  ;;  %v5631_v50 = vld [vmem:[%s12302_s6 + $0xa8] sm:$0xff]  ;;  %v8836_v44 = vpack.c.bf16 %v5634_v49, %v5633_v31 }
 0x512   : > { %v4385_v14 = vmax.f32 %v12068_v7, %v12066_v12  ;;  %8817 = vmatprep.subr.bf16.mxu1 %v12343_v57  ;;  %v8833_v62 = vpack.c.bf16 %v5632_v63, %v5631_v50  ;;  %v4405_v45 = vmax.f32 %v4398_v5, 0.0  ;;  %v5635_v54 = vld [vmem:[%s12302_s6 + $0xc8] sm:$0xff]  ;;  %v5650_v7 = vld [vmem:[%s12302_s6 + $0x130] sm:$0xff] }
 0x513   : > { %v4047_v2 = vpop.f32.mrb[148].mxu1  ;;  %v4361_v16 = vpop.f32.mrb[148].mxu0  ;;  %v5649_v12 = vld [vmem:[%s12302_s6 + $0x128] sm:$0xff] }
 0x514   : > { %v4072_v48 = vmax.f32 %v3730_v46, %v4047_v2  ;;  %v7817_v6 = vpop.f32.mrb[149].mxu1  ;;  %v7964_v8 = vpop.f32.mrb[149].mxu0  ;;  %v4399_v28 = vadd.f32 %v12051_v60, %v4385_v14  ;;  %v5647_v2 = vld [vmem:[%s12302_s6 + $0x118] sm:$0xff]  ;;  %v8854_v14 = vpack.c.bf16 %v5650_v7, %v5649_v12 }
 0x515   : > { %8819 = vmatpush3.bf16.msra.mxu1 %v8818_v30  ;;  %v5636_v30 = vld [vmem:[%s12302_s6 + $0xd0] sm:$0xff] }
 0x516   : > { %v4386_v40 = vmax.f32 %v4072_v48, %v4361_v16  ;;  %8820 = vmatprep.subr.bf16.mxu1 %v12343_v57  ;;  %v8839_v53 = vpack.c.bf16 %v5636_v30, %v5635_v54  ;;  %v5648_v16 = vld [vmem:[%s12302_s6 + $0x120] sm:$0xff]  ;;  %v5637_v48 = vld [vmem:[%s12302_s6 + $0xd8] sm:$0xff]  ;;  %v4406_v8 = vmax.f32 %v4399_v28, 0.0 }
 0x517   : > { %v4052_v41 = vpop.f32.mrb[150].mxu1  ;;  %v12089_v59 = vpop.f32.mrb[150].mxu0  ;;  %v8851_v6 = vpack.c.bf16 %v5648_v16, %v5647_v2 }
 0x518   : > { %v4400_v35 = vadd.f32 %v12051_v60, %v4386_v40  ;;  %v12096_v21 = vmax.f32 %v3731_v0, %v4052_v41  ;;  %v7820_v46 = vpop.f32.mrb[151].mxu1  ;;  %v7967_v38 = vpop.f32.mrb[151].mxu0  ;;  %v5658_v0 = vld [vmem:[%s12302_s6 + $0x168] sm:$0xff]  ;;  %v5652_v40 = vld [vmem:[%s12302_s6 + $0x140] sm:$0xff] }
 0x519   : > { %8822 = vmatpush3.bf16.msra.mxu1 %v8821_v36  ;;  %v8863_v47 = vpack.c.bf16 %v5658_v0, %v5657_v17  ;;  %v5651_v36 = vld [vmem:[%s12302_s6 + $0x138] sm:$0xff]  ;;  %v5653_v41 = vld [vmem:[%s12302_s6 + $0x148] sm:$0xff] }
 0x51a   : > { %v4407_v39 = vmax.f32 %v4400_v35, 0.0  ;;  %v4387_v26 = vmax.f32 %v12096_v21, %v12089_v59  ;;  %8000 = vmatprep.subr.mxu1 %v12341_v43  ;;  %v8857_v10 = vpack.c.bf16 %v5652_v40, %v5651_v36  ;;  %v4992_v59 = vld [vmem:[%s12304_s8 + $0x8] sm:$0xff]  ;;  %v4993_v21 = vld [vmem:[%s12304_s8 + $0x10] sm:$0xff] }
 0x51b   : > { %v4057_v13 = vpop.f32.mrb[152].mxu1  ;;  %v4371_v20 = vpop.f32.mrb[152].mxu0 }
 0x51c   : > { %v4074_v18 = vmax.f32 %v3732_v3, %v4057_v13  ;;  %v7823_v29 = vpop.f32.mrb[153].mxu1  ;;  %v7970_v32 = vpop.f32.mrb[153].mxu0  ;;  %8054 = vmatmul.mubr.msk.f32.vlgmr.msra.gmra.mrb[154].mxu0 %vm4425_vm11, %v4407_v39  ;;  %v8827_v3 = vpack.c.bf16 %v5626_v56, %v5625_v22  ;;  %v4401_v42 = vadd.f32 %v12051_v60, %v4387_v26 }
 0x51d   : > { %8001 = vmatpush3.msra.mxu1 %v4416_v58  ;;  %8861 = vmatpush3.bf16.msra.mxu0 %v8860_v37 }
 0x51e   : > { %v4388_v52 = vmax.f32 %v4074_v18, %v4371_v20  ;;  %8003 = vmatmul.mubr.msk.f32.vlgmr.msra.gmra.mrb[156].mxu1 %vm4425_vm11, %v4403_v34  ;;  %8823 = vmatprep.subr.bf16.mxu1 %v12343_v57  ;;  %v4408_v11 = vmax.f32 %v4401_v42, 0.0 }
 0x51f   : > { %8825 = vmatpush3.bf16.msra.mxu1 %v8824_v1  ;;  %8862 = vmatprep.subr.bf16.mxu0 %v12343_v57 }
 0x520   : > { %8826 = vmatprep.subr.bf16.mxu1 %v12343_v57  ;;  %8087 = vmatprep.mubr.msk.f32.mxu0 %vm9131_vm0, %v12341_v43  ;;  %v4402_v61 = vadd.f32 %v12051_v60, %v4388_v52  ;;  %v4991_v60 = vld [vmem:[%s12304_s8] sm:$0xff] }
 0x521   : > { %8864 = vmatpush3.bf16.msra.mxu0 %v8863_v47  ;;  %8019 = vmatprep.mubr.msk.f32.mxu1 %vm9131_vm0, %v12341_v43  ;;  %v8869_v35 = vpack.c.bf16 %v4992_v59, %v4991_v60  ;;  %v5663_v47 = vld [vmem:[%s12303_s7] ss:$0 sm:$0xff] }
 0x522   : > { %8865 = vmatprep.subr.bf16.mxu0 %v12343_v57  ;;  %v4409_v4 = vmax.f32 %v4402_v61, 0.0 }
 0x523   : > { %8828 = vmatpush3.bf16.msra.mxu1 %v8827_v3  ;;  %v5664_v3 = vld [vmem:[%s12305_s9] ss:$0 sm:$0xff] }
 0x524   : > { %8829 = vmatprep.subr.bf16.mxu1 %v12343_v57 }
 0x525   : > { %8867 = vmatpush3.bf16.msra.mxu0 %v8866_v19 }
 0x526   : > { %8085 = vmatprep.subr.mxu0 %v12341_v43 }
 0x527   : > { %8831 = vmatpush3.bf16.msra.mxu1 %v8830_v33 }
 0x528   : > { %8017 = vmatprep.subr.mxu1 %v12341_v43 }
 0x529   : > { %8086 = vmatpush3.msra.mxu0 %v5661_v27 }
 0x52a   : > { %8088 = vmatmul.mubr.msk.f32.vlgmr.msra.gmra.mrb[156].mxu0 %vm4425_vm11, %v4409_v4 }
 0x52b   : > { %8018 = vmatpush3.msra.mxu1 %v5629_v55 }
 0x52c   : > { %8020 = vmatmul.mubr.msk.f32.vlgmr.msra.gmra.mrb[158].mxu1 %vm4425_vm11, %v4405_v45  ;;  %8832 = vmatprep.subr.bf16.mxu1 %v12343_v57 }
 0x52d   : > { %8834 = vmatpush3.bf16.msra.mxu1 %v8833_v62  ;;  %8036 = vmatprep.mubr.msk.f32.mxu1 %vm9131_vm0, %v12341_v43 }
 0x52e   : > { %8835 = vmatprep.subr.bf16.mxu1 %v12343_v57 }
 0x531   : > { %8837 = vmatpush3.bf16.msra.mxu1 %v8836_v44 }
 0x532   : > { %8838 = vmatprep.subr.bf16.mxu1 %v12343_v57 }
 0x535   : > { %8840 = vmatpush3.bf16.msra.mxu1 %v8839_v53 }
 0x536   : > { %8034 = vmatprep.subr.mxu1 %v12341_v43 }
 0x539   : > { %8035 = vmatpush3.msra.mxu1 %v5637_v48 }
 0x53a   : > { %8037 = vmatmul.mubr.msk.f32.vlgmr.msra.gmra.mrb[160].mxu1 %vm4425_vm11, %v4406_v8  ;;  %8850 = vmatprep.subr.bf16.mxu1 %v12343_v57 }
 0x53b   : > { %8852 = vmatpush3.bf16.msra.mxu1 %v8851_v6  ;;  %8070 = vmatprep.mubr.msk.f32.mxu1 %vm9131_vm0, %v12341_v43 }
 0x53c   : > { %8853 = vmatprep.subr.bf16.mxu1 %v12343_v57 }
 0x53f   : > { %8855 = vmatpush3.bf16.msra.mxu1 %v8854_v14 }
 0x540   : > { %8856 = vmatprep.subr.bf16.mxu1 %v12343_v57 }
 0x543   : > { %8858 = vmatpush3.bf16.msra.mxu1 %v8857_v10 }
 0x544   : > { %8068 = vmatprep.subr.mxu1 %v12341_v43 }
 0x547   : > { %8069 = vmatpush3.msra.mxu1 %v5653_v41 }
 0x548   : > { %8071 = vmatmul.mubr.msk.f32.vlgmr.msra.gmra.mrb[162].mxu1 %vm4425_vm11, %v4408_v11  ;;  %8868 = vmatprep.subr.bf16.mxu1 %v12343_v57 }
 0x549   : > { %8098 = vmatprep.mubr.msk.f32.mxu1 %vm9131_vm0, %v12341_v43  ;;  %8870 = vmatpush3.bf16.msra.mxu1 %v8869_v35  ;;  %v4994_v43 = vld [vmem:[%s12304_s8 + $0x18] sm:$0xff] }
 0x54a   : > { %8871 = vmatprep.subr.bf16.mxu1 %v12343_v57  ;;  %v8872_v46 = vpack.c.bf16 %v4994_v43, %v4993_v21 }
 0x54d   : > { %8873 = vmatpush3.bf16.msra.mxu1 %v8872_v46 }
 0x5e3   : > { %v4495_v38 = vpop.f32.mrb[154].mxu1 }
 0x5e4   : > { %v7987_v23 = vpop.f32.mrb[155].mxu1 }
 0x5ef   : > { %v4813_v51 = vpop.f32.mrb[154].mxu0 }
 0x5f0   : > { %v8055_v37 = vpop.f32.mrb[155].mxu0 }
 0x5f1   : > { %v4568_v39 = vpop.f32.mrb[156].mxu1 }
 0x5f2   : > { %v4569_v26 = vadd.f32 %v4568_v39, %v4495_v38  ;;  %v8004_v58 = vpop.f32.mrb[157].mxu1 }
 0x5fd   : > { %v4977_v17 = vpop.f32.mrb[156].mxu0 }
 0x5fe   : > { %v8089_v0 = vpop.f32.mrb[157].mxu0 }
 0x5ff   : > { %v4649_v57 = vpop.f32.mrb[158].mxu1 }
 0x600   : > { %v4653_v13 = vadd.f32 %v4649_v57, %v4569_v26  ;;  %v8021_v20 = vpop.f32.mrb[159].mxu1 }
 0x60d   : > { %v4731_v1 = vpop.f32.mrb[160].mxu1 }
 0x60e   : > { %v4735_v34 = vadd.f32 %v4731_v1, %v4653_v13  ;;  %v8038_v18 = vpop.f32.mrb[161].mxu1 }
 0x610   : > { %v4817_v29 = vadd.f32 %v4813_v51, %v4735_v34 }
 0x61b   : > { %v4895_v32 = vpop.f32.mrb[162].mxu1 }
 0x61c   : > { %v4899_v22 = vadd.f32 %v4895_v32, %v4817_v29  ;;  %v8072_v56 = vpop.f32.mrb[163].mxu1 }
 0x61e   : > { %v4981_v52 = vadd.f32 %v4977_v17, %v4899_v22 }
 0x620   : > { %v4989_v24 = vadd.f32 %v5663_v47, %v4981_v52 }
 0x622   : > { %v4990_v9 = vmax.f32 %v4989_v24, 0.0 }
 0x624   : > { %8099 = vmatmul.mubr.msk.f32.vlgmr.msra.gmra.mrb[164].mxu1 %vm5002_vm12, %v4990_v9 }
 0x6f7   : > { %v5072_v25 = vpop.f32.mrb[164].mxu1 }
 0x6f8   : > { %v5073_v15 = vadd.f32 %v5664_v3, %v5072_v25  ;;  %v8100_v19 = vpop.f32.mrb[165].mxu1 }
 0x6fa   : > { %5077 = vst.msk [vmem:[%s352_s26] sm:$0xff] %vm5076_vm13, %v5073_v15 }
 0x6fb   : > { %9079 = shalt.err (!%p9076_p3)
}
 0x6fc   : > { %s9080_s21 = scalar_lea.hbm %s12254_s12, 128  ;;  %s9084_s26 = scalar_lea.hbm %s12306_s10, 256 }
 0x6fd   : > { %p9081_p4 = scmp.ne.s32.totalorder %s12254_s12, %s9080_s21  ;;  %p9085_p9 = scmp.lt.u32.totalorder %s12254_s12, %s12306_s10 }
 0x6fe   : > { %p9086_p10 = scmp.lt.u32.totalorder %s9084_s26, %s9080_s21  ;;  %p9088_p12 = scmp.lt.u32.totalorder %s9080_s21, %s12254_s12 }
 0x6ff   : > { %p9082_p7 = pnand %p9081_p4, %p9228_p5 }
 0x700   : > { %p9087_p11 = por %p9086_p10, %p9085_p9 }
 0x701   : > { %p9083_p8 = pneg %p9082_p7 }
 0x702   : > { %p9089_p13 = por %p9088_p12, %p9087_p11 }
 0x704   : > { %p9090_p0 = pnand %p9089_p13, %p9083_p8 }
 0x706   : > { %9093 = shalt.err (!%p9090_p0)
}
 0x707   : > { %9015 = dma.vmem_to_hbm [thread:$0]  (%p9228_p5), %s12256_s28, 128, %s12254_s12, %s5079_s27  }
 0x708 PF: > { %p9021_p1 = scmp.ge.s32.totalorder %s9128_s16, 2  ;;  %s5104_s20 = sand.u32 1, %s9116_s13  }
 0x709   : > { %s5105_s17 = scalar_lea.sflag [#allocation4], %s5104_s20 }
 0x70a   : > { %p9018_p2 = pnand %p9021_p1, %p9232_p6 }
 0x70c   : > { %9111 = dma.done.wait (!%p9018_p2), %s5105_s17, 128  }
 0x70d   : > { %9113 = vsyncadd (!%p9018_p2), %s5105_s17, 4294967168  ;;  %s12397_s25 = sld [smem:[#allocation6_spill]]  ;;  %p20_p3 = scmp.ge.s32.totalorder %s9215_s19, 4  }
 0x70e   : > { %s12398_s13 = smov %s9120_s14  ;;  %s12399_s14 = smov %s9124_s15 }
 0x70f   : > { %s12401_s16 = smov %s9215_s19  ;;  %22 = sbr.rel (!%p20_p3) target bundleno = 3 (0x3), region = 114 }
 0x713   : > { %s12400_s15 = smov %s12397_s25 }
 0x716   :  { %5110 = vsyncpa [#allocation4], 1 }
 0x717   :  { %5112 = vsyncpa [#allocation4 + $0x1], 1 }

</bundles_post_ra>
